<compile_context>
chip_gen: v7x
topology: tpu7x:2x2x1
jax: 0.10.0
libtpu: 0.0.40
codegen_flags: <defaults>
</compile_context>

<pallas_src>
import functools

import jax
import jax.numpy as jnp
import numpy as np
from jax.experimental import pallas as pl
from jax.experimental.pallas import tpu as pltpu

NUM_FILTERS = 64
KSIZE = 3                    # odd kernel size ('same' padding)
NUM_BLOCKS = 5
EPS = 1e-5
C2 = 2 * NUM_FILTERS         # both branches packed on the lane axis -> 128


# ----------------------------------------------------------------------------
# The single fused kernel: conv stacks (both branches, lane-packed) + FC head
# ----------------------------------------------------------------------------
def _fused_kernel(slab0_ref, ctr0_ref,
                  w1a_ref, t1a_ref, w2a_ref, t2a_ref, wsa_ref, bsa_ref,
                  w1r_ref, t1r_ref, w2r_ref, t2r_ref, wsr_ref, bsr_ref,
                  wfc_ref, tfc_ref, wf1_ref, tf1_ref, wf2_ref, tf2_ref,
                  wf3_ref, bf3_ref,
                  o_ref, act_ref, tmp_ref, *, N, L, K, NR):
    """Activation layout: (rows, 128) where rows =
    [G guard | (G pad, L data, G pad) x N | G guard] and lanes = [seqs | dotb].
    A 'same' conv is one matmul of a (W, K*C) slab of K sublane-shifted views
    against a (K*C, 128) branch-block-diagonal weight."""
    G = K // 2
    Lp = L + 2 * G
    W = N * Lp

    # Zero only the guard rows of the two working buffers (data/pad rows are
    # fully overwritten, with the pad mask applied, every block).
    zrow = jnp.zeros((G, C2), jnp.float32)
    act_ref[pl.ds(0, G), :] = zrow
    act_ref[pl.ds(W + G, G), :] = zrow
    tmp_ref[pl.ds(0, G), :] = zrow
    tmp_ref[pl.ds(W + G, G), :] = zrow

    # Pad-row mask built in-kernel from an iota (no DMA, no mod/div).
    row = jax.lax.broadcasted_iota(jnp.int32, (W, C2), 0)
    inside = (row >= G) & (row < G + L)
    for n in range(1, N):
        lo = n * Lp + G
        inside = inside | ((row >= lo) & (row < lo + L))
    mask = inside.astype(jnp.float32)            # 1.0 on data rows, 0.0 on pads

    def leaky(v, slope):
        return jnp.where(v > 0.0, v, slope * v)

    def run_block(slab1, center, w1, t1, w2, t2, ws, bs):
        # conv1 (taps folded into one contraction) + folded bias/BN + LeakyReLU
        h1 = leaky(jnp.dot(slab1.astype(jnp.bfloat16), w1,
                           preferred_element_type=jnp.float32) + t1, 0.01) * mask
        # 1x1 shortcut (plain conv, no BN / activation) on the block input
        s = jnp.dot(center.astype(jnp.bfloat16), ws,
                    preferred_element_type=jnp.float32) + bs
        # stage h1 so conv2 can read sublane-shifted views of it
        tmp_ref[pl.ds(G, W), :] = h1
        slab2 = jnp.concatenate([tmp_ref[pl.ds(k, W), :] for k in range(K)],
                                axis=1).astype(jnp.bfloat16)
        # conv2 + folded bias/BN + LeakyReLU, then residual add, then mask
        h2 = (leaky(jnp.dot(slab2, w2, preferred_element_type=jnp.float32)
                    + t2, 0.01) + s) * mask
        act_ref[pl.ds(G, W), :] = h2

    # Block 0: its tap slab / centre view are pre-built on the host (C_in tiny).
    run_block(slab0_ref[...], ctr0_ref[...],
              w1a_ref[...], t1a_ref[...], w2a_ref[...], t2a_ref[...],
              wsa_ref[...], bsa_ref[...])

    # Blocks 1..4: read / write the VMEM-resident activation buffer.
    for i in range(NR):
        pieces = [act_ref[pl.ds(k, W), :] for k in range(K)]
        run_block(jnp.concatenate(pieces, axis=1), pieces[G],
                  w1r_ref[i], t1r_ref[i], w2r_ref[i], t2r_ref[i],
                  wsr_ref[i], bsr_ref[i])

    # -------------------------- fused FC head --------------------------------
    # Flattened (position-major, branch-lane-packed) features per batch element,
    # gathered straight from the VMEM activation buffer (no HBM writeback).
    feats = []
    for n in range(N):
        base = n * Lp + 2 * G
        feats.append(jnp.concatenate(
            [act_ref[pl.ds(base + d, 1), :] for d in range(L)], axis=1))
    feat = jnp.concatenate(feats, axis=0).astype(jnp.bfloat16)    # (N, L*128)

    # first_fc_x and first_fc_z as ONE block-structured matmul -> (N, 128)
    h = jnp.dot(feat, wfc_ref[...],
                preferred_element_type=jnp.float32) + tfc_ref[...]
    h = leaky(h, 0.1)
    # hx + hz: after the 64-lane roll-add, BOTH halves hold the branch sum, so
    # fc1's weight is zero-padded to (128, 64) and no lane slicing is needed.
    h = h + pltpu.roll(h, 64, 1)
    h = leaky(jnp.dot(h, wf1_ref[...],
                      preferred_element_type=jnp.float32) + tf1_ref[...], 0.1)
    h = leaky(jnp.dot(h, wf2_ref[...],
                      preferred_element_type=jnp.float32) + tf2_ref[...], 0.1)
    o_ref[...] = jnp.dot(h, wf3_ref[...],
                         preferred_element_type=jnp.float32) + bf3_ref[...]


# ----------------------------------------------------------------------------
# Forward pass wrapper (combined_CNN, include_dotb=True, eval mode)
# ----------------------------------------------------------------------------
def combined_cnn_forward(packed, x, z):
    N, Cin, L = x.shape
    assert z.shape == (N, Cin, L)
    K = KSIZE
    G = K // 2
    Lp = L + 2 * G
    W = N * Lp
    Wb = W + 2 * G

    # Tiny host-side layout prep of the raw inputs (a few KB, once per call):
    # branch lane-pack, per-batch 'same' zero padding, guard rows, and the K
    # tap-shifted copies for block 0 concatenated on the lane axis.
    a = jnp.concatenate([x, z], axis=1)            # (N, 2C, L)  lanes: [x | z]
    a = jnp.transpose(a, (0, 2, 1))                # (N, L, 2C)
    a = jnp.pad(a, ((0, 0), (G, G), (0, 0)))       # per-batch conv padding
    a = a.reshape(W, 2 * Cin)                      # content rows (pads inline)
    padded = jnp.pad(a, ((G, G), (0, 0)))          # + guard rows -> (Wb, 2C)
    slab0 = jnp.concatenate([padded[k:k + W, :] for k in range(K)], axis=1)
    ctr0 = a                                       # un-shifted (1x1 shortcut in)

    args = (slab0, ctr0) + tuple(packed)

    def full_spec(arr):
        nd = arr.ndim
        return pl.BlockSpec(arr.shape, lambda i, _nd=nd: (0,) * _nd)

    kernel = functools.partial(_fused_kernel, N=N, L=L, K=K, NR=NUM_BLOCKS - 1)
    return pl.pallas_call(
        kernel,
        out_shape=jax.ShapeDtypeStruct((N, 1), jnp.float32),
        grid=(1,),
        in_specs=[full_spec(arr) for arr in args],
        out_specs=pl.BlockSpec((N, 1), lambda i: (0, 0)),
        scratch_shapes=[pltpu.VMEM((Wb, C2), jnp.float32),   # block outputs
                        pltpu.VMEM((Wb, C2), jnp.float32)],  # intra-block h1
        compiler_params=pltpu.CompilerParams(
            dimension_semantics=("arbitrary",),
            vmem_limit_bytes=32 * 1024 * 1024),
    )(*args)


# ----------------------------------------------------------------------------
# Host-side parameter folding / packing (done once, outside the hot path)
# ----------------------------------------------------------------------------
def _bn_fold(gamma, beta, mean, var):
    scale = gamma / jnp.sqrt(var + EPS)
    shift = beta - mean * scale
    return scale, shift


def _fold_conv(w, b, bn):
    """(C_out, C_in, K) conv + bias + BN -> (K, C_in, C_out) scaled taps, shift."""
    scale, shift = _bn_fold(*bn)
    wt = jnp.transpose(w * scale[:, None, None], (2, 1, 0))
    return wt, scale * b + shift


def _pack_conv_pair(bx, bz, wk, bk, bnk):
    """Branch-block-diagonal, tap-packed conv weight: (K*2*C_in, 128) bf16."""
    wx, tx = _fold_conv(bx[wk], bx[bk], bx[bnk])
    wz, tz = _fold_conv(bz[wk], bz[bk], bz[bnk])
    K, Cin, Cout = wx.shape
    taps = []
    for k in range(K):
        blk = jnp.zeros((2 * Cin, 2 * Cout), jnp.float32)
        blk = blk.at[:Cin, :Cout].set(wx[k])
        blk = blk.at[Cin:, Cout:].set(wz[k])
        taps.append(blk)
    w = jnp.concatenate(taps, axis=0).astype(jnp.bfloat16)
    t = jnp.concatenate([tx, tz]).reshape(1, -1)
    return w, t


def _pack_shortcut_pair(bx, bz):
    wx = bx['ws'][:, :, 0].T
    wz = bz['ws'][:, :, 0].T
    Cin, Cout = wx.shape
    blk = jnp.zeros((2 * Cin, 2 * Cout), jnp.float32)
    blk = blk.at[:Cin, :Cout].set(wx)
    blk = blk.at[Cin:, Cout:].set(wz)
    bs = jnp.concatenate([bx['bs'], bz['bs']]).reshape(1, -1)
    return blk.astype(jnp.bfloat16), bs


def _fold_first_fc_pair(px, pz, L):
    """first_fc_x + first_fc_z as one block-structured (L*128, 128) bf16 matmul;
    rows permuted from torch's (c*L + l) flatten to the kernel's
    (l, packed-channel) layout (x -> output lanes 0:64, z -> 64:128)."""
    C = NUM_FILTERS
    sx, hx = _bn_fold(*px['bn'])
    sz, hz = _bn_fold(*pz['bn'])
    wx = (px['w'].T * sx[None, :]).reshape(C, L, -1).transpose(1, 0, 2)
    wz = (pz['w'].T * sz[None, :]).reshape(C, L, -1).transpose(1, 0, 2)
    w = jnp.zeros((L, 2 * C, 2 * C), jnp.float32)
    w = w.at[:, :C, :C].set(wx)
    w = w.at[:, C:, C:].set(wz)
    w = w.reshape(L * 2 * C, 2 * C).astype(jnp.bfloat16)
    t = jnp.concatenate([sx * px['b'] + hx, sz * pz['b'] + hz]).reshape(1, -1)
    return w, t


def _fold_linear(w, b, bn):
    scale, shift = _bn_fold(*bn)
    return w.T * scale[None, :], (scale * b + shift).reshape(1, -1)


def pack_params(raw, L):
    bxs, bzs = raw['seqs_conv'], raw['dotb_conv']
    w1a, t1a = _pack_conv_pair(bxs[0], bzs[0], 'w1', 'b1', 'bn1')
    w2a, t2a = _pack_conv_pair(bxs[0], bzs[0], 'w2', 'b2', 'bn2')
    wsa, bsa = _pack_shortcut_pair(bxs[0], bzs[0])

    w1r, t1r, w2r, t2r, wsr, bsr = [], [], [], [], [], []
    for bx, bz in zip(bxs[1:], bzs[1:]):
        a, ta = _pack_conv_pair(bx, bz, 'w1', 'b1', 'bn1')
        c, tc = _pack_conv_pair(bx, bz, 'w2', 'b2', 'bn2')
        s, bs = _pack_shortcut_pair(bx, bz)
        w1r.append(a); t1r.append(ta)
        w2r.append(c); t2r.append(tc)
        wsr.append(s); bsr.append(bs)

    wfc, tfc = _fold_first_fc_pair(raw['first_fc_x'], raw['first_fc_z'], L)
    wf1, tf1 = _fold_linear(raw['fc1']['w'], raw['fc1']['b'], raw['fc1']['bn'])
    wf1 = jnp.concatenate([wf1, jnp.zeros_like(wf1)], axis=0)  # (128,64), roll trick
    wf2, tf2 = _fold_linear(raw['fc2']['w'], raw['fc2']['b'], raw['fc2']['bn'])
    wf3 = raw['fc3']['w'].T
    bf3 = raw['fc3']['b'].reshape(1, 1)

    return (w1a, t1a, w2a, t2a, wsa, bsa,
            jnp.stack(w1r), jnp.stack(t1r), jnp.stack(w2r), jnp.stack(t2r),
            jnp.stack(wsr), jnp.stack(bsr),
            wfc, tfc, wf1, tf1, wf2, tf2, wf3, bf3)


# ----------------------------------------------------------------------------
# Deterministic "raw" (PyTorch-shaped) parameters
# ----------------------------------------------------------------------------
def init_params(key, c_in, L):
    ks = iter(jax.random.split(key, 512))

    def rnd(shape, s=0.1):
        return jax.random.normal(next(ks), shape, jnp.float32) * s

    def bn(n):
        gamma = 1.0 + rnd((n,), 0.05)
        beta = rnd((n,), 0.05)
        mean = rnd((n,), 0.05)
        var = 1.0 + jnp.abs(rnd((n,), 0.05))
        return (gamma, beta, mean, var)

    def res_block(cin):
        return dict(
            w1=rnd((NUM_FILTERS, cin, KSIZE)), b1=rnd((NUM_FILTERS,)),
            bn1=bn(NUM_FILTERS),
            w2=rnd((NUM_FILTERS, NUM_FILTERS, KSIZE)), b2=rnd((NUM_FILTERS,)),
            bn2=bn(NUM_FILTERS),
            ws=rnd((NUM_FILTERS, cin, 1)), bs=rnd((NUM_FILTERS,)),
        )

    def conv_stack(cin):
        blocks, c = [], cin
        for _ in range(NUM_BLOCKS):
            blocks.append(res_block(c))
            c = NUM_FILTERS
        return blocks

    def fc(fin, fout, with_bn=True):
        p = dict(w=rnd((fout, fin)), b=rnd((fout,)))
        if with_bn:
            p['bn'] = bn(fout)
        return p

    return dict(
        seqs_conv=conv_stack(c_in),
        dotb_conv=conv_stack(c_in),
        first_fc_x=fc(NUM_FILTERS * L, 64),
        first_fc_z=fc(NUM_FILTERS * L, 64),
        fc1=fc(64, 64),
        fc2=fc(64, 16),
        fc3=fc(16, 1, with_bn=False),
    )


# ----------------------------------------------------------------------------
# Pure-JAX reference (eval-mode semantics of the PyTorch module)
# ----------------------------------------------------------------------------
def _leaky(v, slope):
    return jnp.where(v > 0, v, slope * v)


def _ref_conv(x, w, b):
    out = jax.lax.conv_general_dilated(
        x, w, window_strides=(1,), padding='SAME',
        dimension_numbers=('NCH', 'OIH', 'NCH'),
        precision=jax.lax.Precision.HIGHEST)
    return out + b[None, :, None]


def _ref_bn_c(x, bn):
    gamma, beta, mean, var = bn
    return ((x - mean[None, :, None]) / jnp.sqrt(var[None, :, None] + EPS)
            * gamma[None, :, None] + beta[None, :, None])


def _ref_bn_f(x, bn):
    gamma, beta, mean, var = bn
    return ((x - mean[None, :]) / jnp.sqrt(var[None, :] + EPS)
            * gamma[None, :] + beta[None, :])


def _ref_block(x, p):
    h = _leaky(_ref_bn_c(_ref_conv(x, p['w1'], p['b1']), p['bn1']), 0.01)
    h = _leaky(_ref_bn_c(_ref_conv(h, p['w2'], p['b2']), p['bn2']), 0.01)
    return h + _ref_conv(x, p['ws'], p['bs'])


def _ref_linear(x, w, b):
    return jnp.dot(x, w.T, precision=jax.lax.Precision.HIGHEST) + b[None, :]


def reference_forward(raw, x, z):
    for blk in raw['seqs_conv']:
        x = _ref_block(x, blk)
    for blk in raw['dotb_conv']:
        z = _ref_block(z, blk)
    n = x.shape[0]
    xf, zf = x.reshape(n, -1), z.reshape(n, -1)
    p = raw['first_fc_x']
    hx = _leaky(_ref_bn_f(_ref_linear(xf, p['w'], p['b']), p['bn']), 0.1)
    p = raw['first_fc_z']
    hz = _leaky(_ref_bn_f(_ref_linear(zf, p['w'], p['b']), p['bn']), 0.1)
    h = hx + hz
    p = raw['fc1']
    h = _leaky(_ref_bn_f(_ref_linear(h, p['w'], p['b']), p['bn']), 0.1)
    p = raw['fc2']
    h = _leaky(_ref_bn_f(_ref_linear(h, p['w'], p['b']), p['bn']), 0.1)
    p = raw['fc3']
    return _ref_linear(h, p['w'], p['b'])


# ----------------------------------------------------------------------------
if __name__ == "__main__":
    N, C_IN, L = 2, 4, 16        # (batch, channels, length) for both branches

    key = jax.random.PRNGKey(0)
    kx, kz, kp = jax.random.split(key, 3)
    x = jax.random.normal(kx, (N, C_IN, L), jnp.float32)
    z = jax.random.normal(kz, (N, C_IN, L), jnp.float32)

    raw = init_params(kp, C_IN, L)
    packed = pack_params(raw, L)

    out = jax.jit(combined_cnn_forward)(packed, x, z)
    out = jax.block_until_ready(out)
    assert out.shape == (N, 1) and out.dtype == jnp.float32

    ref = jax.block_until_ready(jax.jit(reference_forward)(raw, x, z))
    # bf16 matmul operands in the kernel vs. f32/HIGHEST reference.
    np.testing.assert_allclose(np.asarray(out), np.asarray(ref),
                               rtol=5e-2, atol=2e-2)

    print("KERNEL_OK")
</pallas_src>

<mosaic_0001>
module attributes {stable_mosaic.version = 11 : i64} {
  func.func @_fused_kernel(%arg0: i32, %arg1: memref<36x24xf32, #tpu.memory_space<vmem>>, %arg2: memref<36x8xf32, #tpu.memory_space<vmem>>, %arg3: memref<24x128xbf16, #tpu.memory_space<vmem>>, %arg4: memref<1x128xf32, #tpu.memory_space<vmem>>, %arg5: memref<384x128xbf16, #tpu.memory_space<vmem>>, %arg6: memref<1x128xf32, #tpu.memory_space<vmem>>, %arg7: memref<8x128xbf16, #tpu.memory_space<vmem>>, %arg8: memref<1x128xf32, #tpu.memory_space<vmem>>, %arg9: memref<4x384x128xbf16, #tpu.memory_space<vmem>>, %arg10: memref<4x1x128xf32, #tpu.memory_space<vmem>>, %arg11: memref<4x384x128xbf16, #tpu.memory_space<vmem>>, %arg12: memref<4x1x128xf32, #tpu.memory_space<vmem>>, %arg13: memref<4x128x128xbf16, #tpu.memory_space<vmem>>, %arg14: memref<4x1x128xf32, #tpu.memory_space<vmem>>, %arg15: memref<2048x128xbf16, #tpu.memory_space<vmem>>, %arg16: memref<1x128xf32, #tpu.memory_space<vmem>>, %arg17: memref<128x64xf32, #tpu.memory_space<vmem>>, %arg18: memref<1x64xf32, #tpu.memory_space<vmem>>, %arg19: memref<64x16xf32, #tpu.memory_space<vmem>>, %arg20: memref<1x16xf32, #tpu.memory_space<vmem>>, %arg21: memref<16x1xf32, #tpu.memory_space<vmem>>, %arg22: memref<1x1xf32, #tpu.memory_space<vmem>>, %arg23: memref<2x1xf32, #tpu.memory_space<vmem>>, %arg24: memref<38x128xf32, #tpu.memory_space<vmem>>, %arg25: memref<38x128xf32, #tpu.memory_space<vmem>>) attributes {dimension_semantics = [#tpu.dimension_semantics<arbitrary>], iteration_bounds = array<i64: 1>, scalar_prefetch = 0 : i64, scratch_operands = 2 : i64, tpu.core_type = #tpu.core_type<tc>, window_params = [{pipeline_mode = #tpu.pipeline_mode<synchronous>, transform_indices = @transform_0, window_bounds = array<i64: 36, 24>}, {pipeline_mode = #tpu.pipeline_mode<synchronous>, transform_indices = @transform_1, window_bounds = array<i64: 36, 8>}, {pipeline_mode = #tpu.pipeline_mode<synchronous>, transform_indices = @transform_2, window_bounds = array<i64: 24, 128>}, {pipeline_mode = #tpu.pipeline_mode<synchronous>, transform_indices = @transform_3, window_bounds = array<i64: 1, 128>}, {pipeline_mode = #tpu.pipeline_mode<synchronous>, transform_indices = @transform_4, window_bounds = array<i64: 384, 128>}, {pipeline_mode = #tpu.pipeline_mode<synchronous>, transform_indices = @transform_5, window_bounds = array<i64: 1, 128>}, {pipeline_mode = #tpu.pipeline_mode<synchronous>, transform_indices = @transform_6, window_bounds = array<i64: 8, 128>}, {pipeline_mode = #tpu.pipeline_mode<synchronous>, transform_indices = @transform_7, window_bounds = array<i64: 1, 128>}, {pipeline_mode = #tpu.pipeline_mode<synchronous>, transform_indices = @transform_8, window_bounds = array<i64: 4, 384, 128>}, {pipeline_mode = #tpu.pipeline_mode<synchronous>, transform_indices = @transform_9, window_bounds = array<i64: 4, 1, 128>}, {pipeline_mode = #tpu.pipeline_mode<synchronous>, transform_indices = @transform_10, window_bounds = array<i64: 4, 384, 128>}, {pipeline_mode = #tpu.pipeline_mode<synchronous>, transform_indices = @transform_11, window_bounds = array<i64: 4, 1, 128>}, {pipeline_mode = #tpu.pipeline_mode<synchronous>, transform_indices = @transform_12, window_bounds = array<i64: 4, 128, 128>}, {pipeline_mode = #tpu.pipeline_mode<synchronous>, transform_indices = @transform_13, window_bounds = array<i64: 4, 1, 128>}, {pipeline_mode = #tpu.pipeline_mode<synchronous>, transform_indices = @transform_14, window_bounds = array<i64: 2048, 128>}, {pipeline_mode = #tpu.pipeline_mode<synchronous>, transform_indices = @transform_15, window_bounds = array<i64: 1, 128>}, {pipeline_mode = #tpu.pipeline_mode<synchronous>, transform_indices = @transform_16, window_bounds = array<i64: 128, 64>}, {pipeline_mode = #tpu.pipeline_mode<synchronous>, transform_indices = @transform_17, window_bounds = array<i64: 1, 64>}, {pipeline_mode = #tpu.pipeline_mode<synchronous>, transform_indices = @transform_18, window_bounds = array<i64: 64, 16>}, {pipeline_mode = #tpu.pipeline_mode<synchronous>, transform_indices = @transform_19, window_bounds = array<i64: 1, 16>}, {pipeline_mode = #tpu.pipeline_mode<synchronous>, transform_indices = @transform_20, window_bounds = array<i64: 16, 1>}, {pipeline_mode = #tpu.pipeline_mode<synchronous>, transform_indices = @transform_21, window_bounds = array<i64: 1, 1>}, {pipeline_mode = #tpu.pipeline_mode<synchronous>, transform_indices = @transform_22, window_bounds = array<i64: 2, 1>}]} {
    %cst = arith.constant 0.000000e+00 : f32
    %0 = vector.broadcast %cst : f32 to vector<1x128xf32>
    %c0 = arith.constant 0 : index
    %c0_0 = arith.constant 0 : index
    %1 = vector.load %arg24[%c0, %c0_0] : memref<38x128xf32, #tpu.memory_space<vmem>>, vector<1x128xf32>
    tpu.vector_store %arg24[%c0, %c0_0], %0 {strides = array<i32>} : memref<38x128xf32, #tpu.memory_space<vmem>>, vector<1x128xf32>,
    %c37 = arith.constant 37 : index
    %c0_1 = arith.constant 0 : index
    %2 = vector.load %arg24[%c37, %c0_1] : memref<38x128xf32, #tpu.memory_space<vmem>>, vector<1x128xf32>
    tpu.vector_store %arg24[%c37, %c0_1], %0 {strides = array<i32>} : memref<38x128xf32, #tpu.memory_space<vmem>>, vector<1x128xf32>,
    %c0_2 = arith.constant 0 : index
    %c0_3 = arith.constant 0 : index
    %3 = vector.load %arg25[%c0_2, %c0_3] : memref<38x128xf32, #tpu.memory_space<vmem>>, vector<1x128xf32>
    tpu.vector_store %arg25[%c0_2, %c0_3], %0 {strides = array<i32>} : memref<38x128xf32, #tpu.memory_space<vmem>>, vector<1x128xf32>,
    %c37_4 = arith.constant 37 : index
    %c0_5 = arith.constant 0 : index
    %4 = vector.load %arg25[%c37_4, %c0_5] : memref<38x128xf32, #tpu.memory_space<vmem>>, vector<1x128xf32>
    tpu.vector_store %arg25[%c37_4, %c0_5], %0 {strides = array<i32>} : memref<38x128xf32, #tpu.memory_space<vmem>>, vector<1x128xf32>,
    %5 = tpu.iota {dimensions = array<i32: 0>} : vector<36x128xi32>
    %c1_i32 = arith.constant 1 : i32
    %6 = vector.broadcast %c1_i32 : i32 to vector<36x128xi32>
    %7 = arith.cmpi sge, %5, %6 : vector<36x128xi32>
    %c17_i32 = arith.constant 17 : i32
    %8 = vector.broadcast %c17_i32 : i32 to vector<36x128xi32>
    %9 = arith.cmpi slt, %5, %8 : vector<36x128xi32>
    %10 = arith.andi %7, %9 : vector<36x128xi1>
    %c19_i32 = arith.constant 19 : i32
    %11 = vector.broadcast %c19_i32 : i32 to vector<36x128xi32>
    %12 = arith.cmpi sge, %5, %11 : vector<36x128xi32>
    %c35_i32 = arith.constant 35 : i32
    %13 = vector.broadcast %c35_i32 : i32 to vector<36x128xi32>
    %14 = arith.cmpi slt, %5, %13 : vector<36x128xi32>
    %15 = arith.andi %12, %14 : vector<36x128xi1>
    %16 = arith.ori %10, %15 : vector<36x128xi1>
    %17 = arith.extui %16 : vector<36x128xi1> to vector<36x128xi32>
    %18 = arith.sitofp %17 : vector<36x128xi32> to vector<36x128xf32>
    %c0_6 = arith.constant 0 : index
    %c0_7 = arith.constant 0 : index
    %19 = vector.load %arg1[%c0_6, %c0_7] : memref<36x24xf32, #tpu.memory_space<vmem>>, vector<36x24xf32>
    %c0_8 = arith.constant 0 : index
    %c0_9 = arith.constant 0 : index
    %20 = vector.load %arg2[%c0_8, %c0_9] : memref<36x8xf32, #tpu.memory_space<vmem>>, vector<36x8xf32>
    %c0_10 = arith.constant 0 : index
    %c0_11 = arith.constant 0 : index
    %21 = vector.load %arg3[%c0_10, %c0_11] : memref<24x128xbf16, #tpu.memory_space<vmem>>, vector<24x128xbf16>
    %c0_12 = arith.constant 0 : index
    %c0_13 = arith.constant 0 : index
    %22 = vector.load %arg4[%c0_12, %c0_13] : memref<1x128xf32, #tpu.memory_space<vmem>>, vector<1x128xf32>
    %c0_14 = arith.constant 0 : index
    %c0_15 = arith.constant 0 : index
    %23 = vector.load %arg5[%c0_14, %c0_15] : memref<384x128xbf16, #tpu.memory_space<vmem>>, vector<384x128xbf16>
    %c0_16 = arith.constant 0 : index
    %c0_17 = arith.constant 0 : index
    %24 = vector.load %arg6[%c0_16, %c0_17] : memref<1x128xf32, #tpu.memory_space<vmem>>, vector<1x128xf32>
    %c0_18 = arith.constant 0 : index
    %c0_19 = arith.constant 0 : index
    %25 = vector.load %arg7[%c0_18, %c0_19] : memref<8x128xbf16, #tpu.memory_space<vmem>>, vector<8x128xbf16>
    %c0_20 = arith.constant 0 : index
    %c0_21 = arith.constant 0 : index
    %26 = vector.load %arg8[%c0_20, %c0_21] : memref<1x128xf32, #tpu.memory_space<vmem>>, vector<1x128xf32>
    %27 = arith.truncf %19 : vector<36x24xf32> to vector<36x24xbf16>
    %cst_22 = arith.constant dense<0.000000e+00> : vector<36x128xf32>
    %28 = tpu.matmul %27, %21, %cst_22 {dimension_numbers = #tpu.dot_dimension_numbers<[1], [0], [0], [1], [0, 0, 1, 1], [], []>} : vector<36x24xbf16>, vector<24x128xbf16>, vector<36x128xf32> -> vector<36x128xf32>
    %29 = vector.broadcast %22 : vector<1x128xf32> to vector<36x128xf32>
    %30 = arith.addf %28, %29 : vector<36x128xf32>
    %cst_23 = arith.constant 0.000000e+00 : f32
    %31 = vector.broadcast %cst_23 : f32 to vector<36x128xf32>
    %32 = arith.cmpf ogt, %30, %31 : vector<36x128xf32>
    %cst_24 = arith.constant 0.00999999977 : f32
    %33 = vector.broadcast %cst_24 : f32 to vector<36x128xf32>
    %34 = arith.mulf %33, %30 : vector<36x128xf32>
    %35 = arith.select %32, %30, %34 : vector<36x128xi1>, vector<36x128xf32>
    %36 = arith.mulf %35, %18 : vector<36x128xf32>
    %37 = arith.truncf %20 : vector<36x8xf32> to vector<36x8xbf16>
    %cst_25 = arith.constant dense<0.000000e+00> : vector<36x128xf32>
    %38 = tpu.matmul %37, %25, %cst_25 {dimension_numbers = #tpu.dot_dimension_numbers<[1], [0], [0], [1], [0, 0, 1, 1], [], []>} : vector<36x8xbf16>, vector<8x128xbf16>, vector<36x128xf32> -> vector<36x128xf32>
    %39 = vector.broadcast %26 : vector<1x128xf32> to vector<36x128xf32>
    %40 = arith.addf %38, %39 : vector<36x128xf32>
    %c1 = arith.constant 1 : index
    %c0_26 = arith.constant 0 : index
    %41 = vector.load %arg25[%c1, %c0_26] : memref<38x128xf32, #tpu.memory_space<vmem>>, vector<36x128xf32>
    tpu.vector_store %arg25[%c1, %c0_26], %36 {strides = array<i32>} : memref<38x128xf32, #tpu.memory_space<vmem>>, vector<36x128xf32>,
    %c0_27 = arith.constant 0 : index
    %c0_28 = arith.constant 0 : index
    %42 = vector.load %arg25[%c0_27, %c0_28] : memref<38x128xf32, #tpu.memory_space<vmem>>, vector<36x128xf32>
    %c1_29 = arith.constant 1 : index
    %c0_30 = arith.constant 0 : index
    %43 = vector.load %arg25[%c1_29, %c0_30] : memref<38x128xf32, #tpu.memory_space<vmem>>, vector<36x128xf32>
    %c2 = arith.constant 2 : index
    %c0_31 = arith.constant 0 : index
    %44 = vector.load %arg25[%c2, %c0_31] : memref<38x128xf32, #tpu.memory_space<vmem>>, vector<36x128xf32>
    %45 = tpu.concatenate %42, %43, %44 in 1 : vector<36x128xf32>, vector<36x128xf32>, vector<36x128xf32> -> vector<36x384xf32>
    %46 = arith.truncf %45 : vector<36x384xf32> to vector<36x384xbf16>
    %cst_32 = arith.constant dense<0.000000e+00> : vector<36x128xf32>
    %47 = tpu.matmul %46, %23, %cst_32 {dimension_numbers = #tpu.dot_dimension_numbers<[1], [0], [0], [1], [0, 0, 1, 1], [], []>} : vector<36x384xbf16>, vector<384x128xbf16>, vector<36x128xf32> -> vector<36x128xf32>
    %48 = vector.broadcast %24 : vector<1x128xf32> to vector<36x128xf32>
    %49 = arith.addf %47, %48 : vector<36x128xf32>
    %cst_33 = arith.constant 0.000000e+00 : f32
    %50 = vector.broadcast %cst_33 : f32 to vector<36x128xf32>
    %51 = arith.cmpf ogt, %49, %50 : vector<36x128xf32>
    %cst_34 = arith.constant 0.00999999977 : f32
    %52 = vector.broadcast %cst_34 : f32 to vector<36x128xf32>
    %53 = arith.mulf %52, %49 : vector<36x128xf32>
    %54 = arith.select %51, %49, %53 : vector<36x128xi1>, vector<36x128xf32>
    %55 = arith.addf %54, %40 : vector<36x128xf32>
    %56 = arith.mulf %55, %18 : vector<36x128xf32>
    %c1_35 = arith.constant 1 : index
    %c0_36 = arith.constant 0 : index
    %57 = vector.load %arg24[%c1_35, %c0_36] : memref<38x128xf32, #tpu.memory_space<vmem>>, vector<36x128xf32>
    tpu.vector_store %arg24[%c1_35, %c0_36], %56 {strides = array<i32>} : memref<38x128xf32, #tpu.memory_space<vmem>>, vector<36x128xf32>,
    %c0_37 = arith.constant 0 : index
    %c0_38 = arith.constant 0 : index
    %58 = vector.load %arg24[%c0_37, %c0_38] : memref<38x128xf32, #tpu.memory_space<vmem>>, vector<36x128xf32>
    %c1_39 = arith.constant 1 : index
    %c0_40 = arith.constant 0 : index
    %59 = vector.load %arg24[%c1_39, %c0_40] : memref<38x128xf32, #tpu.memory_space<vmem>>, vector<36x128xf32>
    %c2_41 = arith.constant 2 : index
    %c0_42 = arith.constant 0 : index
    %60 = vector.load %arg24[%c2_41, %c0_42] : memref<38x128xf32, #tpu.memory_space<vmem>>, vector<36x128xf32>
    %61 = tpu.concatenate %58, %59, %60 in 1 : vector<36x128xf32>, vector<36x128xf32>, vector<36x128xf32> -> vector<36x384xf32>
    %c0_43 = arith.constant 0 : index
    %c0_44 = arith.constant 0 : index
    %c0_45 = arith.constant 0 : index
    %62 = vector.load %arg9[%c0_43, %c0_44, %c0_45] : memref<4x384x128xbf16, #tpu.memory_space<vmem>>, vector<1x384x128xbf16>
    %63 = vector.shape_cast %62 : vector<1x384x128xbf16> to vector<384x128xbf16>
    %c0_46 = arith.constant 0 : index
    %c0_47 = arith.constant 0 : index
    %c0_48 = arith.constant 0 : index
    %64 = vector.load %arg10[%c0_46, %c0_47, %c0_48] : memref<4x1x128xf32, #tpu.memory_space<vmem>>, vector<1x1x128xf32>
    %65 = vector.shape_cast %64 : vector<1x1x128xf32> to vector<1x128xf32>
    %c0_49 = arith.constant 0 : index
    %c0_50 = arith.constant 0 : index
    %c0_51 = arith.constant 0 : index
    %66 = vector.load %arg11[%c0_49, %c0_50, %c0_51] : memref<4x384x128xbf16, #tpu.memory_space<vmem>>, vector<1x384x128xbf16>
    %67 = vector.shape_cast %66 : vector<1x384x128xbf16> to vector<384x128xbf16>
    %c0_52 = arith.constant 0 : index
    %c0_53 = arith.constant 0 : index
    %c0_54 = arith.constant 0 : index
    %68 = vector.load %arg12[%c0_52, %c0_53, %c0_54] : memref<4x1x128xf32, #tpu.memory_space<vmem>>, vector<1x1x128xf32>
    %69 = vector.shape_cast %68 : vector<1x1x128xf32> to vector<1x128xf32>
    %c0_55 = arith.constant 0 : index
    %c0_56 = arith.constant 0 : index
    %c0_57 = arith.constant 0 : index
    %70 = vector.load %arg13[%c0_55, %c0_56, %c0_57] : memref<4x128x128xbf16, #tpu.memory_space<vmem>>, vector<1x128x128xbf16>
    %71 = vector.shape_cast %70 : vector<1x128x128xbf16> to vector<128x128xbf16>
    %c0_58 = arith.constant 0 : index
    %c0_59 = arith.constant 0 : index
    %c0_60 = arith.constant 0 : index
    %72 = vector.load %arg14[%c0_58, %c0_59, %c0_60] : memref<4x1x128xf32, #tpu.memory_space<vmem>>, vector<1x1x128xf32>
    %73 = vector.shape_cast %72 : vector<1x1x128xf32> to vector<1x128xf32>
    %74 = arith.truncf %61 : vector<36x384xf32> to vector<36x384xbf16>
    %cst_61 = arith.constant dense<0.000000e+00> : vector<36x128xf32>
    %75 = tpu.matmul %74, %63, %cst_61 {dimension_numbers = #tpu.dot_dimension_numbers<[1], [0], [0], [1], [0, 0, 1, 1], [], []>} : vector<36x384xbf16>, vector<384x128xbf16>, vector<36x128xf32> -> vector<36x128xf32>
    %76 = vector.broadcast %65 : vector<1x128xf32> to vector<36x128xf32>
    %77 = arith.addf %75, %76 : vector<36x128xf32>
    %cst_62 = arith.constant 0.000000e+00 : f32
    %78 = vector.broadcast %cst_62 : f32 to vector<36x128xf32>
    %79 = arith.cmpf ogt, %77, %78 : vector<36x128xf32>
    %cst_63 = arith.constant 0.00999999977 : f32
    %80 = vector.broadcast %cst_63 : f32 to vector<36x128xf32>
    %81 = arith.mulf %80, %77 : vector<36x128xf32>
    %82 = arith.select %79, %77, %81 : vector<36x128xi1>, vector<36x128xf32>
    %83 = arith.mulf %82, %18 : vector<36x128xf32>
    %84 = arith.truncf %59 : vector<36x128xf32> to vector<36x128xbf16>
    %cst_64 = arith.constant dense<0.000000e+00> : vector<36x128xf32>
    %85 = tpu.matmul %84, %71, %cst_64 {dimension_numbers = #tpu.dot_dimension_numbers<[1], [0], [0], [1], [0, 0, 1, 1], [], []>} : vector<36x128xbf16>, vector<128x128xbf16>, vector<36x128xf32> -> vector<36x128xf32>
    %86 = vector.broadcast %73 : vector<1x128xf32> to vector<36x128xf32>
    %87 = arith.addf %85, %86 : vector<36x128xf32>
    %c1_65 = arith.constant 1 : index
    %c0_66 = arith.constant 0 : index
    %88 = vector.load %arg25[%c1_65, %c0_66] : memref<38x128xf32, #tpu.memory_space<vmem>>, vector<36x128xf32>
    tpu.vector_store %arg25[%c1_65, %c0_66], %83 {strides = array<i32>} : memref<38x128xf32, #tpu.memory_space<vmem>>, vector<36x128xf32>,
    %c0_67 = arith.constant 0 : index
    %c0_68 = arith.constant 0 : index
    %89 = vector.load %arg25[%c0_67, %c0_68] : memref<38x128xf32, #tpu.memory_space<vmem>>, vector<36x128xf32>
    %c1_69 = arith.constant 1 : index
    %c0_70 = arith.constant 0 : index
    %90 = vector.load %arg25[%c1_69, %c0_70] : memref<38x128xf32, #tpu.memory_space<vmem>>, vector<36x128xf32>
    %c2_71 = arith.constant 2 : index
    %c0_72 = arith.constant 0 : index
    %91 = vector.load %arg25[%c2_71, %c0_72] : memref<38x128xf32, #tpu.memory_space<vmem>>, vector<36x128xf32>
    %92 = tpu.concatenate %89, %90, %91 in 1 : vector<36x128xf32>, vector<36x128xf32>, vector<36x128xf32> -> vector<36x384xf32>
    %93 = arith.truncf %92 : vector<36x384xf32> to vector<36x384xbf16>
    %cst_73 = arith.constant dense<0.000000e+00> : vector<36x128xf32>
    %94 = tpu.matmul %93, %67, %cst_73 {dimension_numbers = #tpu.dot_dimension_numbers<[1], [0], [0], [1], [0, 0, 1, 1], [], []>} : vector<36x384xbf16>, vector<384x128xbf16>, vector<36x128xf32> -> vector<36x128xf32>
    %95 = vector.broadcast %69 : vector<1x128xf32> to vector<36x128xf32>
    %96 = arith.addf %94, %95 : vector<36x128xf32>
    %cst_74 = arith.constant 0.000000e+00 : f32
    %97 = vector.broadcast %cst_74 : f32 to vector<36x128xf32>
    %98 = arith.cmpf ogt, %96, %97 : vector<36x128xf32>
    %cst_75 = arith.constant 0.00999999977 : f32
    %99 = vector.broadcast %cst_75 : f32 to vector<36x128xf32>
    %100 = arith.mulf %99, %96 : vector<36x128xf32>
    %101 = arith.select %98, %96, %100 : vector<36x128xi1>, vector<36x128xf32>
    %102 = arith.addf %101, %87 : vector<36x128xf32>
    %103 = arith.mulf %102, %18 : vector<36x128xf32>
    %c1_76 = arith.constant 1 : index
    %c0_77 = arith.constant 0 : index
    %104 = vector.load %arg24[%c1_76, %c0_77] : memref<38x128xf32, #tpu.memory_space<vmem>>, vector<36x128xf32>
    tpu.vector_store %arg24[%c1_76, %c0_77], %103 {strides = array<i32>} : memref<38x128xf32, #tpu.memory_space<vmem>>, vector<36x128xf32>,
    %c0_78 = arith.constant 0 : index
    %c0_79 = arith.constant 0 : index
    %105 = vector.load %arg24[%c0_78, %c0_79] : memref<38x128xf32, #tpu.memory_space<vmem>>, vector<36x128xf32>
    %c1_80 = arith.constant 1 : index
    %c0_81 = arith.constant 0 : index
    %106 = vector.load %arg24[%c1_80, %c0_81] : memref<38x128xf32, #tpu.memory_space<vmem>>, vector<36x128xf32>
    %c2_82 = arith.constant 2 : index
    %c0_83 = arith.constant 0 : index
    %107 = vector.load %arg24[%c2_82, %c0_83] : memref<38x128xf32, #tpu.memory_space<vmem>>, vector<36x128xf32>
    %108 = tpu.concatenate %105, %106, %107 in 1 : vector<36x128xf32>, vector<36x128xf32>, vector<36x128xf32> -> vector<36x384xf32>
    %c1_84 = arith.constant 1 : index
    %c0_85 = arith.constant 0 : index
    %c0_86 = arith.constant 0 : index
    %109 = vector.load %arg9[%c1_84, %c0_85, %c0_86] : memref<4x384x128xbf16, #tpu.memory_space<vmem>>, vector<1x384x128xbf16>
    %110 = vector.shape_cast %109 : vector<1x384x128xbf16> to vector<384x128xbf16>
    %c1_87 = arith.constant 1 : index
    %c0_88 = arith.constant 0 : index
    %c0_89 = arith.constant 0 : index
    %111 = vector.load %arg10[%c1_87, %c0_88, %c0_89] : memref<4x1x128xf32, #tpu.memory_space<vmem>>, vector<1x1x128xf32>
    %112 = vector.shape_cast %111 : vector<1x1x128xf32> to vector<1x128xf32>
    %c1_90 = arith.constant 1 : index
    %c0_91 = arith.constant 0 : index
    %c0_92 = arith.constant 0 : index
    %113 = vector.load %arg11[%c1_90, %c0_91, %c0_92] : memref<4x384x128xbf16, #tpu.memory_space<vmem>>, vector<1x384x128xbf16>
    %114 = vector.shape_cast %113 : vector<1x384x128xbf16> to vector<384x128xbf16>
    %c1_93 = arith.constant 1 : index
    %c0_94 = arith.constant 0 : index
    %c0_95 = arith.constant 0 : index
    %115 = vector.load %arg12[%c1_93, %c0_94, %c0_95] : memref<4x1x128xf32, #tpu.memory_space<vmem>>, vector<1x1x128xf32>
    %116 = vector.shape_cast %115 : vector<1x1x128xf32> to vector<1x128xf32>
    %c1_96 = arith.constant 1 : index
    %c0_97 = arith.constant 0 : index
    %c0_98 = arith.constant 0 : index
    %117 = vector.load %arg13[%c1_96, %c0_97, %c0_98] : memref<4x128x128xbf16, #tpu.memory_space<vmem>>, vector<1x128x128xbf16>
    %118 = vector.shape_cast %117 : vector<1x128x128xbf16> to vector<128x128xbf16>
    %c1_99 = arith.constant 1 : index
    %c0_100 = arith.constant 0 : index
    %c0_101 = arith.constant 0 : index
    %119 = vector.load %arg14[%c1_99, %c0_100, %c0_101] : memref<4x1x128xf32, #tpu.memory_space<vmem>>, vector<1x1x128xf32>
    %120 = vector.shape_cast %119 : vector<1x1x128xf32> to vector<1x128xf32>
    %121 = arith.truncf %108 : vector<36x384xf32> to vector<36x384xbf16>
    %cst_102 = arith.constant dense<0.000000e+00> : vector<36x128xf32>
    %122 = tpu.matmul %121, %110, %cst_102 {dimension_numbers = #tpu.dot_dimension_numbers<[1], [0], [0], [1], [0, 0, 1, 1], [], []>} : vector<36x384xbf16>, vector<384x128xbf16>, vector<36x128xf32> -> vector<36x128xf32>
    %123 = vector.broadcast %112 : vector<1x128xf32> to vector<36x128xf32>
    %124 = arith.addf %122, %123 : vector<36x128xf32>
    %cst_103 = arith.constant 0.000000e+00 : f32
    %125 = vector.broadcast %cst_103 : f32 to vector<36x128xf32>
    %126 = arith.cmpf ogt, %124, %125 : vector<36x128xf32>
    %cst_104 = arith.constant 0.00999999977 : f32
    %127 = vector.broadcast %cst_104 : f32 to vector<36x128xf32>
    %128 = arith.mulf %127, %124 : vector<36x128xf32>
    %129 = arith.select %126, %124, %128 : vector<36x128xi1>, vector<36x128xf32>
    %130 = arith.mulf %129, %18 : vector<36x128xf32>
    %131 = arith.truncf %106 : vector<36x128xf32> to vector<36x128xbf16>
    %cst_105 = arith.constant dense<0.000000e+00> : vector<36x128xf32>
    %132 = tpu.matmul %131, %118, %cst_105 {dimension_numbers = #tpu.dot_dimension_numbers<[1], [0], [0], [1], [0, 0, 1, 1], [], []>} : vector<36x128xbf16>, vector<128x128xbf16>, vector<36x128xf32> -> vector<36x128xf32>
    %133 = vector.broadcast %120 : vector<1x128xf32> to vector<36x128xf32>
    %134 = arith.addf %132, %133 : vector<36x128xf32>
    %c1_106 = arith.constant 1 : index
    %c0_107 = arith.constant 0 : index
    %135 = vector.load %arg25[%c1_106, %c0_107] : memref<38x128xf32, #tpu.memory_space<vmem>>, vector<36x128xf32>
    tpu.vector_store %arg25[%c1_106, %c0_107], %130 {strides = array<i32>} : memref<38x128xf32, #tpu.memory_space<vmem>>, vector<36x128xf32>,
    %c0_108 = arith.constant 0 : index
    %c0_109 = arith.constant 0 : index
    %136 = vector.load %arg25[%c0_108, %c0_109] : memref<38x128xf32, #tpu.memory_space<vmem>>, vector<36x128xf32>
    %c1_110 = arith.constant 1 : index
    %c0_111 = arith.constant 0 : index
    %137 = vector.load %arg25[%c1_110, %c0_111] : memref<38x128xf32, #tpu.memory_space<vmem>>, vector<36x128xf32>
    %c2_112 = arith.constant 2 : index
    %c0_113 = arith.constant 0 : index
    %138 = vector.load %arg25[%c2_112, %c0_113] : memref<38x128xf32, #tpu.memory_space<vmem>>, vector<36x128xf32>
    %139 = tpu.concatenate %136, %137, %138 in 1 : vector<36x128xf32>, vector<36x128xf32>, vector<36x128xf32> -> vector<36x384xf32>
    %140 = arith.truncf %139 : vector<36x384xf32> to vector<36x384xbf16>
    %cst_114 = arith.constant dense<0.000000e+00> : vector<36x128xf32>
    %141 = tpu.matmul %140, %114, %cst_114 {dimension_numbers = #tpu.dot_dimension_numbers<[1], [0], [0], [1], [0, 0, 1, 1], [], []>} : vector<36x384xbf16>, vector<384x128xbf16>, vector<36x128xf32> -> vector<36x128xf32>
    %142 = vector.broadcast %116 : vector<1x128xf32> to vector<36x128xf32>
    %143 = arith.addf %141, %142 : vector<36x128xf32>
    %cst_115 = arith.constant 0.000000e+00 : f32
    %144 = vector.broadcast %cst_115 : f32 to vector<36x128xf32>
    %145 = arith.cmpf ogt, %143, %144 : vector<36x128xf32>
    %cst_116 = arith.constant 0.00999999977 : f32
    %146 = vector.broadcast %cst_116 : f32 to vector<36x128xf32>
    %147 = arith.mulf %146, %143 : vector<36x128xf32>
    %148 = arith.select %145, %143, %147 : vector<36x128xi1>, vector<36x128xf32>
    %149 = arith.addf %148, %134 : vector<36x128xf32>
    %150 = arith.mulf %149, %18 : vector<36x128xf32>
    %c1_117 = arith.constant 1 : index
    %c0_118 = arith.constant 0 : index
    %151 = vector.load %arg24[%c1_117, %c0_118] : memref<38x128xf32, #tpu.memory_space<vmem>>, vector<36x128xf32>
    tpu.vector_store %arg24[%c1_117, %c0_118], %150 {strides = array<i32>} : memref<38x128xf32, #tpu.memory_space<vmem>>, vector<36x128xf32>,
    %c0_119 = arith.constant 0 : index
    %c0_120 = arith.constant 0 : index
    %152 = vector.load %arg24[%c0_119, %c0_120] : memref<38x128xf32, #tpu.memory_space<vmem>>, vector<36x128xf32>
    %c1_121 = arith.constant 1 : index
    %c0_122 = arith.constant 0 : index
    %153 = vector.load %arg24[%c1_121, %c0_122] : memref<38x128xf32, #tpu.memory_space<vmem>>, vector<36x128xf32>
    %c2_123 = arith.constant 2 : index
    %c0_124 = arith.constant 0 : index
    %154 = vector.load %arg24[%c2_123, %c0_124] : memref<38x128xf32, #tpu.memory_space<vmem>>, vector<36x128xf32>
    %155 = tpu.concatenate %152, %153, %154 in 1 : vector<36x128xf32>, vector<36x128xf32>, vector<36x128xf32> -> vector<36x384xf32>
    %c2_125 = arith.constant 2 : index
    %c0_126 = arith.constant 0 : index
    %c0_127 = arith.constant 0 : index
    %156 = vector.load %arg9[%c2_125, %c0_126, %c0_127] : memref<4x384x128xbf16, #tpu.memory_space<vmem>>, vector<1x384x128xbf16>
    %157 = vector.shape_cast %156 : vector<1x384x128xbf16> to vector<384x128xbf16>
    %c2_128 = arith.constant 2 : index
    %c0_129 = arith.constant 0 : index
    %c0_130 = arith.constant 0 : index
    %158 = vector.load %arg10[%c2_128, %c0_129, %c0_130] : memref<4x1x128xf32, #tpu.memory_space<vmem>>, vector<1x1x128xf32>
    %159 = vector.shape_cast %158 : vector<1x1x128xf32> to vector<1x128xf32>
    %c2_131 = arith.constant 2 : index
    %c0_132 = arith.constant 0 : index
    %c0_133 = arith.constant 0 : index
    %160 = vector.load %arg11[%c2_131, %c0_132, %c0_133] : memref<4x384x128xbf16, #tpu.memory_space<vmem>>, vector<1x384x128xbf16>
    %161 = vector.shape_cast %160 : vector<1x384x128xbf16> to vector<384x128xbf16>
    %c2_134 = arith.constant 2 : index
    %c0_135 = arith.constant 0 : index
    %c0_136 = arith.constant 0 : index
    %162 = vector.load %arg12[%c2_134, %c0_135, %c0_136] : memref<4x1x128xf32, #tpu.memory_space<vmem>>, vector<1x1x128xf32>
    %163 = vector.shape_cast %162 : vector<1x1x128xf32> to vector<1x128xf32>
    %c2_137 = arith.constant 2 : index
    %c0_138 = arith.constant 0 : index
    %c0_139 = arith.constant 0 : index
    %164 = vector.load %arg13[%c2_137, %c0_138, %c0_139] : memref<4x128x128xbf16, #tpu.memory_space<vmem>>, vector<1x128x128xbf16>
    %165 = vector.shape_cast %164 : vector<1x128x128xbf16> to vector<128x128xbf16>
    %c2_140 = arith.constant 2 : index
    %c0_141 = arith.constant 0 : index
    %c0_142 = arith.constant 0 : index
    %166 = vector.load %arg14[%c2_140, %c0_141, %c0_142] : memref<4x1x128xf32, #tpu.memory_space<vmem>>, vector<1x1x128xf32>
    %167 = vector.shape_cast %166 : vector<1x1x128xf32> to vector<1x128xf32>
    %168 = arith.truncf %155 : vector<36x384xf32> to vector<36x384xbf16>
    %cst_143 = arith.constant dense<0.000000e+00> : vector<36x128xf32>
    %169 = tpu.matmul %168, %157, %cst_143 {dimension_numbers = #tpu.dot_dimension_numbers<[1], [0], [0], [1], [0, 0, 1, 1], [], []>} : vector<36x384xbf16>, vector<384x128xbf16>, vector<36x128xf32> -> vector<36x128xf32>
    %170 = vector.broadcast %159 : vector<1x128xf32> to vector<36x128xf32>
    %171 = arith.addf %169, %170 : vector<36x128xf32>
    %cst_144 = arith.constant 0.000000e+00 : f32
    %172 = vector.broadcast %cst_144 : f32 to vector<36x128xf32>
    %173 = arith.cmpf ogt, %171, %172 : vector<36x128xf32>
    %cst_145 = arith.constant 0.00999999977 : f32
    %174 = vector.broadcast %cst_145 : f32 to vector<36x128xf32>
    %175 = arith.mulf %174, %171 : vector<36x128xf32>
    %176 = arith.select %173, %171, %175 : vector<36x128xi1>, vector<36x128xf32>
    %177 = arith.mulf %176, %18 : vector<36x128xf32>
    %178 = arith.truncf %153 : vector<36x128xf32> to vector<36x128xbf16>
    %cst_146 = arith.constant dense<0.000000e+00> : vector<36x128xf32>
    %179 = tpu.matmul %178, %165, %cst_146 {dimension_numbers = #tpu.dot_dimension_numbers<[1], [0], [0], [1], [0, 0, 1, 1], [], []>} : vector<36x128xbf16>, vector<128x128xbf16>, vector<36x128xf32> -> vector<36x128xf32>
    %180 = vector.broadcast %167 : vector<1x128xf32> to vector<36x128xf32>
    %181 = arith.addf %179, %180 : vector<36x128xf32>
    %c1_147 = arith.constant 1 : index
    %c0_148 = arith.constant 0 : index
    %182 = vector.load %arg25[%c1_147, %c0_148] : memref<38x128xf32, #tpu.memory_space<vmem>>, vector<36x128xf32>
    tpu.vector_store %arg25[%c1_147, %c0_148], %177 {strides = array<i32>} : memref<38x128xf32, #tpu.memory_space<vmem>>, vector<36x128xf32>,
    %c0_149 = arith.constant 0 : index
    %c0_150 = arith.constant 0 : index
    %183 = vector.load %arg25[%c0_149, %c0_150] : memref<38x128xf32, #tpu.memory_space<vmem>>, vector<36x128xf32>
    %c1_151 = arith.constant 1 : index
    %c0_152 = arith.constant 0 : index
    %184 = vector.load %arg25[%c1_151, %c0_152] : memref<38x128xf32, #tpu.memory_space<vmem>>, vector<36x128xf32>
    %c2_153 = arith.constant 2 : index
    %c0_154 = arith.constant 0 : index
    %185 = vector.load %arg25[%c2_153, %c0_154] : memref<38x128xf32, #tpu.memory_space<vmem>>, vector<36x128xf32>
    %186 = tpu.concatenate %183, %184, %185 in 1 : vector<36x128xf32>, vector<36x128xf32>, vector<36x128xf32> -> vector<36x384xf32>
    %187 = arith.truncf %186 : vector<36x384xf32> to vector<36x384xbf16>
    %cst_155 = arith.constant dense<0.000000e+00> : vector<36x128xf32>
    %188 = tpu.matmul %187, %161, %cst_155 {dimension_numbers = #tpu.dot_dimension_numbers<[1], [0], [0], [1], [0, 0, 1, 1], [], []>} : vector<36x384xbf16>, vector<384x128xbf16>, vector<36x128xf32> -> vector<36x128xf32>
    %189 = vector.broadcast %163 : vector<1x128xf32> to vector<36x128xf32>
    %190 = arith.addf %188, %189 : vector<36x128xf32>
    %cst_156 = arith.constant 0.000000e+00 : f32
    %191 = vector.broadcast %cst_156 : f32 to vector<36x128xf32>
    %192 = arith.cmpf ogt, %190, %191 : vector<36x128xf32>
    %cst_157 = arith.constant 0.00999999977 : f32
    %193 = vector.broadcast %cst_157 : f32 to vector<36x128xf32>
    %194 = arith.mulf %193, %190 : vector<36x128xf32>
    %195 = arith.select %192, %190, %194 : vector<36x128xi1>, vector<36x128xf32>
    %196 = arith.addf %195, %181 : vector<36x128xf32>
    %197 = arith.mulf %196, %18 : vector<36x128xf32>
    %c1_158 = arith.constant 1 : index
    %c0_159 = arith.constant 0 : index
    %198 = vector.load %arg24[%c1_158, %c0_159] : memref<38x128xf32, #tpu.memory_space<vmem>>, vector<36x128xf32>
    tpu.vector_store %arg24[%c1_158, %c0_159], %197 {strides = array<i32>} : memref<38x128xf32, #tpu.memory_space<vmem>>, vector<36x128xf32>,
    %c0_160 = arith.constant 0 : index
    %c0_161 = arith.constant 0 : index
    %199 = vector.load %arg24[%c0_160, %c0_161] : memref<38x128xf32, #tpu.memory_space<vmem>>, vector<36x128xf32>
    %c1_162 = arith.constant 1 : index
    %c0_163 = arith.constant 0 : index
    %200 = vector.load %arg24[%c1_162, %c0_163] : memref<38x128xf32, #tpu.memory_space<vmem>>, vector<36x128xf32>
    %c2_164 = arith.constant 2 : index
    %c0_165 = arith.constant 0 : index
    %201 = vector.load %arg24[%c2_164, %c0_165] : memref<38x128xf32, #tpu.memory_space<vmem>>, vector<36x128xf32>
    %202 = tpu.concatenate %199, %200, %201 in 1 : vector<36x128xf32>, vector<36x128xf32>, vector<36x128xf32> -> vector<36x384xf32>
    %c3 = arith.constant 3 : index
    %c0_166 = arith.constant 0 : index
    %c0_167 = arith.constant 0 : index
    %203 = vector.load %arg9[%c3, %c0_166, %c0_167] : memref<4x384x128xbf16, #tpu.memory_space<vmem>>, vector<1x384x128xbf16>
    %204 = vector.shape_cast %203 : vector<1x384x128xbf16> to vector<384x128xbf16>
    %c3_168 = arith.constant 3 : index
    %c0_169 = arith.constant 0 : index
    %c0_170 = arith.constant 0 : index
    %205 = vector.load %arg10[%c3_168, %c0_169, %c0_170] : memref<4x1x128xf32, #tpu.memory_space<vmem>>, vector<1x1x128xf32>
    %206 = vector.shape_cast %205 : vector<1x1x128xf32> to vector<1x128xf32>
    %c3_171 = arith.constant 3 : index
    %c0_172 = arith.constant 0 : index
    %c0_173 = arith.constant 0 : index
    %207 = vector.load %arg11[%c3_171, %c0_172, %c0_173] : memref<4x384x128xbf16, #tpu.memory_space<vmem>>, vector<1x384x128xbf16>
    %208 = vector.shape_cast %207 : vector<1x384x128xbf16> to vector<384x128xbf16>
    %c3_174 = arith.constant 3 : index
    %c0_175 = arith.constant 0 : index
    %c0_176 = arith.constant 0 : index
    %209 = vector.load %arg12[%c3_174, %c0_175, %c0_176] : memref<4x1x128xf32, #tpu.memory_space<vmem>>, vector<1x1x128xf32>
    %210 = vector.shape_cast %209 : vector<1x1x128xf32> to vector<1x128xf32>
    %c3_177 = arith.constant 3 : index
    %c0_178 = arith.constant 0 : index
    %c0_179 = arith.constant 0 : index
    %211 = vector.load %arg13[%c3_177, %c0_178, %c0_179] : memref<4x128x128xbf16, #tpu.memory_space<vmem>>, vector<1x128x128xbf16>
    %212 = vector.shape_cast %211 : vector<1x128x128xbf16> to vector<128x128xbf16>
    %c3_180 = arith.constant 3 : index
    %c0_181 = arith.constant 0 : index
    %c0_182 = arith.constant 0 : index
    %213 = vector.load %arg14[%c3_180, %c0_181, %c0_182] : memref<4x1x128xf32, #tpu.memory_space<vmem>>, vector<1x1x128xf32>
    %214 = vector.shape_cast %213 : vector<1x1x128xf32> to vector<1x128xf32>
    %215 = arith.truncf %202 : vector<36x384xf32> to vector<36x384xbf16>
    %cst_183 = arith.constant dense<0.000000e+00> : vector<36x128xf32>
    %216 = tpu.matmul %215, %204, %cst_183 {dimension_numbers = #tpu.dot_dimension_numbers<[1], [0], [0], [1], [0, 0, 1, 1], [], []>} : vector<36x384xbf16>, vector<384x128xbf16>, vector<36x128xf32> -> vector<36x128xf32>
    %217 = vector.broadcast %206 : vector<1x128xf32> to vector<36x128xf32>
    %218 = arith.addf %216, %217 : vector<36x128xf32>
    %cst_184 = arith.constant 0.000000e+00 : f32
    %219 = vector.broadcast %cst_184 : f32 to vector<36x128xf32>
    %220 = arith.cmpf ogt, %218, %219 : vector<36x128xf32>
    %cst_185 = arith.constant 0.00999999977 : f32
    %221 = vector.broadcast %cst_185 : f32 to vector<36x128xf32>
    %222 = arith.mulf %221, %218 : vector<36x128xf32>
    %223 = arith.select %220, %218, %222 : vector<36x128xi1>, vector<36x128xf32>
    %224 = arith.mulf %223, %18 : vector<36x128xf32>
    %225 = arith.truncf %200 : vector<36x128xf32> to vector<36x128xbf16>
    %cst_186 = arith.constant dense<0.000000e+00> : vector<36x128xf32>
    %226 = tpu.matmul %225, %212, %cst_186 {dimension_numbers = #tpu.dot_dimension_numbers<[1], [0], [0], [1], [0, 0, 1, 1], [], []>} : vector<36x128xbf16>, vector<128x128xbf16>, vector<36x128xf32> -> vector<36x128xf32>
    %227 = vector.broadcast %214 : vector<1x128xf32> to vector<36x128xf32>
    %228 = arith.addf %226, %227 : vector<36x128xf32>
    %c1_187 = arith.constant 1 : index
    %c0_188 = arith.constant 0 : index
    %229 = vector.load %arg25[%c1_187, %c0_188] : memref<38x128xf32, #tpu.memory_space<vmem>>, vector<36x128xf32>
    tpu.vector_store %arg25[%c1_187, %c0_188], %224 {strides = array<i32>} : memref<38x128xf32, #tpu.memory_space<vmem>>, vector<36x128xf32>,
    %c0_189 = arith.constant 0 : index
    %c0_190 = arith.constant 0 : index
    %230 = vector.load %arg25[%c0_189, %c0_190] : memref<38x128xf32, #tpu.memory_space<vmem>>, vector<36x128xf32>
    %c1_191 = arith.constant 1 : index
    %c0_192 = arith.constant 0 : index
    %231 = vector.load %arg25[%c1_191, %c0_192] : memref<38x128xf32, #tpu.memory_space<vmem>>, vector<36x128xf32>
    %c2_193 = arith.constant 2 : index
    %c0_194 = arith.constant 0 : index
    %232 = vector.load %arg25[%c2_193, %c0_194] : memref<38x128xf32, #tpu.memory_space<vmem>>, vector<36x128xf32>
    %233 = tpu.concatenate %230, %231, %232 in 1 : vector<36x128xf32>, vector<36x128xf32>, vector<36x128xf32> -> vector<36x384xf32>
    %234 = arith.truncf %233 : vector<36x384xf32> to vector<36x384xbf16>
    %cst_195 = arith.constant dense<0.000000e+00> : vector<36x128xf32>
    %235 = tpu.matmul %234, %208, %cst_195 {dimension_numbers = #tpu.dot_dimension_numbers<[1], [0], [0], [1], [0, 0, 1, 1], [], []>} : vector<36x384xbf16>, vector<384x128xbf16>, vector<36x128xf32> -> vector<36x128xf32>
    %236 = vector.broadcast %210 : vector<1x128xf32> to vector<36x128xf32>
    %237 = arith.addf %235, %236 : vector<36x128xf32>
    %cst_196 = arith.constant 0.000000e+00 : f32
    %238 = vector.broadcast %cst_196 : f32 to vector<36x128xf32>
    %239 = arith.cmpf ogt, %237, %238 : vector<36x128xf32>
    %cst_197 = arith.constant 0.00999999977 : f32
    %240 = vector.broadcast %cst_197 : f32 to vector<36x128xf32>
    %241 = arith.mulf %240, %237 : vector<36x128xf32>
    %242 = arith.select %239, %237, %241 : vector<36x128xi1>, vector<36x128xf32>
    %243 = arith.addf %242, %228 : vector<36x128xf32>
    %244 = arith.mulf %243, %18 : vector<36x128xf32>
    %c1_198 = arith.constant 1 : index
    %c0_199 = arith.constant 0 : index
    %245 = vector.load %arg24[%c1_198, %c0_199] : memref<38x128xf32, #tpu.memory_space<vmem>>, vector<36x128xf32>
    tpu.vector_store %arg24[%c1_198, %c0_199], %244 {strides = array<i32>} : memref<38x128xf32, #tpu.memory_space<vmem>>, vector<36x128xf32>,
    %c2_200 = arith.constant 2 : index
    %c0_201 = arith.constant 0 : index
    %246 = vector.load %arg24[%c2_200, %c0_201] : memref<38x128xf32, #tpu.memory_space<vmem>>, vector<1x128xf32>
    %c3_202 = arith.constant 3 : index
    %c0_203 = arith.constant 0 : index
    %247 = vector.load %arg24[%c3_202, %c0_203] : memref<38x128xf32, #tpu.memory_space<vmem>>, vector<1x128xf32>
    %c4 = arith.constant 4 : index
    %c0_204 = arith.constant 0 : index
    %248 = vector.load %arg24[%c4, %c0_204] : memref<38x128xf32, #tpu.memory_space<vmem>>, vector<1x128xf32>
    %c5 = arith.constant 5 : index
    %c0_205 = arith.constant 0 : index
    %249 = vector.load %arg24[%c5, %c0_205] : memref<38x128xf32, #tpu.memory_space<vmem>>, vector<1x128xf32>
    %c6 = arith.constant 6 : index
    %c0_206 = arith.constant 0 : index
    %250 = vector.load %arg24[%c6, %c0_206] : memref<38x128xf32, #tpu.memory_space<vmem>>, vector<1x128xf32>
    %c7 = arith.constant 7 : index
    %c0_207 = arith.constant 0 : index
    %251 = vector.load %arg24[%c7, %c0_207] : memref<38x128xf32, #tpu.memory_space<vmem>>, vector<1x128xf32>
    %c8 = arith.constant 8 : index
    %c0_208 = arith.constant 0 : index
    %252 = vector.load %arg24[%c8, %c0_208] : memref<38x128xf32, #tpu.memory_space<vmem>>, vector<1x128xf32>
    %c9 = arith.constant 9 : index
    %c0_209 = arith.constant 0 : index
    %253 = vector.load %arg24[%c9, %c0_209] : memref<38x128xf32, #tpu.memory_space<vmem>>, vector<1x128xf32>
    %c10 = arith.constant 10 : index
    %c0_210 = arith.constant 0 : index
    %254 = vector.load %arg24[%c10, %c0_210] : memref<38x128xf32, #tpu.memory_space<vmem>>, vector<1x128xf32>
    %c11 = arith.constant 11 : index
    %c0_211 = arith.constant 0 : index
    %255 = vector.load %arg24[%c11, %c0_211] : memref<38x128xf32, #tpu.memory_space<vmem>>, vector<1x128xf32>
    %c12 = arith.constant 12 : index
    %c0_212 = arith.constant 0 : index
    %256 = vector.load %arg24[%c12, %c0_212] : memref<38x128xf32, #tpu.memory_space<vmem>>, vector<1x128xf32>
    %c13 = arith.constant 13 : index
    %c0_213 = arith.constant 0 : index
    %257 = vector.load %arg24[%c13, %c0_213] : memref<38x128xf32, #tpu.memory_space<vmem>>, vector<1x128xf32>
    %c14 = arith.constant 14 : index
    %c0_214 = arith.constant 0 : index
    %258 = vector.load %arg24[%c14, %c0_214] : memref<38x128xf32, #tpu.memory_space<vmem>>, vector<1x128xf32>
    %c15 = arith.constant 15 : index
    %c0_215 = arith.constant 0 : index
    %259 = vector.load %arg24[%c15, %c0_215] : memref<38x128xf32, #tpu.memory_space<vmem>>, vector<1x128xf32>
    %c16 = arith.constant 16 : index
    %c0_216 = arith.constant 0 : index
    %260 = vector.load %arg24[%c16, %c0_216] : memref<38x128xf32, #tpu.memory_space<vmem>>, vector<1x128xf32>
    %c17 = arith.constant 17 : index
    %c0_217 = arith.constant 0 : index
    %261 = vector.load %arg24[%c17, %c0_217] : memref<38x128xf32, #tpu.memory_space<vmem>>, vector<1x128xf32>
    %262 = tpu.concatenate %246, %247, %248, %249, %250, %251, %252, %253, %254, %255, %256, %257, %258, %259, %260, %261 in 1 : vector<1x128xf32>, vector<1x128xf32>, vector<1x128xf32>, vector<1x128xf32>, vector<1x128xf32>, vector<1x128xf32>, vector<1x128xf32>, vector<1x128xf32>, vector<1x128xf32>, vector<1x128xf32>, vector<1x128xf32>, vector<1x128xf32>, vector<1x128xf32>, vector<1x128xf32>, vector<1x128xf32>, vector<1x128xf32> -> vector<1x2048xf32>
    %c20 = arith.constant 20 : index
    %c0_218 = arith.constant 0 : index
    %263 = vector.load %arg24[%c20, %c0_218] : memref<38x128xf32, #tpu.memory_space<vmem>>, vector<1x128xf32>
    %c21 = arith.constant 21 : index
    %c0_219 = arith.constant 0 : index
    %264 = vector.load %arg24[%c21, %c0_219] : memref<38x128xf32, #tpu.memory_space<vmem>>, vector<1x128xf32>
    %c22 = arith.constant 22 : index
    %c0_220 = arith.constant 0 : index
    %265 = vector.load %arg24[%c22, %c0_220] : memref<38x128xf32, #tpu.memory_space<vmem>>, vector<1x128xf32>
    %c23 = arith.constant 23 : index
    %c0_221 = arith.constant 0 : index
    %266 = vector.load %arg24[%c23, %c0_221] : memref<38x128xf32, #tpu.memory_space<vmem>>, vector<1x128xf32>
    %c24 = arith.constant 24 : index
    %c0_222 = arith.constant 0 : index
    %267 = vector.load %arg24[%c24, %c0_222] : memref<38x128xf32, #tpu.memory_space<vmem>>, vector<1x128xf32>
    %c25 = arith.constant 25 : index
    %c0_223 = arith.constant 0 : index
    %268 = vector.load %arg24[%c25, %c0_223] : memref<38x128xf32, #tpu.memory_space<vmem>>, vector<1x128xf32>
    %c26 = arith.constant 26 : index
    %c0_224 = arith.constant 0 : index
    %269 = vector.load %arg24[%c26, %c0_224] : memref<38x128xf32, #tpu.memory_space<vmem>>, vector<1x128xf32>
    %c27 = arith.constant 27 : index
    %c0_225 = arith.constant 0 : index
    %270 = vector.load %arg24[%c27, %c0_225] : memref<38x128xf32, #tpu.memory_space<vmem>>, vector<1x128xf32>
    %c28 = arith.constant 28 : index
    %c0_226 = arith.constant 0 : index
    %271 = vector.load %arg24[%c28, %c0_226] : memref<38x128xf32, #tpu.memory_space<vmem>>, vector<1x128xf32>
    %c29 = arith.constant 29 : index
    %c0_227 = arith.constant 0 : index
    %272 = vector.load %arg24[%c29, %c0_227] : memref<38x128xf32, #tpu.memory_space<vmem>>, vector<1x128xf32>
    %c30 = arith.constant 30 : index
    %c0_228 = arith.constant 0 : index
    %273 = vector.load %arg24[%c30, %c0_228] : memref<38x128xf32, #tpu.memory_space<vmem>>, vector<1x128xf32>
    %c31 = arith.constant 31 : index
    %c0_229 = arith.constant 0 : index
    %274 = vector.load %arg24[%c31, %c0_229] : memref<38x128xf32, #tpu.memory_space<vmem>>, vector<1x128xf32>
    %c32 = arith.constant 32 : index
    %c0_230 = arith.constant 0 : index
    %275 = vector.load %arg24[%c32, %c0_230] : memref<38x128xf32, #tpu.memory_space<vmem>>, vector<1x128xf32>
    %c33 = arith.constant 33 : index
    %c0_231 = arith.constant 0 : index
    %276 = vector.load %arg24[%c33, %c0_231] : memref<38x128xf32, #tpu.memory_space<vmem>>, vector<1x128xf32>
    %c34 = arith.constant 34 : index
    %c0_232 = arith.constant 0 : index
    %277 = vector.load %arg24[%c34, %c0_232] : memref<38x128xf32, #tpu.memory_space<vmem>>, vector<1x128xf32>
    %c35 = arith.constant 35 : index
    %c0_233 = arith.constant 0 : index
    %278 = vector.load %arg24[%c35, %c0_233] : memref<38x128xf32, #tpu.memory_space<vmem>>, vector<1x128xf32>
    %279 = tpu.concatenate %263, %264, %265, %266, %267, %268, %269, %270, %271, %272, %273, %274, %275, %276, %277, %278 in 1 : vector<1x128xf32>, vector<1x128xf32>, vector<1x128xf32>, vector<1x128xf32>, vector<1x128xf32>, vector<1x128xf32>, vector<1x128xf32>, vector<1x128xf32>, vector<1x128xf32>, vector<1x128xf32>, vector<1x128xf32>, vector<1x128xf32>, vector<1x128xf32>, vector<1x128xf32>, vector<1x128xf32>, vector<1x128xf32> -> vector<1x2048xf32>
    %280 = tpu.concatenate %262, %279 in 0 : vector<1x2048xf32>, vector<1x2048xf32> -> vector<2x2048xf32>
    %281 = arith.truncf %280 : vector<2x2048xf32> to vector<2x2048xbf16>
    %c0_234 = arith.constant 0 : index
    %c0_235 = arith.constant 0 : index
    %282 = vector.load %arg15[%c0_234, %c0_235] : memref<2048x128xbf16, #tpu.memory_space<vmem>>, vector<2048x128xbf16>
    %cst_236 = arith.constant dense<0.000000e+00> : vector<2x128xf32>
    %283 = tpu.matmul %281, %282, %cst_236 {dimension_numbers = #tpu.dot_dimension_numbers<[1], [0], [0], [1], [0, 0, 1, 1], [], []>} : vector<2x2048xbf16>, vector<2048x128xbf16>, vector<2x128xf32> -> vector<2x128xf32>
    %c0_237 = arith.constant 0 : index
    %c0_238 = arith.constant 0 : index
    %284 = vector.load %arg16[%c0_237, %c0_238] : memref<1x128xf32, #tpu.memory_space<vmem>>, vector<1x128xf32>
    %285 = vector.broadcast %284 : vector<1x128xf32> to vector<2x128xf32>
    %286 = arith.addf %283, %285 : vector<2x128xf32>
    %cst_239 = arith.constant 0.000000e+00 : f32
    %287 = vector.broadcast %cst_239 : f32 to vector<2x128xf32>
    %288 = arith.cmpf ogt, %286, %287 : vector<2x128xf32>
    %cst_240 = arith.constant 1.000000e-01 : f32
    %289 = vector.broadcast %cst_240 : f32 to vector<2x128xf32>
    %290 = arith.mulf %289, %286 : vector<2x128xf32>
    %291 = arith.select %288, %286, %290 : vector<2x128xi1>, vector<2x128xf32>
    %c64_i32 = arith.constant 64 : i32
    %292 = tpu.dynamic_rotate %291 by %c64_i32 dim 1 : vector<2x128xf32>, i32 -> vector<2x128xf32>
    %293 = arith.addf %291, %292 : vector<2x128xf32>
    %c0_241 = arith.constant 0 : index
    %c0_242 = arith.constant 0 : index
    %294 = vector.load %arg17[%c0_241, %c0_242] : memref<128x64xf32, #tpu.memory_space<vmem>>, vector<128x64xf32>
    %cst_243 = arith.constant dense<0.000000e+00> : vector<2x64xf32>
    %295 = tpu.matmul %293, %294, %cst_243 {dimension_numbers = #tpu.dot_dimension_numbers<[1], [0], [0], [1], [0, 0, 1, 1], [], []>} : vector<2x128xf32>, vector<128x64xf32>, vector<2x64xf32> -> vector<2x64xf32>
    %c0_244 = arith.constant 0 : index
    %c0_245 = arith.constant 0 : index
    %296 = vector.load %arg18[%c0_244, %c0_245] : memref<1x64xf32, #tpu.memory_space<vmem>>, vector<1x64xf32>
    %297 = vector.broadcast %296 : vector<1x64xf32> to vector<2x64xf32>
    %298 = arith.addf %295, %297 : vector<2x64xf32>
    %cst_246 = arith.constant 0.000000e+00 : f32
    %299 = vector.broadcast %cst_246 : f32 to vector<2x64xf32>
    %300 = arith.cmpf ogt, %298, %299 : vector<2x64xf32>
    %cst_247 = arith.constant 1.000000e-01 : f32
    %301 = vector.broadcast %cst_247 : f32 to vector<2x64xf32>
    %302 = arith.mulf %301, %298 : vector<2x64xf32>
    %303 = arith.select %300, %298, %302 : vector<2x64xi1>, vector<2x64xf32>
    %c0_248 = arith.constant 0 : index
    %c0_249 = arith.constant 0 : index
    %304 = vector.load %arg19[%c0_248, %c0_249] : memref<64x16xf32, #tpu.memory_space<vmem>>, vector<64x16xf32>
    %cst_250 = arith.constant dense<0.000000e+00> : vector<2x16xf32>
    %305 = tpu.matmul %303, %304, %cst_250 {dimension_numbers = #tpu.dot_dimension_numbers<[1], [0], [0], [1], [0, 0, 1, 1], [], []>} : vector<2x64xf32>, vector<64x16xf32>, vector<2x16xf32> -> vector<2x16xf32>
    %c0_251 = arith.constant 0 : index
    %c0_252 = arith.constant 0 : index
    %306 = vector.load %arg20[%c0_251, %c0_252] : memref<1x16xf32, #tpu.memory_space<vmem>>, vector<1x16xf32>
    %307 = vector.broadcast %306 : vector<1x16xf32> to vector<2x16xf32>
    %308 = arith.addf %305, %307 : vector<2x16xf32>
    %cst_253 = arith.constant 0.000000e+00 : f32
    %309 = vector.broadcast %cst_253 : f32 to vector<2x16xf32>
    %310 = arith.cmpf ogt, %308, %309 : vector<2x16xf32>
    %cst_254 = arith.constant 1.000000e-01 : f32
    %311 = vector.broadcast %cst_254 : f32 to vector<2x16xf32>
    %312 = arith.mulf %311, %308 : vector<2x16xf32>
    %313 = arith.select %310, %308, %312 : vector<2x16xi1>, vector<2x16xf32>
    %c0_255 = arith.constant 0 : index
    %c0_256 = arith.constant 0 : index
    %314 = vector.load %arg21[%c0_255, %c0_256] : memref<16x1xf32, #tpu.memory_space<vmem>>, vector<16x1xf32>
    %cst_257 = arith.constant dense<0.000000e+00> : vector<2x1xf32>
    %315 = tpu.matmul %313, %314, %cst_257 {dimension_numbers = #tpu.dot_dimension_numbers<[1], [0], [0], [1], [0, 0, 1, 1], [], []>} : vector<2x16xf32>, vector<16x1xf32>, vector<2x1xf32> -> vector<2x1xf32>
    %c0_258 = arith.constant 0 : index
    %c0_259 = arith.constant 0 : index
    %316 = vector.load %arg22[%c0_258, %c0_259] : memref<1x1xf32, #tpu.memory_space<vmem>>, vector<1x1xf32>
    %317 = vector.broadcast %316 : vector<1x1xf32> to vector<2x1xf32>
    %318 = arith.addf %315, %317 : vector<2x1xf32>
    %c0_260 = arith.constant 0 : index
    %c0_261 = arith.constant 0 : index
    %319 = vector.load %arg23[%c0_260, %c0_261] : memref<2x1xf32, #tpu.memory_space<vmem>>, vector<2x1xf32>
    tpu.vector_store %arg23[%c0_260, %c0_261], %318 {strides = array<i32>} : memref<2x1xf32, #tpu.memory_space<vmem>>, vector<2x1xf32>,
    return
  }
  func.func @transform_0(%arg0: i32) -> (i32, i32) {
    %c0_i32 = arith.constant 0 : i32
    %c0_i32_0 = arith.constant 0 : i32
    %c0_i32_1 = arith.constant 0 : i32
    return %c0_i32, %c0_i32_0 : i32, i32
  }
  func.func @transform_1(%arg0: i32) -> (i32, i32) {
    %c0_i32 = arith.constant 0 : i32
    %c0_i32_0 = arith.constant 0 : i32
    %c0_i32_1 = arith.constant 0 : i32
    return %c0_i32, %c0_i32_0 : i32, i32
  }
  func.func @transform_2(%arg0: i32) -> (i32, i32) {
    %c0_i32 = arith.constant 0 : i32
    %c0_i32_0 = arith.constant 0 : i32
    %c0_i32_1 = arith.constant 0 : i32
    return %c0_i32, %c0_i32_0 : i32, i32
  }
  func.func @transform_3(%arg0: i32) -> (i32, i32) {
    %c0_i32 = arith.constant 0 : i32
    %c0_i32_0 = arith.constant 0 : i32
    %c0_i32_1 = arith.constant 0 : i32
    return %c0_i32, %c0_i32_0 : i32, i32
  }
  func.func @transform_4(%arg0: i32) -> (i32, i32) {
    %c0_i32 = arith.constant 0 : i32
    %c0_i32_0 = arith.constant 0 : i32
    %c0_i32_1 = arith.constant 0 : i32
    return %c0_i32, %c0_i32_0 : i32, i32
  }
  func.func @transform_5(%arg0: i32) -> (i32, i32) {
    %c0_i32 = arith.constant 0 : i32
    %c0_i32_0 = arith.constant 0 : i32
    %c0_i32_1 = arith.constant 0 : i32
    return %c0_i32, %c0_i32_0 : i32, i32
  }
  func.func @transform_6(%arg0: i32) -> (i32, i32) {
    %c0_i32 = arith.constant 0 : i32
    %c0_i32_0 = arith.constant 0 : i32
    %c0_i32_1 = arith.constant 0 : i32
    return %c0_i32, %c0_i32_0 : i32, i32
  }
  func.func @transform_7(%arg0: i32) -> (i32, i32) {
    %c0_i32 = arith.constant 0 : i32
    %c0_i32_0 = arith.constant 0 : i32
    %c0_i32_1 = arith.constant 0 : i32
    return %c0_i32, %c0_i32_0 : i32, i32
  }
  func.func @transform_8(%arg0: i32) -> (i32, i32, i32) {
    %c0_i32 = arith.constant 0 : i32
    %c0_i32_0 = arith.constant 0 : i32
    %c0_i32_1 = arith.constant 0 : i32
    %c0_i32_2 = arith.constant 0 : i32
    return %c0_i32, %c0_i32_0, %c0_i32_1 : i32, i32, i32
  }
  func.func @transform_9(%arg0: i32) -> (i32, i32, i32) {
    %c0_i32 = arith.constant 0 : i32
    %c0_i32_0 = arith.constant 0 : i32
    %c0_i32_1 = arith.constant 0 : i32
    %c0_i32_2 = arith.constant 0 : i32
    return %c0_i32, %c0_i32_0, %c0_i32_1 : i32, i32, i32
  }
  func.func @transform_10(%arg0: i32) -> (i32, i32, i32) {
    %c0_i32 = arith.constant 0 : i32
    %c0_i32_0 = arith.constant 0 : i32
    %c0_i32_1 = arith.constant 0 : i32
    %c0_i32_2 = arith.constant 0 : i32
    return %c0_i32, %c0_i32_0, %c0_i32_1 : i32, i32, i32
  }
  func.func @transform_11(%arg0: i32) -> (i32, i32, i32) {
    %c0_i32 = arith.constant 0 : i32
    %c0_i32_0 = arith.constant 0 : i32
    %c0_i32_1 = arith.constant 0 : i32
    %c0_i32_2 = arith.constant 0 : i32
    return %c0_i32, %c0_i32_0, %c0_i32_1 : i32, i32, i32
  }
  func.func @transform_12(%arg0: i32) -> (i32, i32, i32) {
    %c0_i32 = arith.constant 0 : i32
    %c0_i32_0 = arith.constant 0 : i32
    %c0_i32_1 = arith.constant 0 : i32
    %c0_i32_2 = arith.constant 0 : i32
    return %c0_i32, %c0_i32_0, %c0_i32_1 : i32, i32, i32
  }
  func.func @transform_13(%arg0: i32) -> (i32, i32, i32) {
    %c0_i32 = arith.constant 0 : i32
    %c0_i32_0 = arith.constant 0 : i32
    %c0_i32_1 = arith.constant 0 : i32
    %c0_i32_2 = arith.constant 0 : i32
    return %c0_i32, %c0_i32_0, %c0_i32_1 : i32, i32, i32
  }
  func.func @transform_14(%arg0: i32) -> (i32, i32) {
    %c0_i32 = arith.constant 0 : i32
    %c0_i32_0 = arith.constant 0 : i32
    %c0_i32_1 = arith.constant 0 : i32
    return %c0_i32, %c0_i32_0 : i32, i32
  }
  func.func @transform_15(%arg0: i32) -> (i32, i32) {
    %c0_i32 = arith.constant 0 : i32
    %c0_i32_0 = arith.constant 0 : i32
    %c0_i32_1 = arith.constant 0 : i32
    return %c0_i32, %c0_i32_0 : i32, i32
  }
  func.func @transform_16(%arg0: i32) -> (i32, i32) {
    %c0_i32 = arith.constant 0 : i32
    %c0_i32_0 = arith.constant 0 : i32
    %c0_i32_1 = arith.constant 0 : i32
    return %c0_i32, %c0_i32_0 : i32, i32
  }
  func.func @transform_17(%arg0: i32) -> (i32, i32) {
    %c0_i32 = arith.constant 0 : i32
    %c0_i32_0 = arith.constant 0 : i32
    %c0_i32_1 = arith.constant 0 : i32
    return %c0_i32, %c0_i32_0 : i32, i32
  }
  func.func @transform_18(%arg0: i32) -> (i32, i32) {
    %c0_i32 = arith.constant 0 : i32
    %c0_i32_0 = arith.constant 0 : i32
    %c0_i32_1 = arith.constant 0 : i32
    return %c0_i32, %c0_i32_0 : i32, i32
  }
  func.func @transform_19(%arg0: i32) -> (i32, i32) {
    %c0_i32 = arith.constant 0 : i32
    %c0_i32_0 = arith.constant 0 : i32
    %c0_i32_1 = arith.constant 0 : i32
    return %c0_i32, %c0_i32_0 : i32, i32
  }
  func.func @transform_20(%arg0: i32) -> (i32, i32) {
    %c0_i32 = arith.constant 0 : i32
    %c0_i32_0 = arith.constant 0 : i32
    %c0_i32_1 = arith.constant 0 : i32
    return %c0_i32, %c0_i32_0 : i32, i32
  }
  func.func @transform_21(%arg0: i32) -> (i32, i32) {
    %c0_i32 = arith.constant 0 : i32
    %c0_i32_0 = arith.constant 0 : i32
    %c0_i32_1 = arith.constant 0 : i32
    return %c0_i32, %c0_i32_0 : i32, i32
  }
  func.func @transform_22(%arg0: i32) -> (i32, i32) {
    %c0_i32 = arith.constant 0 : i32
    %c0_i32_0 = arith.constant 0 : i32
    %c0_i32_1 = arith.constant 0 : i32
    return %c0_i32, %c0_i32_0 : i32, i32
  }
}

</mosaic_0001>

<bundles_post_ra>
// kernel: combined_cnn_forward.1
= control target key start
LH: loop header
LB: loop body
LE: loop exit
PB: predicated region body
PF: predicated region fallthrough
CT: control target
= control target key end

     0   :  { %s9588_s0 = inlined_call_operand.vmem [shape: f32[36,24], index: 0, kind: input, shape index: {}]   ;;  %s9589_s1 = inlined_call_operand.vmem [shape: f32[36,8], index: 1, kind: input, shape index: {}]   ;;  %s9590_s2 = inlined_call_operand.hbm [shape: bf16[24,128], index: 2, kind: input, shape index: {}]   ;;  %s9591_s3 = inlined_call_operand.vmem [shape: f32[1,128], index: 3, kind: input, shape index: {}]   ;;  %s9592_s4 = inlined_call_operand.hbm [shape: bf16[384,128], index: 4, kind: input, shape index: {}]   ;;  %s9593_s5 = inlined_call_operand.vmem [shape: f32[1,128], index: 5, kind: input, shape index: {}]   ;;  %s9594_s6 = inlined_call_operand.hbm [shape: bf16[8,128], index: 6, kind: input, shape index: {}]   ;;  %s9595_s7 = inlined_call_operand.hbm [shape: f32[1,128], index: 7, kind: input, shape index: {}]   ;;  %s9596_s8 = inlined_call_operand.vmem [shape: bf16[4,384,128], index: 8, kind: input, shape index: {}]   ;;  %s9597_s9 = inlined_call_operand.hbm [shape: f32[4,1,128], index: 9, kind: input, shape index: {}]   ;;  %s9598_s10 = inlined_call_operand.hbm [shape: bf16[4,384,128], index: 10, kind: input, shape index: {}]   ;;  %s9599_s11 = inlined_call_operand.hbm [shape: f32[4,1,128], index: 11, kind: input, shape index: {}]   ;;  %s9600_s12 = inlined_call_operand.hbm [shape: bf16[4,128,128], index: 12, kind: input, shape index: {}]   ;;  %s9601_s13 = inlined_call_operand.hbm [shape: f32[4,1,128], index: 13, kind: input, shape index: {}]   ;;  %s9602_s14 = inlined_call_operand.hbm [shape: bf16[2048,128], index: 14, kind: input, shape index: {}]   ;;  %s9603_s15 = inlined_call_operand.hbm [shape: f32[1,128], index: 15, kind: input, shape index: {}]   ;;  %s9604_s16 = inlined_call_operand.vmem [shape: f32[128,64], index: 16, kind: input, shape index: {}]   ;;  %s9605_s17 = inlined_call_operand.hbm [shape: f32[1,64], index: 17, kind: input, shape index: {}]   ;;  %s9606_s18 = inlined_call_operand.vmem [shape: f32[64,16], index: 18, kind: input, shape index: {}]   ;;  %s9607_s19 = inlined_call_operand.vmem [shape: f32[1,16], index: 19, kind: input, shape index: {}]   ;;  %s9608_s20 = inlined_call_operand.vmem [shape: f32[16,1], index: 20, kind: input, shape index: {}]   ;;  %s9609_s21 = inlined_call_operand.<no memory space> [shape: f32[1,1], index: 21, kind: input, shape index: {}]   ;;  %s9610_s22 = inlined_call_operand.vmem [shape: f32[2,1], index: 22, kind: output, shape index: {}]  }
   0x1   :  { %9616 = sst [smem:[#allocation31_spill]] %s9588_s0  ;;  %v27_v0 = vstv %s9609_s21 }
   0x2   :  { %9617 = sst [smem:[#allocation32_spill]] %s9589_s1  ;;  %28 = vst [vmem:[#allocation4] sm:$0x1] %v27_v0 }
   0x3   :  { %9618 = sst [smem:[#allocation33_spill]] %s9590_s2 }
   0x4   :  { %9619 = sst [smem:[#allocation34_spill]] %s9591_s3 }
   0x5   :  { %9620 = sst [smem:[#allocation35_spill]] %s9592_s4 }
   0x6   :  { %9621 = sst [smem:[#allocation36_spill]] %s9593_s5 }
   0x7   :  { %9622 = sst [smem:[#allocation37_spill]] %s9594_s6 }
   0x8   :  { %29 = vsyncpa [#allocation6], 0 }
   0x9   :  { %30 = vsyncpa [#allocation8], 0 }
   0xa   :  { %31 = vsyncpa [#allocation11], 0 }
   0xb   :  { %32 = vsyncpa [#allocation14], 0 }
   0xc   :  { %33 = vsyncpa [#allocation17], 0 }
   0xd   :  { %34 = vsyncpa [#allocation20], 0 }
   0xe   :  { %35 = vsyncpa [#allocation23], 0  ;;  %s8420_s29 = smov [#allocation7]   ;;  %s8421_s4 = smov [#allocation10]  }
   0xf   :  { %s59_s30 = sshll.u32 %s8420_s29, 4  ;;  %s84_s0 = sshll.u32 %s8421_s4, 4  ;;  %s60_s30 = int_to_ptr.vmem [resolvable:$true] %s59_s30  ;;  %s8557_s0 = int_to_ptr.vmem [resolvable:$true] %s84_s0 }
  0x10   :  { %s9623_s5 = sld [smem:[#allocation35_spill]] }
  0x16   :  { %s8142_s24 = scalar_lea.hbm %s9623_s5, 3072 }
  0x17   :  { %p8143_p0 = scmp.ne.s32.totalorder %s9623_s5, %s8142_s24  ;;  %p8146_p1 = scmp.lt.u32.totalorder %s8142_s24, %s9623_s5 }
  0x19   :  { %p8148_p2 = pnand %p8146_p1, %p8143_p0 }
  0x1b   :  { %8151 = shalt.err (!%p8148_p2)
}
  0x1c   :  { %s8152_s2 = scalar_lea.vmem %s60_s30, 3072  ;;  %p8157_p4 = scmp.lt.s32.totalorder %s60_s30, %s60_s30 }
  0x1d   :  { %p8153_p3 = scmp.ne.s32.totalorder %s60_s30, %s8152_s2  ;;  %p8158_p5 = scmp.lt.s32.totalorder %s8152_s2, %s8152_s2 }
  0x1f   :  { %p8159_p6 = por %p8158_p5, %p8157_p4 }
  0x21   :  { %p8160_p7 = pnand %p8159_p6, %p8153_p3 }
  0x23   :  { %8163 = shalt.err (!%p8160_p7)
}
  0x24   :  { %s8422_s27 = smov 64   ;;  %s8423_s3 = smov 4  }
  0x25   :  { %65 = dma.hbm_to_vmem [thread:$0]  %s9623_s5, 3072, %s60_s30, [#allocation8], %s8422_s27, %s8422_s27, %s8423_s3  }
  0x26   :  { %s8164_s1 = scalar_lea.hbm %s9595_s7, 16 }
  0x27   :  { %p8165_p8 = scmp.ne.s32.totalorder %s9595_s7, %s8164_s1  ;;  %p8168_p9 = scmp.lt.u32.totalorder %s8164_s1, %s9595_s7 }
  0x29   :  { %p8170_p10 = pnand %p8168_p9, %p8165_p8 }
  0x2b   :  { %8173 = shalt.err (!%p8170_p10)
}
  0x2c   :  { %s8174_s26 = scalar_lea.vmem %s8557_s0, 16  ;;  %s8178_s30 = scalar_lea.vmem %s8557_s0, 32 }
  0x2d   :  { %p8175_p11 = scmp.ne.s32.totalorder %s8557_s0, %s8174_s26  ;;  %p8179_p12 = scmp.lt.s32.totalorder %s8557_s0, %s8557_s0 }
  0x2e   :  { %p8180_p13 = scmp.lt.s32.totalorder %s8178_s30, %s8174_s26 }
  0x30   :  { %p8181_p0 = por %p8180_p13, %p8179_p12 }
  0x32   :  { %p8182_p1 = pnand %p8181_p0, %p8175_p11 }
  0x34   :  { %8185 = shalt.err (!%p8182_p1)
}
  0x35   :  { %87 = dma.hbm_to_vmem [thread:$0]  %s9595_s7, 16, %s8557_s0, [#allocation11]  }
  0x36   :  { %s8424_s28 = smov [#allocation13]   ;;  %s8425_s4 = smov [#allocation16]  }
  0x37   :  { %s107_s29 = sshll.u32 %s8424_s28, 4  ;;  %s131_s23 = sshll.u32 %s8425_s4, 4  ;;  %s108_s29 = int_to_ptr.vmem [resolvable:$true] %s107_s29  ;;  %s8592_s23 = int_to_ptr.vmem [resolvable:$true] %s131_s23 }
  0x38   :  { %s8186_s21 = scalar_lea.hbm %s9598_s10, 12288 }
  0x39   :  { %p8187_p2 = scmp.ne.s32.totalorder %s9598_s10, %s8186_s21  ;;  %p8190_p3 = scmp.lt.u32.totalorder %s8186_s21, %s9598_s10 }
  0x3b   :  { %p8192_p4 = pnand %p8190_p3, %p8187_p2 }
  0x3d   :  { %8195 = shalt.err (!%p8192_p4)
}
  0x3e   :  { %s8196_s7 = scalar_lea.vmem %s108_s29, 12288  ;;  %p8201_p6 = scmp.lt.s32.totalorder %s108_s29, %s108_s29 }
  0x3f   :  { %p8197_p5 = scmp.ne.s32.totalorder %s108_s29, %s8196_s7  ;;  %p8202_p7 = scmp.lt.s32.totalorder %s8196_s7, %s8196_s7 }
  0x41   :  { %p8203_p8 = por %p8202_p7, %p8201_p6 }
  0x43   :  { %p8204_p9 = pnand %p8203_p8, %p8197_p5 }
  0x45   :  { %8207 = shalt.err (!%p8204_p9)
}
  0x46   :  { %113 = dma.hbm_to_vmem [thread:$0]  %s9598_s10, 12288, %s108_s29, [#allocation14], %s8422_s27, %s8422_s27, %s8423_s3  }
  0x47   :  { %s8208_s4 = scalar_lea.hbm %s9600_s12, 4096 }
  0x48   :  { %p8209_p10 = scmp.ne.s32.totalorder %s9600_s12, %s8208_s4  ;;  %p8212_p11 = scmp.lt.u32.totalorder %s8208_s4, %s9600_s12 }
  0x4a   :  { %p8214_p12 = pnand %p8212_p11, %p8209_p10 }
  0x4c   :  { %8217 = shalt.err (!%p8214_p12)
}
  0x4d   :  { %s8218_s25 = scalar_lea.vmem %s8592_s23, 4096  ;;  %p8223_p0 = scmp.lt.s32.totalorder %s8592_s23, %s8592_s23 }
  0x4e   :  { %p8219_p13 = scmp.ne.s32.totalorder %s8592_s23, %s8218_s25  ;;  %p8224_p1 = scmp.lt.s32.totalorder %s8218_s25, %s8218_s25 }
  0x50   :  { %p8225_p2 = por %p8224_p1, %p8223_p0 }
  0x52   :  { %p8226_p3 = pnand %p8225_p2, %p8219_p13 }
  0x54   :  { %8229 = shalt.err (!%p8226_p3)
}
  0x55   :  { %137 = dma.hbm_to_vmem [thread:$0]  %s9600_s12, 4096, %s8592_s23, [#allocation17], %s8422_s27, %s8422_s27, %s8423_s3  }
  0x56   :  { %s8426_s26 = smov [#allocation19]   ;;  %s8427_s7 = smov [#allocation5]  }
  0x57   :  { %s155_s30 = sshll.u32 %s8426_s26, 4  ;;  %s45_s0 = sshll.u32 %s8427_s7, 4  ;;  %s156_s30 = int_to_ptr.vmem [resolvable:$true] %s155_s30  ;;  %s8629_s0 = int_to_ptr.vmem [resolvable:$true] %s45_s0 }
  0x58   :  { %s8230_s28 = scalar_lea.hbm %s9602_s14, 16384 }
  0x59   :  { %p8231_p4 = scmp.ne.s32.totalorder %s9602_s14, %s8230_s28  ;;  %p8234_p5 = scmp.lt.u32.totalorder %s8230_s28, %s9602_s14 }
  0x5b   :  { %p8236_p6 = pnand %p8234_p5, %p8231_p4 }
  0x5d   :  { %8239 = shalt.err (!%p8236_p6)
}
  0x5e   :  { %s8240_s12 = scalar_lea.vmem %s156_s30, 16384  ;;  %p8245_p8 = scmp.lt.s32.totalorder %s156_s30, %s156_s30 }
  0x5f   :  { %p8241_p7 = scmp.ne.s32.totalorder %s156_s30, %s8240_s12  ;;  %p8246_p9 = scmp.lt.s32.totalorder %s8240_s12, %s8240_s12 }
  0x61   :  { %p8247_p10 = por %p8246_p9, %p8245_p8 }
  0x63   :  { %p8248_p11 = pnand %p8247_p10, %p8241_p7 }
  0x65   :  { %8251 = shalt.err (!%p8248_p11)
}
  0x66   :  { %161 = dma.hbm_to_vmem [thread:$0]  %s9602_s14, 16384, %s156_s30, [#allocation20], %s8422_s27, %s8422_s27, %s8423_s3  }
  0x67   :  { %s9624_s29 = sld [smem:[#allocation33_spill]] }
  0x6d   :  { %s8252_s26 = scalar_lea.hbm %s9624_s29, 192 }
  0x6e   :  { %p8253_p12 = scmp.ne.s32.totalorder %s9624_s29, %s8252_s26  ;;  %p8256_p13 = scmp.lt.u32.totalorder %s8252_s26, %s9624_s29 }
  0x70   :  { %p8258_p0 = pnand %p8256_p13, %p8253_p12 }
  0x72   :  { %8261 = shalt.err (!%p8258_p0)
}
  0x73   :  { %s8262_s4 = scalar_lea.vmem %s8629_s0, 192  ;;  %p8267_p2 = scmp.lt.s32.totalorder %s8629_s0, %s8629_s0 }
  0x74   :  { %p8263_p1 = scmp.ne.s32.totalorder %s8629_s0, %s8262_s4  ;;  %p8268_p3 = scmp.lt.s32.totalorder %s8262_s4, %s8262_s4 }
  0x76   :  { %p8269_p4 = por %p8268_p3, %p8267_p2 }
  0x78   :  { %p8270_p5 = pnand %p8269_p4, %p8263_p1 }
  0x7a   :  { %8273 = shalt.err (!%p8270_p5)
}
  0x7b   :  { %51 = dma.hbm_to_vmem [thread:$0]  %s9624_s29, 192, %s8629_s0, [#allocation6], %s8422_s27, %s8422_s27, %s8423_s3  }
  0x7c   :  { %s8428_s1 = smov [#allocation9]   ;;  %s8429_s21 = smov [#allocation12]  }
  0x7d   :  { %s74_s24 = sshll.u32 %s8428_s1, 4  ;;  %s95_s12 = sshll.u32 %s8429_s21, 4  ;;  %s75_s24 = int_to_ptr.vmem [resolvable:$true] %s74_s24  ;;  %s8666_s12 = int_to_ptr.vmem [resolvable:$true] %s95_s12 }
  0x7e   :  { %s9625_s25 = sld [smem:[#allocation37_spill]] }
  0x84   :  { %s8274_s10 = scalar_lea.hbm %s9625_s25, 64 }
  0x85   :  { %p8275_p6 = scmp.ne.s32.totalorder %s9625_s25, %s8274_s10  ;;  %p8278_p7 = scmp.lt.u32.totalorder %s8274_s10, %s9625_s25 }
  0x87   :  { %p8280_p8 = pnand %p8278_p7, %p8275_p6 }
  0x89   :  { %8283 = shalt.err (!%p8280_p8)
}
  0x8a   :  { %s8284_s3 = scalar_lea.vmem %s75_s24, 64  ;;  %p8289_p10 = scmp.lt.s32.totalorder %s75_s24, %s75_s24 }
  0x8b   :  { %p8285_p9 = scmp.ne.s32.totalorder %s75_s24, %s8284_s3  ;;  %p8290_p11 = scmp.lt.s32.totalorder %s8284_s3, %s8284_s3 }
  0x8d   :  { %p8291_p12 = por %p8290_p11, %p8289_p10 }
  0x8f   :  { %p8292_p13 = pnand %p8291_p12, %p8285_p9 }
  0x91   :  { %8295 = shalt.err (!%p8292_p13)
}
  0x92   :  { %77 = dma.hbm_to_vmem [thread:$0]  %s9625_s25, 64, %s75_s24, [#allocation8]  }
  0x93   :  { %s8296_s14 = scalar_lea.hbm %s9597_s9, 64 }
  0x94   :  { %p8297_p0 = scmp.ne.s32.totalorder %s9597_s9, %s8296_s14  ;;  %p8300_p1 = scmp.lt.u32.totalorder %s8296_s14, %s9597_s9 }
  0x96   :  { %p8302_p2 = pnand %p8300_p1, %p8297_p0 }
  0x98   :  { %8305 = shalt.err (!%p8302_p2)
}
  0x99   :  { %s8306_s6 = scalar_lea.vmem %s8666_s12, 64  ;;  %p8311_p4 = scmp.lt.s32.totalorder %s8666_s12, %s8666_s12 }
  0x9a   :  { %p8307_p3 = scmp.ne.s32.totalorder %s8666_s12, %s8306_s6  ;;  %p8312_p5 = scmp.lt.s32.totalorder %s8306_s6, %s8306_s6 }
  0x9c   :  { %p8313_p6 = por %p8312_p5, %p8311_p4 }
  0x9e   :  { %p8314_p7 = pnand %p8313_p6, %p8307_p3 }
  0xa0   :  { %8317 = shalt.err (!%p8314_p7)
}
  0xa1   :  { %s8430_s24 = smov 16   ;;  %s8431_s25 = smov 1  }
  0xa2   :  { %101 = dma.hbm_to_vmem [thread:$0]  %s9597_s9, 64, %s8666_s12, [#allocation11], %s8430_s24, %s8430_s24, %s8431_s25  }
  0xa3   :  { %s8432_s7 = smov [#allocation15]   ;;  %s8433_s2 = smov [#allocation18]  }
  0xa4   :  { %s119_s5 = sshll.u32 %s8432_s7, 4  ;;  %s143_s3 = sshll.u32 %s8433_s2, 4  ;;  %s120_s5 = int_to_ptr.vmem [resolvable:$true] %s119_s5  ;;  %s8700_s3 = int_to_ptr.vmem [resolvable:$true] %s143_s3 }
  0xa5   :  { %s8318_s28 = scalar_lea.hbm %s9599_s11, 64 }
  0xa6   :  { %p8319_p8 = scmp.ne.s32.totalorder %s9599_s11, %s8318_s28  ;;  %p8322_p9 = scmp.lt.u32.totalorder %s8318_s28, %s9599_s11 }
  0xa8   :  { %p8324_p10 = pnand %p8322_p9, %p8319_p8 }
  0xaa   :  { %8327 = shalt.err (!%p8324_p10)
}
  0xab   :  { %s8328_s9 = scalar_lea.vmem %s120_s5, 64  ;;  %p8333_p12 = scmp.lt.s32.totalorder %s120_s5, %s120_s5 }
  0xac   :  { %p8329_p11 = scmp.ne.s32.totalorder %s120_s5, %s8328_s9  ;;  %p8334_p13 = scmp.lt.s32.totalorder %s8328_s9, %s8328_s9 }
  0xae   :  { %p8335_p0 = por %p8334_p13, %p8333_p12 }
  0xb0   :  { %p8336_p1 = pnand %p8335_p0, %p8329_p11 }
  0xb2   :  { %8339 = shalt.err (!%p8336_p1)
}
  0xb3   :  { %125 = dma.hbm_to_vmem [thread:$0]  %s9599_s11, 64, %s120_s5, [#allocation14], %s8430_s24, %s8430_s24, %s8431_s25  }
  0xb4   :  { %s8340_s10 = scalar_lea.hbm %s9601_s13, 64 }
  0xb5   :  { %p8341_p2 = scmp.ne.s32.totalorder %s9601_s13, %s8340_s10  ;;  %p8344_p3 = scmp.lt.u32.totalorder %s8340_s10, %s9601_s13 }
  0xb7   :  { %p8346_p4 = pnand %p8344_p3, %p8341_p2 }
  0xb9   :  { %8349 = shalt.err (!%p8346_p4)
}
  0xba   :  { %s8350_s29 = scalar_lea.vmem %s8700_s3, 64  ;;  %p8355_p6 = scmp.lt.s32.totalorder %s8700_s3, %s8700_s3 }
  0xbb   :  { %p8351_p5 = scmp.ne.s32.totalorder %s8700_s3, %s8350_s29  ;;  %p8356_p7 = scmp.lt.s32.totalorder %s8350_s29, %s8350_s29 }
  0xbd   :  { %p8357_p8 = por %p8356_p7, %p8355_p6 }
  0xbf   :  { %p8358_p9 = pnand %p8357_p8, %p8351_p5 }
  0xc1   :  { %8361 = shalt.err (!%p8358_p9)
}
  0xc2   :  { %149 = dma.hbm_to_vmem [thread:$0]  %s9601_s13, 64, %s8700_s3, [#allocation17], %s8430_s24, %s8430_s24, %s8431_s25  }
  0xc3   :  { %s8434_s28 = smov [#allocation21]   ;;  %s8435_s14 = smov [#allocation22]  }
  0xc4   :  { %s168_s4 = sshll.u32 %s8434_s28, 4  ;;  %s180_s30 = sshll.u32 %s8435_s14, 4  ;;  %s169_s4 = int_to_ptr.vmem [resolvable:$true] %s168_s4  ;;  %s181_s30 = int_to_ptr.vmem [resolvable:$true] %s180_s30 }
  0xc5   :  { %s8362_s12 = scalar_lea.hbm %s9603_s15, 16 }
  0xc6   :  { %p8363_p10 = scmp.ne.s32.totalorder %s9603_s15, %s8362_s12  ;;  %p8366_p11 = scmp.lt.u32.totalorder %s8362_s12, %s9603_s15 }
  0xc8   :  { %p8368_p12 = pnand %p8366_p11, %p8363_p10 }
  0xca   :  { %8371 = shalt.err (!%p8368_p12)
}
  0xcb   :  { %s8372_s13 = scalar_lea.vmem %s169_s4, 16  ;;  %s8376_s24 = scalar_lea.vmem %s169_s4, 32 }
  0xcc   :  { %p8373_p13 = scmp.ne.s32.totalorder %s169_s4, %s8372_s13  ;;  %p8377_p0 = scmp.lt.s32.totalorder %s169_s4, %s169_s4 }
  0xcd   :  { %p8378_p1 = scmp.lt.s32.totalorder %s8376_s24, %s8372_s13 }
  0xcf   :  { %p8379_p2 = por %p8378_p1, %p8377_p0 }
  0xd1   :  { %p8380_p3 = pnand %p8379_p2, %p8373_p13 }
  0xd3   :  { %8383 = shalt.err (!%p8380_p3)
}
  0xd4   :  { %171 = dma.hbm_to_vmem [thread:$0]  %s9603_s15, 16, %s169_s4, [#allocation20]  }
  0xd5   :  { %s8384_s2 = scalar_lea.hbm %s9605_s17, 16 }
  0xd6   :  { %p8385_p4 = scmp.ne.s32.totalorder %s9605_s17, %s8384_s2  ;;  %p8388_p5 = scmp.lt.u32.totalorder %s8384_s2, %s9605_s17 }
  0xd8   :  { %p8390_p6 = pnand %p8388_p5, %p8385_p4 }
  0xda   :  { %8393 = shalt.err (!%p8390_p6)
}
  0xdb   :  { %s8394_s28 = scalar_lea.vmem %s181_s30, 16  ;;  %s8398_s14 = scalar_lea.vmem %s181_s30, 32 }
  0xdc   :  { %p8395_p7 = scmp.ne.s32.totalorder %s181_s30, %s8394_s28  ;;  %p8399_p8 = scmp.lt.s32.totalorder %s181_s30, %s181_s30 }
  0xdd   :  { %p8400_p9 = scmp.lt.s32.totalorder %s8398_s14, %s8394_s28 }
  0xdf   :  { %p8401_p10 = por %p8400_p9, %p8399_p8 }
  0xe1   :  { %p8402_p11 = pnand %p8401_p10, %p8395_p7 }
  0xe3   :  { %8405 = shalt.err (!%p8402_p11)
}
  0xe4   :  { %183 = dma.hbm_to_vmem [thread:$0]  %s9605_s17, 16, %s181_s30, [#allocation23]  }
  0xe5   :  { %8406 = dma.done.wait [#allocation6], 192  }
  0xe6   :  { %8407 = vsyncadd [#allocation6], 4294967104 }
  0xe7   :  { %8408 = dma.done.wait [#allocation8], 3136  }
  0xe8   :  { %8409 = vsyncadd [#allocation8], 4294964160 }
  0xe9   :  { %8410 = dma.done.wait [#allocation11], 80  }
  0xea   :  { %8411 = vsyncadd [#allocation11], 4294967216 }
  0xeb   :  { %8412 = dma.done.wait [#allocation14], 12352  }
  0xec   :  { %8413 = vsyncadd [#allocation14], 4294954944 }
  0xed   :  { %8414 = dma.done.wait [#allocation17], 4160  }
  0xee   :  { %8415 = vsyncadd [#allocation17], 4294963136 }
  0xef   :  { %8416 = dma.done.wait [#allocation20], 16400  }
  0xf0   :  { %8417 = vsyncadd [#allocation20], 4294950896 }
  0xf1   :  { %8418 = dma.done.wait [#allocation23], 16  }
  0xf2   :  { %8419 = vsyncadd [#allocation23], 4294967280  ;;  %v8436_v1 = vmov 0.0   ;;  %vm8437_vm0 = vmmov 0   ;;  %v7764_v2 = vld [vmem:[#allocation5] sm:$0xff]   ;;  %vm377_vm1 = vcmask 1043456   ;;  %v233_v47 = vlaneseq }
  0xf3   :  { %7251 = vmatprep.subr.bf16.mxu0 %v8436_v1  ;;  %229 = vst [vmem:[#allocation2] sm:$0x1] %v8436_v1  ;;  %230 = vst [vmem:[#allocation2 + $0x25] sm:$0x1] %v8436_v1  ;;  %7255 = vmatprep.mubr.msk.bf16.mxu0 %vm8437_vm0, %v8436_v1  ;;  %v7765_v3 = vld [vmem:[#allocation5 + $0x8] ss:$0 sps:$4 sm:$0xff]  }
  0xf4   :  { %231 = vst [vmem:[#allocation3] sm:$0x1] %v8436_v1  ;;  %232 = vst [vmem:[#allocation3 + $0x25] sm:$0x1] %v8436_v1  ;;  %7267 = vmatprep.subr.bf16.mxu1 %v8436_v1  ;;  %7269 = vmatprep.mubr.msk.bf16.mxu1 %vm8437_vm0, %v8436_v1  ;;  %s9626_s1 = sld [smem:[#allocation31_spill]]  ;;  %v379_v6 = vsel %vm377_vm1, %v7765_v3, 0 }
  0xf5   :  { %7252 = vmatpush3.bf16.msra.mxu0 %v7764_v2  ;;  %v347_v7 = vld [vmem:[#allocation9] sm:$0xf]  ;;  %s9627_s6 = sld [smem:[#allocation32_spill]]  ;;  %vm466_vm2 = vcmask 64512   ;;  %vm367_vm3 = vcmask 195584   ;;  %v7768_v15 = vld [vmem:[#allocation7 + $0x48] sm:$0xff]  }
  0xf6   :  { %7253 = vmatprep.subr.bf16.mxu0 %v8436_v1  ;;  %v477_v9 = vsel %vm377_vm1, %v347_v7, 0  ;;  %v7766_v13 = vld [vmem:[#allocation7 + $0x40] sm:$0xff]   ;;  %v7769_v18 = vld [vmem:[#allocation7 + $0x8] sm:$0xff]   ;;  %v7770_v19 = vld [vmem:[#allocation7 + $0x50] sm:$0xff]   ;;  %v234_v48 = vshrl.u32 %v233_v47, 7  ;;  %s9629_s9 = sld [smem:[#allocation36_spill]] }
  0xf7   :  { %7268 = vmatpush3.bf16.msra.mxu1 %v477_v9  ;;  %v7767_v14 = vld [vmem:[#allocation7] sm:$0xff]   ;;  %v7772_v21 = vld [vmem:[#allocation7 + $0x10] sm:$0xff]   ;;  %v7773_v23 = vld [vmem:[#allocation7 + $0x58] sm:$0xff]  }
  0xf8   :  { %6597 = vmatprep.subr.bf16.mxu1 %v7766_v13  ;;  %v7771_v20 = vld [vmem:[#allocation7 + $0x80] sm:$0xff]   ;;  %v7774_v24 = vld [vmem:[#allocation7 + $0x88] sm:$0xff]   ;;  %v7775_v27 = vld [vmem:[#allocation7 + $0x18] sm:$0xff]   ;;  %vm239_vm4 = vcmp.ge.s32.totalorder %v234_v48, 1  ;;  %v236_v50 = vadd.s32 16, %v234_v48 }
  0xf9   :  { %7254 = vmatpush3.bf16.msra.mxu0 %v379_v6  ;;  %v7776_v31 = vld [vmem:[#allocation7 + $0x60] sm:$0xff]   ;;  %v7777_v32 = vld [vmem:[#allocation7 + $0x90] sm:$0xff]   ;;  %v7779_v34 = vld [vmem:[#allocation7 + $0x68] sm:$0xff]   ;;  %v8828_v49 = vsel %vm239_vm4, 1.0, %v8436_v1 }
  0xfa   :  { %v284_v4 = vld [vmem:[%s9626_s1] sm:$0xff]  ;;  %v285_v5 = vld [vmem:[%s9626_s1 + $0x8] sm:$0xff]  ;;  %7281 = vmatprep.subr.bf16.mxu0 %v8436_v1  ;;  %v286_v16 = vld [vmem:[%s9626_s1 + $0x10] sm:$0xff]  ;;  %vm246_vm5 = vcmp.lt.s32.totalorder %v236_v50, 17  ;;  %vm256_vm6 = vcmp.ge.s32.totalorder %v236_v50, 19 }
  0xfb   :  { %v289_v8 = vld [vmem:[%s9627_s6] sm:$0xff]  ;;  %v290_v10 = vld [vmem:[%s9627_s6 + $0x8] sm:$0xff]  ;;  %v349_v11 = vpack.c.bf16 %v285_v5, %v284_v4  ;;  %v287_v17 = vld [vmem:[%s9626_s1 + $0x18] sm:$0xff] }
  0xfc   :  { %v457_v12 = vpack.c.bf16 %v290_v10, %v289_v8  ;;  %v350_v22 = vpack.c.bf16 %v287_v17, %v286_v16  ;;  %v288_v25 = vld [vmem:[%s9626_s1 + $0x20] sm:$0xf]  ;;  %v291_v28 = vld [vmem:[%s9627_s6 + $0x10] sm:$0xff]  ;;  %v292_v29 = vld [vmem:[%s9627_s6 + $0x18] sm:$0xff]  ;;  %s9628_s1 = sld [smem:[#allocation34_spill]] }
  0xfd   :  { %7256 = vmatmul.mubr.msk.bf16.vlgmr.msra.gmra.mrb[0].mxu0 %vm367_vm3, %v349_v11  ;;  %v351_v26 = vpack.c.bf16 %v288_v25, %v288_v25  ;;  %v458_v30 = vpack.c.bf16 %v292_v29, %v291_v28  ;;  %v7778_v33 = vld [vmem:[#allocation7 + $0x20] sm:$0xff]   ;;  %v7780_v35 = vld [vmem:[#allocation7 + $0x98] sm:$0xff]   ;;  %v7781_v36 = vld [vmem:[#allocation7 + $0x28] sm:$0xff]   ;;  %v238_v11 = vadd.s32 32, %v234_v48 }
  0xfe   :  { %7270 = vmatmul.mubr.msk.bf16.vlgmr.msra.gmra.mrb[0].mxu1 %vm466_vm2, %v457_v12  ;;  %7259 = vmatprep.mubr.msk.bf16.mxu0 %vm8437_vm0, %v8436_v1  ;;  %v293_v37 = vld [vmem:[%s9627_s6 + $0x20] sm:$0xf]  ;;  %v7782_v39 = vld [vmem:[#allocation7 + $0x70] sm:$0xff]   ;;  %v7785_v42 = vld [vmem:[#allocation7 + $0x78] sm:$0xff]  }
  0xff   :  { %6598 = vmatpush3.bf16.msra.mxu1 %v7767_v14  ;;  %7273 = vmatprep.mubr.msk.bf16.mxu1 %vm8437_vm0, %v8436_v1  ;;  %v459_v38 = vpack.c.bf16 %v293_v37, %v293_v37  ;;  %v7783_v40 = vld [vmem:[#allocation7 + $0xa0] sm:$0xff]   ;;  %v7784_v41 = vld [vmem:[#allocation7 + $0x30] sm:$0xff]   ;;  %v7786_v43 = vld [vmem:[#allocation7 + $0xa8] sm:$0xff]   ;;  %vm263_vm12 = vcmp.lt.s32.totalorder %v238_v11, 35 }
 0x100   :  { %6599 = vmatprep.subr.bf16.mxu1 %v7768_v15  ;;  %7282 = vmatpush3.bf16.msra.mxu0 %v7771_v20  ;;  %v7787_v44 = vld [vmem:[#allocation7 + $0x38] sm:$0xff]   ;;  %v7788_v45 = vld [vmem:[#allocation7 + $0xb0] sm:$0xff]   ;;  %v7790_v51 = vld [vmem:[%s9596_s8 + $0x40] sm:$0xff]   ;;  %v8854_v28 = vsel %vm263_vm12, 1.0, %v8436_v1 }
 0x101   :  { %7283 = vmatprep.subr.bf16.mxu0 %v8436_v1  ;;  %v7789_v46 = vld [vmem:[#allocation7 + $0xb8] sm:$0xff]   ;;  %vm271_vm9 = vmor %vm246_vm5, %vm256_vm6  ;;  %v7792_v25 = vld [vmem:[%s9596_s8 + $0x48] sm:$0xff]  }
 0x102   :  { %v6039_v52 = vld [vmem:[%s9628_s1] ss:$0 sm:$0xff]  ;;  %v8844_v7 = vsel %vm271_vm9, 1.0, %v8436_v1  ;;  %v7806_v11 = vld [vmem:[%s9596_s8 + $0x70] sm:$0xff]  }
 0x103   :  { %6600 = vmatpush3.bf16.msra.mxu1 %v7769_v18 }
 0x104   :  { %6601 = vmatprep.subr.bf16.mxu1 %v7770_v19  ;;  %7284 = vmatpush3.bf16.msra.mxu0 %v7774_v24 }
 0x105   :  { %7260 = vmatmul.mubr.msk.bf16.gmra.mrb[4].mxu0 %vm367_vm3, %v350_v22  ;;  %7285 = vmatprep.subr.bf16.mxu0 %v8436_v1 }
 0x106   :  { %7263 = vmatprep.mubr.msk.bf16.mxu0 %vm8437_vm0, %v8436_v1  ;;  %7274 = vmatmul.mubr.msk.bf16.gmra.mrb[4].mxu1 %vm466_vm2, %v458_v30 }
 0x107   :  { %6602 = vmatpush3.bf16.msra.mxu1 %v7772_v21  ;;  %7277 = vmatprep.mubr.msk.bf16.mxu1 %vm8437_vm0, %v8436_v1  ;;  %v7791_v21 = vld [vmem:[%s9596_s8] sm:$0xff]  }
 0x108   :  { %6603 = vmatprep.subr.bf16.mxu1 %v7773_v23  ;;  %7286 = vmatpush3.bf16.msra.mxu0 %v7777_v32 }
 0x109   :  { %7287 = vmatprep.subr.bf16.mxu0 %v8436_v1 }
 0x10b   :  { %6604 = vmatpush3.bf16.msra.mxu1 %v7775_v27 }
 0x10c   :  { %6605 = vmatprep.subr.bf16.mxu1 %v7776_v31  ;;  %7288 = vmatpush3.bf16.msra.mxu0 %v7780_v35 }
 0x10d   :  { %7264 = vmatmul.mubr.msk.bf16.gmra.mrb[8].mxu0 %vm367_vm3, %v351_v26  ;;  %7289 = vmatprep.subr.bf16.mxu0 %v8436_v1 }
 0x10e   :  { %7297 = vmatprep.mubr.msk.bf16.mxu0 %vm8437_vm0, %v8436_v1  ;;  %7278 = vmatmul.mubr.msk.bf16.gmra.mrb[8].mxu1 %vm466_vm2, %v459_v38 }
 0x10f   :  { %6606 = vmatpush3.bf16.msra.mxu1 %v7778_v33 }
 0x110   :  { %6607 = vmatprep.subr.bf16.mxu1 %v7779_v34  ;;  %7290 = vmatpush3.bf16.msra.mxu0 %v7783_v40 }
 0x111   :  { %7291 = vmatprep.subr.bf16.mxu0 %v8436_v1 }
 0x113   :  { %6608 = vmatpush3.bf16.msra.mxu1 %v7781_v36 }
 0x114   :  { %6609 = vmatprep.subr.bf16.mxu1 %v7782_v39  ;;  %7292 = vmatpush3.bf16.msra.mxu0 %v7786_v43 }
 0x115   :  { %7293 = vmatprep.subr.bf16.mxu0 %v8436_v1 }
 0x117   :  { %6610 = vmatpush3.bf16.msra.mxu1 %v7784_v41 }
 0x118   :  { %6611 = vmatprep.subr.bf16.mxu1 %v7785_v42  ;;  %7294 = vmatpush3.bf16.msra.mxu0 %v7788_v45 }
 0x119   :  { %7295 = vmatprep.subr.bf16.mxu0 %v8436_v1 }
 0x11b   :  { %6612 = vmatpush3.bf16.msra.mxu1 %v7787_v44 }
 0x11c   :  { %7296 = vmatpush3.bf16.msra.mxu0 %v7789_v46  ;;  %6642 = vmatprep.subr.bf16.mxu1 %v7790_v51 }
 0x11d   :  { %7309 = vmatprep.subr.bf16.mxu0 %v8436_v1 }
 0x1d0   :  { %v415_v54 = vpop.f32.mrb[0].mxu0 }
 0x1d1   :  { %v8836_v53 = vpop.f32.mrb[0].mxu1  ;;  %v416_v56 = vadd.f32 %v6039_v52, %v415_v54  ;;  %v7257_v57 = vpop.f32.mrb[1].mxu0 }
 0x1d2   :  { %v7271_v55 = vpop.f32.mrb[1].mxu1  ;;  %v418_v59 = vpop.f32.mrb[2].mxu0 }
 0x1d3   :  { %v8838_v58 = vpop.f32.mrb[2].mxu1  ;;  %vm437_vm7 = vcmp.gt.f32.partialorder %v416_v56, 0.0  ;;  %v442_v61 = vmul.f32 0.01, %v416_v56  ;;  %v419_v62 = vadd.f32 %v6039_v52, %v418_v59  ;;  %v7258_v63 = vpop.f32.mrb[3].mxu0 }
 0x1d4   :  { %v7272_v60 = vpop.f32.mrb[3].mxu1  ;;  %v7796_v63 = vld [vmem:[%s9596_s8 + $0x80] sm:$0xff]  }
 0x1d5   :  { %v447_v0 = vsel %vm437_vm7, %v416_v56, %v442_v61  ;;  %vm438_vm8 = vcmp.gt.f32.partialorder %v419_v62, 0.0  ;;  %v443_v2 = vmul.f32 0.01, %v419_v62  ;;  %v7793_v60 = vld [vmem:[%s9596_s8 + $0x8] sm:$0xff]   ;;  %v7794_v61 = vld [vmem:[%s9596_s8 + $0x50] sm:$0xff]  }
 0x1d6   :  { %v452_v3 = vmul.f32 %v8828_v49, %v447_v0  ;;  %v7797_v0 = vld [vmem:[%s9596_s8 + $0x58] sm:$0xff]  }
 0x1d7   :  { %v448_v4 = vsel %vm438_vm8, %v419_v62, %v443_v2  ;;  %v7795_v62 = vld [vmem:[%s9596_s8 + $0x10] sm:$0xff]   ;;  %v7798_v2 = vld [vmem:[%s9596_s8 + $0x18] sm:$0xff]  }
 0x1d8   :  { %535 = vst [vmem:[#allocation3 + $0x1] sm:$0xff] %v452_v3  ;;  %536 = vst [vmem:[#allocation3 + $0x9] sm:$0xff] %v448_v4  ;;  %v423_v5 = vpop.f32.mrb[4].mxu0  ;;  %v556_v6 = vpack.c.bf16 %v448_v4, %v452_v3  ;;  %v7799_v3 = vld [vmem:[%s9596_s8 + $0x88] sm:$0xff]   ;;  %v7800_v4 = vld [vmem:[%s9596_s8 + $0x60] sm:$0xff]  }
 0x1d9   :  { %v424_v8 = vadd.f32 %v6039_v52, %v423_v5  ;;  %v7261_v9 = vpop.f32.mrb[5].mxu0  ;;  %v8863_v50 = vpop.f32.mrb[4].mxu1  ;;  %v7801_v5 = vld [vmem:[%s9596_s8 + $0x20] sm:$0xff]  }
 0x1da   :  { %v426_v10 = vpop.f32.mrb[6].mxu0  ;;  %746 = vmatprep.mubr.bf16.mxu1 %v556_v6  ;;  %v7275_v51 = vpop.f32.mrb[5].mxu1  ;;  %v7802_v6 = vld [vmem:[%s9596_s8 + $0x90] sm:$0xff]   ;;  %v7804_v9 = vld [vmem:[%s9596_s8 + $0x28] sm:$0xff]  }
 0x1db   :  { %vm439_vm10 = vcmp.gt.f32.partialorder %v424_v8, 0.0  ;;  %v444_v12 = vmul.f32 0.01, %v424_v8  ;;  %v427_v13 = vadd.f32 %v6039_v52, %v426_v10  ;;  %v7262_v14 = vpop.f32.mrb[7].mxu0  ;;  %v7805_v10 = vld [vmem:[%s9596_s8 + $0x98] sm:$0xff]  }
 0x1dc   :  { %v7809_v14 = vld [vmem:[%s9596_s8 + $0x78] sm:$0xff]  }
 0x1dd   :  { %v449_v15 = vsel %vm439_vm10, %v424_v8, %v444_v12  ;;  %vm440_vm11 = vcmp.gt.f32.partialorder %v427_v13, 0.0  ;;  %v445_v16 = vmul.f32 0.01, %v427_v13  ;;  %v7803_v8 = vld [vmem:[%s9596_s8 + $0x68] sm:$0xff]   ;;  %v7807_v12 = vld [vmem:[%s9596_s8 + $0x30] sm:$0xff]  }
 0x1de   :  { %v454_v17 = vmul.f32 %v8844_v7, %v449_v15  ;;  %v7810_v15 = vld [vmem:[%s9596_s8 + $0x38] sm:$0xff]  }
 0x1df   :  { %v450_v18 = vsel %vm440_vm11, %v427_v13, %v445_v16  ;;  %v540_v19 = vld [vmem:[#allocation3] sm:$0xff]  ;;  %v541_v20 = vld [vmem:[#allocation3 + $0x8] sm:$0xff]  ;;  %v7808_v13 = vld [vmem:[%s9596_s8 + $0xa0] sm:$0xff]  }
 0x1e0   :  { %537 = vst [vmem:[#allocation3 + $0x11] sm:$0xff] %v454_v17  ;;  %538 = vst [vmem:[#allocation3 + $0x19] sm:$0xff] %v450_v18  ;;  %v431_v22 = vpop.f32.mrb[8].mxu0  ;;  %v555_v23 = vpack.c.bf16 %v541_v20, %v540_v19  ;;  %v559_v24 = vpack.c.bf16 %v450_v18, %v454_v17  ;;  %v550_v33 = vld [vmem:[#allocation3 + $0x2] sm:$0xff]  ;;  %v7814_v18 = vld [vmem:[%s9596_s8 + $0xb8] sm:$0xff]  }
 0x1e1   :  { %v432_v26 = vadd.f32 %v6039_v52, %v431_v22  ;;  %v7265_v27 = vpop.f32.mrb[9].mxu0  ;;  %v8865_v52 = vpop.f32.mrb[6].mxu1  ;;  %v7811_v16 = vld [vmem:[%s9596_s8 + $0xa8] sm:$0xff]   ;;  %v7812_v17 = vld [vmem:[%s9596_s8 + $0xb0] sm:$0xff]  }
 0x1e2   :  { %v434_v29 = vpop.f32.mrb[10].mxu0  ;;  %747 = vmatmul.mubr.bf16.vlgmr.msra.gmra.mrb[12].mxu1 %v555_v23  ;;  %v7276_v54 = vpop.f32.mrb[7].mxu1  ;;  %v7822_v19 = vld [vmem:[#allocation13 + $0x40] sm:$0xff]  }
 0x1e3   :  { %vm441_vm13 = vcmp.gt.f32.partialorder %v432_v26, 0.0  ;;  %v446_v30 = vmul.f32 0.01, %v432_v26  ;;  %v7266_v31 = vpop.f32.mrb[11].mxu0  ;;  %754 = vmatprep.mubr.bf16.mxu1 %v559_v24  ;;  %6643 = vmatpush3.bf16.msra.mxu1 %v7791_v21  ;;  %v8867_v55 = vpop.f32.mrb[8].mxu1 }
 0x1e4   :  { %6644 = vmatprep.subr.bf16.mxu1 %v7792_v25  ;;  %v7279_v56 = vpop.f32.mrb[9].mxu1  ;;  %v8943_v31 = vld [vmem:[#allocation10] ss:$0 sm:$0xff] }
 0x1e5   :  { %v451_v32 = vsel %vm441_vm13, %v432_v26, %v446_v30  ;;  %v532_v57 = vpop.f32.mrb[10].mxu1  ;;  %v6049_v26 = vld [vmem:[%s9629_s9] ss:$0 sm:$0xff] }
 0x1e6   :  { %v456_v34 = vmul.f32 %v8854_v28, %v451_v32  ;;  %v7280_v59 = vpop.f32.mrb[11].mxu1 }
 0x1e7   :  { %v551_v35 = vld [vmem:[#allocation3 + $0xa] sm:$0xff]  ;;  %v543_v37 = vld [vmem:[#allocation3 + $0x18] sm:$0xff]  ;;  %6645 = vmatpush3.bf16.msra.mxu1 %v7793_v60 }
 0x1e8   :  { %v542_v36 = vld [vmem:[#allocation3 + $0x10] sm:$0xff]  ;;  %539 = vst [vmem:[#allocation3 + $0x21] sm:$0xf] %v456_v34  ;;  %v557_v38 = vpack.c.bf16 %v551_v35, %v550_v33  ;;  %6646 = vmatprep.subr.bf16.mxu1 %v7794_v61 }
 0x1e9   :  { %v558_v39 = vpack.c.bf16 %v543_v37, %v542_v36  ;;  %v552_v40 = vld [vmem:[#allocation3 + $0x12] sm:$0xff] }
 0x1ea   :  { %7298 = vmatmul.mubr.bf16.vlgmr.msra.gmra.mrb[12].mxu0 %v557_v38 }
 0x1eb   :  { %755 = vmatmul.mubr.bf16.gmra.mrb[16].mxu1 %v558_v39  ;;  %7301 = vmatprep.mubr.msk.bf16.mxu0 %vm8437_vm0, %v8436_v1 }
 0x1ec   :  { %6647 = vmatpush3.bf16.msra.mxu1 %v7795_v62  ;;  %7310 = vmatpush3.bf16.msra.mxu0 %v7796_v63 }
 0x1ed   :  { %7311 = vmatprep.subr.bf16.mxu0 %v8436_v1  ;;  %6648 = vmatprep.subr.bf16.mxu1 %v7797_v0 }
 0x1ef   :  { %v549_v41 = vld [vmem:[#allocation3 + $0x21] sm:$0xf] }
 0x1f0   :  { %v553_v42 = vld [vmem:[#allocation3 + $0x1a] sm:$0xff]  ;;  %v562_v44 = vpack.c.bf16 %v549_v41, %v549_v41  ;;  %v554_v47 = vld [vmem:[#allocation3 + $0x22] sm:$0xf]  ;;  %6649 = vmatpush3.bf16.msra.mxu1 %v7798_v2  ;;  %7312 = vmatpush3.bf16.msra.mxu0 %v7799_v3 }
 0x1f1   :  { %v544_v43 = vld [vmem:[#allocation3 + $0x20] sm:$0xf]  ;;  %v560_v45 = vpack.c.bf16 %v553_v42, %v552_v40  ;;  %v563_v48 = vpack.c.bf16 %v554_v47, %v554_v47  ;;  %7313 = vmatprep.subr.bf16.mxu0 %v8436_v1  ;;  %6650 = vmatprep.subr.bf16.mxu1 %v7800_v4  ;;  %v517_v47 = vadd.f32 %v8943_v31, %v8838_v58 }
 0x1f2   :  { %v561_v46 = vpack.c.bf16 %v544_v43, %v544_v43  ;;  %762 = vmatprep.mubr.bf16.mxu1 %v562_v44  ;;  %v514_v43 = vadd.f32 %v8943_v31, %v8836_v53 }
 0x1f3   :  { %7302 = vmatmul.mubr.bf16.gmra.mrb[16].mxu0 %v560_v45 }
 0x1f4   :  { %763 = vmatmul.mubr.bf16.gmra.mrb[20].mxu1 %v561_v46  ;;  %7305 = vmatprep.mubr.msk.bf16.mxu0 %vm8437_vm0, %v8436_v1 }
 0x1f5   :  { %6651 = vmatpush3.bf16.msra.mxu1 %v7801_v5  ;;  %7314 = vmatpush3.bf16.msra.mxu0 %v7802_v6 }
 0x1f6   :  { %7315 = vmatprep.subr.bf16.mxu0 %v8436_v1  ;;  %6652 = vmatprep.subr.bf16.mxu1 %v7803_v8  ;;  %v522_v8 = vadd.f32 %v8943_v31, %v8863_v50 }
 0x1f9   :  { %6653 = vmatpush3.bf16.msra.mxu1 %v7804_v9  ;;  %7316 = vmatpush3.bf16.msra.mxu0 %v7805_v10 }
 0x1fa   :  { %7317 = vmatprep.subr.bf16.mxu0 %v8436_v1  ;;  %6654 = vmatprep.subr.bf16.mxu1 %v7806_v11 }
 0x1fb   :  { %7306 = vmatmul.mubr.bf16.gmra.mrb[20].mxu0 %v563_v48 }
 0x1fc   :  { %7325 = vmatprep.mubr.msk.bf16.mxu0 %vm8437_vm0, %v8436_v1 }
 0x1fd   :  { %6655 = vmatpush3.bf16.msra.mxu1 %v7807_v12  ;;  %7318 = vmatpush3.bf16.msra.mxu0 %v7808_v13  ;;  %v525_v12 = vadd.f32 %v8943_v31, %v8865_v52 }
 0x1fe   :  { %7319 = vmatprep.subr.bf16.mxu0 %v8436_v1  ;;  %6656 = vmatprep.subr.bf16.mxu1 %v7809_v14 }
 0x201   :  { %6657 = vmatpush3.bf16.msra.mxu1 %v7810_v15  ;;  %7320 = vmatpush3.bf16.msra.mxu0 %v7811_v16 }
 0x202   :  { %7337 = vmatprep.subr.bf16.mxu1 %v8436_v1  ;;  %7321 = vmatprep.subr.bf16.mxu0 %v8436_v1 }
 0x205   :  { %7322 = vmatpush3.bf16.msra.mxu0 %v7812_v17 }
 0x206   :  { %7323 = vmatprep.subr.bf16.mxu0 %v8436_v1 }
 0x209   :  { %7324 = vmatpush3.bf16.msra.mxu0 %v7814_v18 }
 0x20a   :  { %6698 = vmatprep.subr.bf16.mxu0 %v7822_v19 }
 0x2b5   :  { %v6613_v20 = vpop.f32.mrb[12].mxu1 }
 0x2b6   :  { %v6614_v21 = vpop.f32.mrb[13].mxu1 }
 0x2b7   :  { %v6615_v22 = vadd.f32 %v6614_v21, %v6613_v20  ;;  %v6616_v23 = vpop.f32.mrb[14].mxu1 }
 0x2b8   :  { %v6617_v24 = vpop.f32.mrb[15].mxu1 }
 0x2b9   :  { %v6618_v25 = vadd.f32 %v6617_v24, %v6616_v23  ;;  %v749_v27 = vadd.f32 %v6615_v22, %v6049_v26  ;;  %v7813_v22 = vld [vmem:[#allocation16] sm:$0xff]  }
 0x2bb   :  { %v752_v35 = vadd.f32 %v6618_v25, %v6049_v26 }
 0x2bd   :  { %v804_v29 = vpop.f32.mrb[12].mxu0 }
 0x2be   :  { %v6619_v30 = vpop.f32.mrb[16].mxu1  ;;  %v805_v32 = vadd.f32 %v804_v29, %v749_v27  ;;  %v7299_v33 = vpop.f32.mrb[13].mxu0 }
 0x2bf   :  { %v6620_v34 = vpop.f32.mrb[17].mxu1  ;;  %v807_v37 = vpop.f32.mrb[14].mxu0 }
 0x2c0   :  { %v6621_v36 = vadd.f32 %v6620_v34, %v6619_v30  ;;  %v6622_v38 = vpop.f32.mrb[18].mxu1  ;;  %vm826_vm14 = vcmp.gt.f32.partialorder %v805_v32, 0.0  ;;  %v831_v39 = vmul.f32 0.01, %v805_v32  ;;  %v808_v40 = vadd.f32 %v807_v37, %v752_v35  ;;  %v7300_v41 = vpop.f32.mrb[15].mxu0  ;;  %v7815_v30 = vld [vmem:[#allocation16 + $0x8] sm:$0xff]  }
 0x2c1   :  { %v6623_v42 = vpop.f32.mrb[19].mxu1  ;;  %v7816_v35 = vld [vmem:[#allocation16 + $0x10] sm:$0xff]   ;;  %v7817_v41 = vld [vmem:[#allocation16 + $0x18] sm:$0xff]  }
 0x2c2   :  { %v6624_v44 = vadd.f32 %v6623_v42, %v6622_v38  ;;  %v836_v45 = vsel %vm826_vm14, %v805_v32, %v831_v39  ;;  %vm827_vm15 = vcmp.gt.f32.partialorder %v808_v40, 0.0  ;;  %v832_v46 = vmul.f32 0.01, %v808_v40  ;;  %v7825_v42 = vld [vmem:[#allocation13 + $0x8] sm:$0xff]  }
 0x2c3   :  { %v841_v48 = vadd.f32 %v836_v45, %v514_v43  ;;  %v757_v54 = vadd.f32 %v6621_v36, %v6049_v26 }
 0x2c4   :  { %v837_v51 = vsel %vm827_vm15, %v808_v40, %v832_v46  ;;  %v760_v63 = vadd.f32 %v6624_v44, %v6049_v26  ;;  %v7824_v40 = vld [vmem:[#allocation13 + $0x48] sm:$0xff]  }
 0x2c5   :  { %v846_v56 = vmul.f32 %v8828_v49, %v841_v48  ;;  %v842_v57 = vadd.f32 %v837_v51, %v517_v47 }
 0x2c6   :  { %v812_v59 = vpop.f32.mrb[16].mxu0 }
 0x2c7   :  { %v813_v60 = vadd.f32 %v812_v59, %v757_v54  ;;  %v6625_v61 = vpop.f32.mrb[20].mxu1  ;;  %v7303_v62 = vpop.f32.mrb[17].mxu0  ;;  %851 = vst [vmem:[#allocation2 + $0x1] sm:$0xff] %v846_v56  ;;  %852 = vst [vmem:[#allocation2 + $0x9] sm:$0xff] %v842_v57  ;;  %v8950_v2 = vpack.c.bf16 %v842_v57, %v846_v56  ;;  %v7818_v54 = vld [vmem:[#allocation16 + $0x20] sm:$0xff]   ;;  %v7819_v56 = vld [vmem:[#allocation16 + $0x28] sm:$0xff]  }
 0x2c8   :  { %v6626_v53 = vpop.f32.mrb[21].mxu1  ;;  %v815_v0 = vpop.f32.mrb[18].mxu0  ;;  %v7826_v62 = vld [vmem:[#allocation13 + $0x50] sm:$0xff]  }
 0x2c9   :  { %vm828_vm1 = vcmp.gt.f32.partialorder %v813_v60, 0.0  ;;  %v833_v3 = vmul.f32 0.01, %v813_v60  ;;  %v6627_v58 = vadd.f32 %v6626_v53, %v6625_v61  ;;  %v816_v4 = vadd.f32 %v815_v0, %v760_v63  ;;  %v6628_v5 = vpop.f32.mrb[22].mxu1  ;;  %v7304_v6 = vpop.f32.mrb[19].mxu0  ;;  %1177 = vmatprep.mubr.bf16.mxu1 %v8950_v2  ;;  %v7821_v61 = vld [vmem:[#allocation16 + $0x38] sm:$0xff]  }
 0x2ca   :  { %v6629_v9 = vpop.f32.mrb[23].mxu1  ;;  %v7827_v63 = vld [vmem:[#allocation13 + $0x80] sm:$0xff]   ;;  %v7828_v53 = vld [vmem:[#allocation13 + $0x10] sm:$0xff]   ;;  %v7829_v0 = vld [vmem:[#allocation13 + $0x58] sm:$0xff]  }
 0x2cb   :  { %v838_v10 = vsel %vm828_vm1, %v813_v60, %v833_v3  ;;  %vm829_vm2 = vcmp.gt.f32.partialorder %v816_v4, 0.0  ;;  %v834_v11 = vmul.f32 0.01, %v816_v4  ;;  %v765_v15 = vadd.f32 %v6627_v58, %v6049_v26  ;;  %v7820_v60 = vld [vmem:[#allocation16 + $0x30] sm:$0xff]   ;;  %v7830_v3 = vld [vmem:[#allocation13 + $0x88] sm:$0xff]   ;;  %v7832_v58 = vld [vmem:[#allocation13 + $0x60] sm:$0xff]  }
 0x2cc   :  { %v843_v13 = vadd.f32 %v838_v10, %v522_v8  ;;  %v530_v26 = vadd.f32 %v8943_v31, %v8867_v55  ;;  %v7823_v31 = vld [vmem:[#allocation13] sm:$0xff]   ;;  %v7835_v6 = vld [vmem:[#allocation13 + $0x68] sm:$0xff]   ;;  %v7836_v8 = vld [vmem:[#allocation13 + $0x98] sm:$0xff]  }
 0x2cd   :  { %v839_v14 = vsel %vm829_vm2, %v816_v4, %v834_v11  ;;  %v7833_v4 = vld [vmem:[#allocation13 + $0x90] sm:$0xff]   ;;  %v7834_v5 = vld [vmem:[#allocation13 + $0x20] sm:$0xff]   ;;  %v7837_v9 = vld [vmem:[#allocation13 + $0x28] sm:$0xff]  }
 0x2ce   :  { %v848_v16 = vmul.f32 %v8844_v7, %v843_v13  ;;  %v844_v17 = vadd.f32 %v839_v14, %v525_v12  ;;  %v820_v18 = vpop.f32.mrb[20].mxu0  ;;  %v856_v21 = vld [vmem:[#allocation2] sm:$0xff]  ;;  %v857_v50 = vld [vmem:[#allocation2 + $0x8] sm:$0xff]  ;;  %v7838_v10 = vld [vmem:[#allocation13 + $0x70] sm:$0xff]  }
 0x2cf   :  { %v821_v19 = vadd.f32 %v820_v18, %v765_v15  ;;  %v7307_v20 = vpop.f32.mrb[21].mxu0  ;;  %v986_v24 = vpack.c.bf16 %v857_v50, %v856_v21  ;;  %v866_v34 = vld [vmem:[#allocation2 + $0x2] sm:$0xff]  ;;  %v7840_v12 = vld [vmem:[#allocation13 + $0x30] sm:$0xff]   ;;  %v7842_v14 = vld [vmem:[#allocation13 + $0xa8] sm:$0xff]  }
 0x2d0   :  { %853 = vst [vmem:[#allocation2 + $0x11] sm:$0xff] %v848_v16  ;;  %854 = vst [vmem:[#allocation2 + $0x19] sm:$0xff] %v844_v17  ;;  %v823_v23 = vpop.f32.mrb[22].mxu0  ;;  %v8958_v25 = vpack.c.bf16 %v844_v17, %v848_v16  ;;  %v7839_v11 = vld [vmem:[#allocation13 + $0xa0] sm:$0xff]   ;;  %v7841_v13 = vld [vmem:[#allocation13 + $0x78] sm:$0xff]  }
 0x2d1   :  { %vm830_vm3 = vcmp.gt.f32.partialorder %v821_v19, 0.0  ;;  %v835_v52 = vmul.f32 0.01, %v821_v19  ;;  %v7308_v27 = vpop.f32.mrb[23].mxu0  ;;  %1178 = vmatmul.mubr.bf16.vlgmr.msra.gmra.mrb[24].mxu1 %v986_v24  ;;  %v7843_v15 = vld [vmem:[#allocation13 + $0x38] sm:$0xff]   ;;  %v7844_v16 = vld [vmem:[#allocation13 + $0xb0] sm:$0xff]  }
 0x2d2   :  { %7338 = vmatpush3.bf16.msra.mxu1 %v7813_v22  ;;  %1185 = vmatprep.mubr.bf16.mxu1 %v8958_v25  ;;  %v7845_v17 = vld [vmem:[#allocation13 + $0xb8] sm:$0xff]  }
 0x2d3   :  { %v840_v29 = vsel %vm830_vm3, %v821_v19, %v835_v52  ;;  %7339 = vmatprep.subr.bf16.mxu1 %v8436_v1  ;;  %v7846_v18 = vld [vmem:[%s9596_s8 + $0x100] sm:$0xff]  }
 0x2d4   :  { %v845_v32 = vadd.f32 %v840_v29, %v530_v26  ;;  %v6074_v24 = vld [vmem:[#allocation12] ss:$0 sm:$0xff] }
 0x2d6   :  { %v850_v33 = vmul.f32 %v8854_v28, %v845_v32  ;;  %7340 = vmatpush3.bf16.msra.mxu1 %v7815_v30 }
 0x2d7   :  { %v867_v36 = vld [vmem:[#allocation2 + $0xa] sm:$0xff]  ;;  %v859_v38 = vld [vmem:[#allocation2 + $0x18] sm:$0xff]  ;;  %7341 = vmatprep.subr.bf16.mxu1 %v8436_v1 }
 0x2d8   :  { %v858_v37 = vld [vmem:[#allocation2 + $0x10] sm:$0xff]  ;;  %855 = vst [vmem:[#allocation2 + $0x21] sm:$0xf] %v850_v33  ;;  %v988_v39 = vpack.c.bf16 %v867_v36, %v866_v34 }
 0x2d9   :  { %v989_v55 = vpack.c.bf16 %v859_v38, %v858_v37  ;;  %v868_v43 = vld [vmem:[#allocation2 + $0x12] sm:$0xff] }
 0x2da   :  { %7326 = vmatmul.mubr.bf16.vlgmr.msra.gmra.mrb[24].mxu0 %v988_v39  ;;  %7342 = vmatpush3.bf16.msra.mxu1 %v7816_v35 }
 0x2db   :  { %1186 = vmatmul.mubr.bf16.gmra.mrb[28].mxu1 %v989_v55  ;;  %7329 = vmatprep.mubr.msk.bf16.mxu0 %vm8437_vm0, %v8436_v1 }
 0x2dc   :  { %7343 = vmatprep.subr.bf16.mxu1 %v8436_v1  ;;  %6699 = vmatpush3.bf16.msra.mxu0 %v7823_v31 }
 0x2dd   :  { %6700 = vmatprep.subr.bf16.mxu0 %v7824_v40 }
 0x2de   :  { %7344 = vmatpush3.bf16.msra.mxu1 %v7817_v41 }
 0x2df   :  { %v865_v44 = vld [vmem:[#allocation2 + $0x21] sm:$0xf]  ;;  %7345 = vmatprep.subr.bf16.mxu1 %v8436_v1 }
 0x2e0   :  { %v869_v45 = vld [vmem:[#allocation2 + $0x1a] sm:$0xff]  ;;  %v993_v47 = vpack.c.bf16 %v865_v44, %v865_v44  ;;  %6701 = vmatpush3.bf16.msra.mxu0 %v7825_v42  ;;  %v870_v57 = vld [vmem:[#allocation2 + $0x22] sm:$0xf] }
 0x2e1   :  { %v860_v46 = vld [vmem:[#allocation2 + $0x20] sm:$0xf]  ;;  %v991_v48 = vpack.c.bf16 %v869_v45, %v868_v43  ;;  %v994_v59 = vpack.c.bf16 %v870_v57, %v870_v57  ;;  %6702 = vmatprep.subr.bf16.mxu0 %v7826_v62 }
 0x2e2   :  { %v992_v51 = vpack.c.bf16 %v860_v46, %v860_v46  ;;  %1193 = vmatprep.mubr.bf16.mxu1 %v993_v47  ;;  %7346 = vmatpush3.bf16.msra.mxu1 %v7818_v54 }
 0x2e3   :  { %7330 = vmatmul.mubr.bf16.gmra.mrb[28].mxu0 %v991_v48  ;;  %7347 = vmatprep.subr.bf16.mxu1 %v8436_v1 }
 0x2e4   :  { %1194 = vmatmul.mubr.bf16.gmra.mrb[32].mxu1 %v992_v51  ;;  %7333 = vmatprep.mubr.msk.bf16.mxu0 %vm8437_vm0, %v8436_v1 }
 0x2e5   :  { %7353 = vmatprep.mubr.msk.bf16.mxu1 %vm8437_vm0, %v8436_v1  ;;  %6703 = vmatpush3.bf16.msra.mxu0 %v7828_v53 }
 0x2e6   :  { %7348 = vmatpush3.bf16.msra.mxu1 %v7819_v56  ;;  %6704 = vmatprep.subr.bf16.mxu0 %v7829_v0 }
 0x2e7   :  { %7349 = vmatprep.subr.bf16.mxu1 %v8436_v1 }
 0x2ea   :  { %7350 = vmatpush3.bf16.msra.mxu1 %v7820_v60 }
 0x2eb   :  { %7334 = vmatmul.mubr.bf16.gmra.mrb[32].mxu0 %v994_v59  ;;  %7351 = vmatprep.subr.bf16.mxu1 %v8436_v1 }
 0x2ee   :  { %7352 = vmatpush3.bf16.msra.mxu1 %v7821_v61 }
 0x2ef   :  { %7365 = vmatprep.subr.bf16.mxu1 %v8436_v1 }
 0x2f1   :  { %7354 = vmatmul.mubr.bf16.vlgmr.msra.gmra.mrb[36].mxu1 %v8950_v2  ;;  %v7831_v2 = vld [vmem:[#allocation13 + $0x18] sm:$0xff]  }
 0x2f2   :  { %7357 = vmatprep.mubr.msk.bf16.mxu1 %vm8437_vm0, %v8436_v1  ;;  %7366 = vmatpush3.bf16.msra.mxu1 %v7827_v63 }
 0x2f3   :  { %7367 = vmatprep.subr.bf16.mxu1 %v8436_v1  ;;  %6705 = vmatpush3.bf16.msra.mxu0 %v7831_v2 }
 0x2f4   :  { %6706 = vmatprep.subr.bf16.mxu0 %v7832_v58 }
 0x2f6   :  { %7368 = vmatpush3.bf16.msra.mxu1 %v7830_v3 }
 0x2f7   :  { %7369 = vmatprep.subr.bf16.mxu1 %v8436_v1  ;;  %6707 = vmatpush3.bf16.msra.mxu0 %v7834_v5 }
 0x2f8   :  { %6708 = vmatprep.subr.bf16.mxu0 %v7835_v6  ;;  %v7847_v6 = vld [vmem:[%s9596_s8 + $0xc0] sm:$0xff]  }
 0x2f9   :  { %7358 = vmatmul.mubr.bf16.gmra.mrb[40].mxu1 %v8958_v25 }
 0x2fa   :  { %7361 = vmatprep.mubr.msk.bf16.mxu1 %vm8437_vm0, %v8436_v1  ;;  %7370 = vmatpush3.bf16.msra.mxu1 %v7833_v4 }
 0x2fb   :  { %7371 = vmatprep.subr.bf16.mxu1 %v8436_v1  ;;  %6709 = vmatpush3.bf16.msra.mxu0 %v7837_v9 }
 0x2fc   :  { %6710 = vmatprep.subr.bf16.mxu0 %v7838_v10 }
 0x2fe   :  { %7372 = vmatpush3.bf16.msra.mxu1 %v7836_v8 }
 0x2ff   :  { %7373 = vmatprep.subr.bf16.mxu1 %v8436_v1  ;;  %6711 = vmatpush3.bf16.msra.mxu0 %v7840_v12 }
 0x300   :  { %6712 = vmatprep.subr.bf16.mxu0 %v7841_v13 }
 0x301   :  { %7362 = vmatmul.mubr.bf16.gmra.mrb[44].mxu1 %v993_v47 }
 0x302   :  { %7381 = vmatprep.mubr.msk.bf16.mxu1 %vm8437_vm0, %v8436_v1  ;;  %7374 = vmatpush3.bf16.msra.mxu1 %v7839_v11  ;;  %v7848_v11 = vld [vmem:[%s9596_s8 + $0x108] sm:$0xff]  }
 0x303   :  { %7375 = vmatprep.subr.bf16.mxu1 %v8436_v1  ;;  %6713 = vmatpush3.bf16.msra.mxu0 %v7843_v15 }
 0x304   :  { %6743 = vmatprep.subr.bf16.mxu0 %v7846_v18 }
 0x306   :  { %7376 = vmatpush3.bf16.msra.mxu1 %v7842_v14 }
 0x307   :  { %7377 = vmatprep.subr.bf16.mxu1 %v8436_v1 }
 0x30a   :  { %7378 = vmatpush3.bf16.msra.mxu1 %v7844_v16 }
 0x30b   :  { %7379 = vmatprep.subr.bf16.mxu1 %v8436_v1 }
 0x30e   :  { %7380 = vmatpush3.bf16.msra.mxu1 %v7845_v17 }
 0x30f   :  { %7393 = vmatprep.subr.bf16.mxu1 %v8436_v1 }
 0x3a4   :  { %v6658_v19 = vpop.f32.mrb[24].mxu1 }
 0x3a5   :  { %v6659_v20 = vpop.f32.mrb[25].mxu1 }
 0x3a6   :  { %v6660_v21 = vadd.f32 %v6659_v20, %v6658_v19  ;;  %v6661_v50 = vpop.f32.mrb[26].mxu1 }
 0x3a7   :  { %v6662_v22 = vpop.f32.mrb[27].mxu1 }
 0x3a8   :  { %v6663_v23 = vadd.f32 %v6662_v22, %v6661_v50  ;;  %v1180_v25 = vadd.f32 %v6660_v21, %v6074_v24 }
 0x3aa   :  { %v1183_v32 = vadd.f32 %v6663_v23, %v6074_v24 }
 0x3ad   :  { %v1235_v52 = vpop.f32.mrb[24].mxu0 }
 0x3ae   :  { %v6664_v27 = vpop.f32.mrb[28].mxu1  ;;  %v1236_v26 = vadd.f32 %v1235_v52, %v1180_v25  ;;  %v7327_v29 = vpop.f32.mrb[25].mxu0 }
 0x3af   :  { %v6665_v30 = vpop.f32.mrb[29].mxu1  ;;  %v1238_v34 = vpop.f32.mrb[26].mxu0 }
 0x3b0   :  { %v6666_v33 = vadd.f32 %v6665_v30, %v6664_v27  ;;  %v6667_v35 = vpop.f32.mrb[30].mxu1  ;;  %vm1257_vm4 = vcmp.gt.f32.partialorder %v1236_v26, 0.0  ;;  %v1262_v36 = vmul.f32 0.01, %v1236_v26  ;;  %v1239_v37 = vadd.f32 %v1238_v34, %v1183_v32  ;;  %v7328_v38 = vpop.f32.mrb[27].mxu0 }
 0x3b1   :  { %v6668_v39 = vpop.f32.mrb[31].mxu1 }
 0x3b2   :  { %v6669_v55 = vadd.f32 %v6668_v39, %v6667_v35  ;;  %v1267_v31 = vsel %vm1257_vm4, %v1236_v26, %v1262_v36  ;;  %vm1258_vm5 = vcmp.gt.f32.partialorder %v1239_v37, 0.0  ;;  %v1263_v40 = vmul.f32 0.01, %v1239_v37 }
 0x3b3   :  { %v1272_v41 = vmul.f32 %v8828_v49, %v1267_v31  ;;  %v1188_v43 = vadd.f32 %v6666_v33, %v6074_v24 }
 0x3b4   :  { %v1268_v42 = vsel %vm1258_vm5, %v1239_v37, %v1263_v40  ;;  %v1191_v51 = vadd.f32 %v6669_v55, %v6074_v24 }
 0x3b5   :  { %1387 = vst [vmem:[#allocation3 + $0x1] sm:$0xff] %v1272_v41  ;;  %1388 = vst [vmem:[#allocation3 + $0x9] sm:$0xff] %v1268_v42  ;;  %v1408_v45 = vpack.c.bf16 %v1268_v42, %v1272_v41 }
 0x3b6   :  { %v1243_v44 = vpop.f32.mrb[28].mxu0 }
 0x3b7   :  { %v1244_v46 = vadd.f32 %v1243_v44, %v1188_v43  ;;  %v6670_v47 = vpop.f32.mrb[32].mxu1  ;;  %v7331_v48 = vpop.f32.mrb[29].mxu0  ;;  %1598 = vmatprep.mubr.bf16.mxu0 %v1408_v45  ;;  %v7849_v44 = vld [vmem:[%s9596_s8 + $0xc8] sm:$0xff]   ;;  %v7850_v45 = vld [vmem:[%s9596_s8 + $0x110] sm:$0xff]  }
 0x3b8   :  { %v6671_v54 = vpop.f32.mrb[33].mxu1  ;;  %v1246_v56 = vpop.f32.mrb[30].mxu0  ;;  %v7853_v48 = vld [vmem:[%s9596_s8 + $0x118] sm:$0xff]  }
 0x3b9   :  { %vm1259_vm6 = vcmp.gt.f32.partialorder %v1244_v46, 0.0  ;;  %v1264_v57 = vmul.f32 0.01, %v1244_v46  ;;  %v6672_v59 = vadd.f32 %v6671_v54, %v6670_v47  ;;  %v1247_v60 = vadd.f32 %v1246_v56, %v1191_v51  ;;  %v6673_v61 = vpop.f32.mrb[34].mxu1  ;;  %v7332_v62 = vpop.f32.mrb[31].mxu0  ;;  %v7852_v47 = vld [vmem:[%s9596_s8 + $0x140] sm:$0xff]  }
 0x3ba   :  { %v6674_v63 = vpop.f32.mrb[35].mxu1  ;;  %v7854_v51 = vld [vmem:[%s9596_s8 + $0xd8] sm:$0xff]   ;;  %v7855_v54 = vld [vmem:[%s9596_s8 + $0x148] sm:$0xff]   ;;  %v7856_v56 = vld [vmem:[%s9596_s8 + $0x120] sm:$0xff]  }
 0x3bb   :  { %v1269_v53 = vsel %vm1259_vm6, %v1244_v46, %v1264_v57  ;;  %vm1260_vm7 = vcmp.gt.f32.partialorder %v1247_v60, 0.0  ;;  %v1265_v0 = vmul.f32 0.01, %v1247_v60  ;;  %v1196_v58 = vadd.f32 %v6672_v59, %v6074_v24  ;;  %v7851_v46 = vld [vmem:[%s9596_s8 + $0xd0] sm:$0xff]   ;;  %v7857_v57 = vld [vmem:[%s9596_s8 + $0xe0] sm:$0xff]   ;;  %v7860_v61 = vld [vmem:[%s9596_s8 + $0xe8] sm:$0xff]  }
 0x3bc   :  { %v1274_v3 = vmul.f32 %v8844_v7, %v1269_v53  ;;  %v1392_v4 = vld [vmem:[#allocation3] sm:$0xff]  ;;  %v1393_v5 = vld [vmem:[#allocation3 + $0x8] sm:$0xff]  ;;  %v7861_v62 = vld [vmem:[%s9596_s8 + $0x158] sm:$0xff]  }
 0x3bd   :  { %v1270_v2 = vsel %vm1260_vm7, %v1247_v60, %v1265_v0  ;;  %v1407_v9 = vpack.c.bf16 %v1393_v5, %v1392_v4  ;;  %v1402_v19 = vld [vmem:[#allocation3 + $0x2] sm:$0xff]  ;;  %v7864_v0 = vld [vmem:[%s9596_s8 + $0x160] sm:$0xff]   ;;  %v7870_v5 = vld [vmem:[%s9596_s8 + $0x178] sm:$0xff]  }
 0x3be   :  { %1389 = vst [vmem:[#allocation3 + $0x11] sm:$0xff] %v1274_v3  ;;  %1390 = vst [vmem:[#allocation3 + $0x19] sm:$0xff] %v1270_v2  ;;  %v1251_v8 = vpop.f32.mrb[32].mxu0  ;;  %v1411_v10 = vpack.c.bf16 %v1270_v2, %v1274_v3  ;;  %v7858_v59 = vld [vmem:[%s9596_s8 + $0x150] sm:$0xff]   ;;  %v7859_v60 = vld [vmem:[%s9596_s8 + $0x128] sm:$0xff]  }
 0x3bf   :  { %v1252_v12 = vadd.f32 %v1251_v8, %v1196_v58  ;;  %v7335_v13 = vpop.f32.mrb[33].mxu0  ;;  %1599 = vmatmul.mubr.bf16.vlgmr.msra.gmra.mrb[36].mxu0 %v1407_v9  ;;  %v7862_v63 = vld [vmem:[%s9596_s8 + $0x130] sm:$0xff]   ;;  %v7865_v3 = vld [vmem:[%s9596_s8 + $0x138] sm:$0xff]   ;;  %v7867_v58 = vld [vmem:[%s9596_s8 + $0x168] sm:$0xff]  }
 0x3c0   :  { %v1254_v14 = vpop.f32.mrb[34].mxu0  ;;  %1606 = vmatprep.mubr.bf16.mxu0 %v1411_v10  ;;  %6744 = vmatpush3.bf16.msra.mxu0 %v7847_v6  ;;  %v7863_v53 = vld [vmem:[%s9596_s8 + $0xf0] sm:$0xff]   ;;  %v7866_v2 = vld [vmem:[%s9596_s8 + $0xf8] sm:$0xff]   ;;  %v7878_v6 = vld [vmem:[#allocation13 + $0x100] sm:$0xff]  }
 0x3c1   :  { %vm1261_vm8 = vcmp.gt.f32.partialorder %v1252_v12, 0.0  ;;  %v1266_v15 = vmul.f32 0.01, %v1252_v12  ;;  %v7336_v16 = vpop.f32.mrb[35].mxu0  ;;  %6745 = vmatprep.subr.bf16.mxu0 %v7848_v11  ;;  %v7868_v4 = vld [vmem:[%s9596_s8 + $0x170] sm:$0xff]  }
 0x3c2   :  { %v6108_v14 = vld [vmem:[#allocation15] ss:$0 sm:$0xff] }
 0x3c3   :  { %v1271_v17 = vsel %vm1261_vm8, %v1252_v12, %v1266_v15 }
 0x3c4   :  { %v1276_v18 = vmul.f32 %v8854_v28, %v1271_v17  ;;  %v9006_v24 = vpop.f32.mrb[36].mxu1  ;;  %6746 = vmatpush3.bf16.msra.mxu0 %v7849_v44 }
 0x3c5   :  { %v1403_v20 = vld [vmem:[#allocation3 + $0xa] sm:$0xff]  ;;  %v1395_v50 = vld [vmem:[#allocation3 + $0x18] sm:$0xff]  ;;  %v7355_v25 = vpop.f32.mrb[37].mxu1  ;;  %6747 = vmatprep.subr.bf16.mxu0 %v7850_v45 }
 0x3c6   :  { %v1394_v21 = vld [vmem:[#allocation3 + $0x10] sm:$0xff]  ;;  %1391 = vst [vmem:[#allocation3 + $0x21] sm:$0xf] %v1276_v18  ;;  %v1409_v22 = vpack.c.bf16 %v1403_v20, %v1402_v19  ;;  %v9008_v52 = vpop.f32.mrb[38].mxu1  ;;  %v9093_v18 = vld [vmem:[#allocation18] ss:$0 sm:$0xff] }
 0x3c7   :  { %v1410_v23 = vpack.c.bf16 %v1395_v50, %v1394_v21  ;;  %v7356_v27 = vpop.f32.mrb[39].mxu1  ;;  %v1404_v26 = vld [vmem:[#allocation3 + $0x12] sm:$0xff] }
 0x3c8   :  { %7382 = vmatmul.mubr.bf16.vlgmr.msra.gmra.mrb[48].mxu1 %v1409_v22  ;;  %6748 = vmatpush3.bf16.msra.mxu0 %v7851_v46 }
 0x3c9   :  { %1607 = vmatmul.mubr.bf16.gmra.mrb[40].mxu0 %v1410_v23  ;;  %7385 = vmatprep.mubr.msk.bf16.mxu1 %vm8437_vm0, %v8436_v1 }
 0x3ca   :  { %7394 = vmatpush3.bf16.msra.mxu1 %v7852_v47  ;;  %6749 = vmatprep.subr.bf16.mxu0 %v7853_v48 }
 0x3cb   :  { %7395 = vmatprep.subr.bf16.mxu1 %v8436_v1 }
 0x3cc   :  { %v9012_v36 = vpop.f32.mrb[40].mxu1  ;;  %6750 = vmatpush3.bf16.msra.mxu0 %v7854_v51 }
 0x3cd   :  { %v1401_v29 = vld [vmem:[#allocation3 + $0x21] sm:$0xf]  ;;  %v7359_v37 = vpop.f32.mrb[41].mxu1  ;;  %6751 = vmatprep.subr.bf16.mxu0 %v7856_v56 }
 0x3ce   :  { %v1405_v30 = vld [vmem:[#allocation3 + $0x1a] sm:$0xff]  ;;  %v1414_v33 = vpack.c.bf16 %v1401_v29, %v1401_v29  ;;  %v9014_v38 = vpop.f32.mrb[42].mxu1  ;;  %v1406_v55 = vld [vmem:[#allocation3 + $0x22] sm:$0xf]  ;;  %7396 = vmatpush3.bf16.msra.mxu1 %v7855_v54  ;;  %v1369_v37 = vadd.f32 %v9093_v18, %v9008_v52 }
 0x3cf   :  { %v1396_v32 = vld [vmem:[#allocation3 + $0x20] sm:$0xf]  ;;  %v1412_v34 = vpack.c.bf16 %v1405_v30, %v1404_v26  ;;  %v7360_v39 = vpop.f32.mrb[43].mxu1  ;;  %v1415_v31 = vpack.c.bf16 %v1406_v55, %v1406_v55  ;;  %7397 = vmatprep.subr.bf16.mxu1 %v8436_v1 }
 0x3d0   :  { %v1413_v35 = vpack.c.bf16 %v1396_v32, %v1396_v32  ;;  %1614 = vmatprep.mubr.bf16.mxu0 %v1414_v33  ;;  %6752 = vmatpush3.bf16.msra.mxu0 %v7857_v57  ;;  %v1366_v32 = vadd.f32 %v9093_v18, %v9006_v24 }
 0x3d1   :  { %7386 = vmatmul.mubr.bf16.gmra.mrb[52].mxu1 %v1412_v34  ;;  %6753 = vmatprep.subr.bf16.mxu0 %v7859_v60  ;;  %v1374_v60 = vadd.f32 %v9093_v18, %v9012_v36 }
 0x3d2   :  { %1615 = vmatmul.mubr.bf16.gmra.mrb[44].mxu0 %v1413_v35  ;;  %7389 = vmatprep.mubr.msk.bf16.mxu1 %vm8437_vm0, %v8436_v1 }
 0x3d3   :  { %7398 = vmatpush3.bf16.msra.mxu1 %v7858_v59 }
 0x3d4   :  { %v9018_v40 = vpop.f32.mrb[44].mxu1  ;;  %7399 = vmatprep.subr.bf16.mxu1 %v8436_v1  ;;  %6754 = vmatpush3.bf16.msra.mxu0 %v7860_v61 }
 0x3d5   :  { %v7363_v41 = vpop.f32.mrb[45].mxu1  ;;  %6755 = vmatprep.subr.bf16.mxu0 %v7862_v63 }
 0x3d6   :  { %v1384_v42 = vpop.f32.mrb[46].mxu1 }
 0x3d7   :  { %v7364_v43 = vpop.f32.mrb[47].mxu1  ;;  %7400 = vmatpush3.bf16.msra.mxu1 %v7861_v62 }
 0x3d8   :  { %7401 = vmatprep.subr.bf16.mxu1 %v8436_v1  ;;  %6756 = vmatpush3.bf16.msra.mxu0 %v7863_v53  ;;  %v1377_v53 = vadd.f32 %v9093_v18, %v9014_v38 }
 0x3d9   :  { %7390 = vmatmul.mubr.bf16.gmra.mrb[56].mxu1 %v1415_v31  ;;  %6757 = vmatprep.subr.bf16.mxu0 %v7865_v3 }
 0x3da   :  { %7409 = vmatprep.mubr.msk.bf16.mxu1 %vm8437_vm0, %v8436_v1 }
 0x3db   :  { %7402 = vmatpush3.bf16.msra.mxu1 %v7864_v0 }
 0x3dc   :  { %7403 = vmatprep.subr.bf16.mxu1 %v8436_v1  ;;  %6758 = vmatpush3.bf16.msra.mxu0 %v7866_v2 }
 0x3dd   :  { %7421 = vmatprep.subr.bf16.mxu0 %v8436_v1 }
 0x3df   :  { %7404 = vmatpush3.bf16.msra.mxu1 %v7867_v58 }
 0x3e0   :  { %7405 = vmatprep.subr.bf16.mxu1 %v8436_v1 }
 0x3e3   :  { %7406 = vmatpush3.bf16.msra.mxu1 %v7868_v4 }
 0x3e4   :  { %7407 = vmatprep.subr.bf16.mxu1 %v8436_v1 }
 0x3e7   :  { %7408 = vmatpush3.bf16.msra.mxu1 %v7870_v5 }
 0x3e8   :  { %6799 = vmatprep.subr.bf16.mxu1 %v7878_v6 }
 0x492   :  { %v6714_v8 = vpop.f32.mrb[36].mxu0 }
 0x493   :  { %v6715_v9 = vpop.f32.mrb[37].mxu0 }
 0x494   :  { %v6716_v10 = vadd.f32 %v6715_v9, %v6714_v8  ;;  %v6717_v11 = vpop.f32.mrb[38].mxu0 }
 0x495   :  { %v6718_v12 = vpop.f32.mrb[39].mxu0 }
 0x496   :  { %v6719_v13 = vadd.f32 %v6718_v12, %v6717_v11  ;;  %v1601_v15 = vadd.f32 %v6716_v10, %v6108_v14  ;;  %v7869_v10 = vld [vmem:[#allocation16 + $0x40] sm:$0xff]  }
 0x498   :  { %v1604_v50 = vadd.f32 %v6719_v13, %v6108_v14 }
 0x49b   :  { %v1656_v16 = vpop.f32.mrb[48].mxu1 }
 0x49c   :  { %v6720_v17 = vpop.f32.mrb[40].mxu0  ;;  %v1657_v19 = vadd.f32 %v1656_v16, %v1601_v15  ;;  %v7383_v20 = vpop.f32.mrb[49].mxu1 }
 0x49d   :  { %v6721_v21 = vpop.f32.mrb[41].mxu0  ;;  %v1659_v23 = vpop.f32.mrb[50].mxu1 }
 0x49e   :  { %v6722_v22 = vadd.f32 %v6721_v21, %v6720_v17  ;;  %v6723_v25 = vpop.f32.mrb[42].mxu0  ;;  %vm1678_vm9 = vcmp.gt.f32.partialorder %v1657_v19, 0.0  ;;  %v1683_v27 = vmul.f32 0.01, %v1657_v19  ;;  %v1660_v26 = vadd.f32 %v1659_v23, %v1604_v50  ;;  %v7384_v29 = vpop.f32.mrb[51].mxu1  ;;  %v7871_v17 = vld [vmem:[#allocation16 + $0x48] sm:$0xff]  }
 0x49f   :  { %v6724_v30 = vpop.f32.mrb[43].mxu0  ;;  %v7872_v50 = vld [vmem:[#allocation16 + $0x50] sm:$0xff]   ;;  %v7873_v29 = vld [vmem:[#allocation16 + $0x58] sm:$0xff]  }
 0x4a0   :  { %v6725_v33 = vadd.f32 %v6724_v30, %v6723_v25  ;;  %v1688_v34 = vsel %vm1678_vm9, %v1657_v19, %v1683_v27  ;;  %vm1679_vm10 = vcmp.gt.f32.partialorder %v1660_v26, 0.0  ;;  %v1684_v35 = vmul.f32 0.01, %v1660_v26  ;;  %v7881_v30 = vld [vmem:[#allocation13 + $0xc8] sm:$0xff]  }
 0x4a1   :  { %v1693_v39 = vadd.f32 %v1688_v34, %v1366_v32  ;;  %v1609_v31 = vadd.f32 %v6722_v22, %v6108_v14 }
 0x4a2   :  { %v1689_v55 = vsel %vm1679_vm10, %v1660_v26, %v1684_v35  ;;  %v1612_v47 = vadd.f32 %v6725_v33, %v6108_v14  ;;  %v7880_v26 = vld [vmem:[#allocation13 + $0x108] sm:$0xff]  }
 0x4a3   :  { %v1698_v41 = vmul.f32 %v8828_v49, %v1693_v39  ;;  %v1694_v42 = vadd.f32 %v1689_v55, %v1369_v37 }
 0x4a4   :  { %v1664_v43 = vpop.f32.mrb[52].mxu1 }
 0x4a5   :  { %v1665_v44 = vadd.f32 %v1664_v43, %v1609_v31  ;;  %v6726_v45 = vpop.f32.mrb[44].mxu0  ;;  %v7387_v46 = vpop.f32.mrb[53].mxu1  ;;  %1703 = vst [vmem:[#allocation2 + $0x1] sm:$0xff] %v1698_v41  ;;  %1704 = vst [vmem:[#allocation2 + $0x9] sm:$0xff] %v1694_v42  ;;  %v9100_v51 = vpack.c.bf16 %v1694_v42, %v1698_v41  ;;  %v7874_v31 = vld [vmem:[#allocation16 + $0x60] sm:$0xff]   ;;  %v7875_v41 = vld [vmem:[#allocation16 + $0x68] sm:$0xff]  }
 0x4a6   :  { %v6727_v24 = vpop.f32.mrb[45].mxu0  ;;  %v1667_v48 = vpop.f32.mrb[54].mxu1  ;;  %v7882_v46 = vld [vmem:[#allocation13 + $0x110] sm:$0xff]  }
 0x4a7   :  { %vm1680_vm11 = vcmp.gt.f32.partialorder %v1665_v44, 0.0  ;;  %v1685_v54 = vmul.f32 0.01, %v1665_v44  ;;  %v6728_v52 = vadd.f32 %v6727_v24, %v6726_v45  ;;  %v1668_v56 = vadd.f32 %v1667_v48, %v1612_v47  ;;  %v6729_v57 = vpop.f32.mrb[46].mxu0  ;;  %v7388_v59 = vpop.f32.mrb[55].mxu1  ;;  %2035 = vmatprep.mubr.bf16.mxu0 %v9100_v51  ;;  %v7877_v45 = vld [vmem:[#allocation16 + $0x78] sm:$0xff]  }
 0x4a8   :  { %v6730_v61 = vpop.f32.mrb[47].mxu0  ;;  %v7883_v47 = vld [vmem:[#allocation13 + $0x140] sm:$0xff]   ;;  %v7884_v24 = vld [vmem:[#allocation13 + $0xd0] sm:$0xff]   ;;  %v7885_v48 = vld [vmem:[#allocation13 + $0x118] sm:$0xff]  }
 0x4a9   :  { %v1690_v62 = vsel %vm1680_vm11, %v1665_v44, %v1685_v54  ;;  %vm1681_vm12 = vcmp.gt.f32.partialorder %v1668_v56, 0.0  ;;  %v1686_v63 = vmul.f32 0.01, %v1668_v56  ;;  %v1617_v2 = vadd.f32 %v6728_v52, %v6108_v14  ;;  %v7876_v44 = vld [vmem:[#allocation16 + $0x70] sm:$0xff]   ;;  %v7886_v54 = vld [vmem:[#allocation13 + $0x148] sm:$0xff]   ;;  %v7888_v52 = vld [vmem:[#allocation13 + $0x120] sm:$0xff]  }
 0x4aa   :  { %v1695_v0 = vadd.f32 %v1690_v62, %v1374_v60  ;;  %v1382_v14 = vadd.f32 %v9093_v18, %v9018_v40  ;;  %v7879_v18 = vld [vmem:[#allocation13 + $0xc0] sm:$0xff]   ;;  %v7891_v59 = vld [vmem:[#allocation13 + $0x128] sm:$0xff]   ;;  %v7892_v60 = vld [vmem:[#allocation13 + $0x158] sm:$0xff]  }
 0x4ab   :  { %v1691_v3 = vsel %vm1681_vm12, %v1668_v56, %v1686_v63  ;;  %v7889_v56 = vld [vmem:[#allocation13 + $0x150] sm:$0xff]   ;;  %v7890_v57 = vld [vmem:[#allocation13 + $0xe0] sm:$0xff]   ;;  %v7893_v61 = vld [vmem:[#allocation13 + $0xe8] sm:$0xff]  }
 0x4ac   :  { %v1700_v58 = vmul.f32 %v8844_v7, %v1695_v0  ;;  %v1696_v4 = vadd.f32 %v1691_v3, %v1377_v53  ;;  %v1672_v5 = vpop.f32.mrb[56].mxu1  ;;  %v1708_v9 = vld [vmem:[#allocation2] sm:$0xff]  ;;  %v1709_v36 = vld [vmem:[#allocation2 + $0x8] sm:$0xff]  ;;  %v7894_v62 = vld [vmem:[#allocation13 + $0x130] sm:$0xff]  }
 0x4ad   :  { %v1673_v6 = vadd.f32 %v1672_v5, %v1617_v2  ;;  %v7391_v8 = vpop.f32.mrb[57].mxu1  ;;  %v1844_v12 = vpack.c.bf16 %v1709_v36, %v1708_v9  ;;  %v1718_v21 = vld [vmem:[#allocation2 + $0x2] sm:$0xff]  ;;  %v7896_v53 = vld [vmem:[#allocation13 + $0xf0] sm:$0xff]   ;;  %v7898_v3 = vld [vmem:[#allocation13 + $0x168] sm:$0xff]  }
 0x4ae   :  { %1705 = vst [vmem:[#allocation2 + $0x11] sm:$0xff] %v1700_v58  ;;  %1706 = vst [vmem:[#allocation2 + $0x19] sm:$0xff] %v1696_v4  ;;  %v1675_v11 = vpop.f32.mrb[58].mxu1  ;;  %v9108_v13 = vpack.c.bf16 %v1696_v4, %v1700_v58  ;;  %v7895_v63 = vld [vmem:[#allocation13 + $0x160] sm:$0xff]   ;;  %v7897_v0 = vld [vmem:[#allocation13 + $0x138] sm:$0xff]  }
 0x4af   :  { %vm1682_vm13 = vcmp.gt.f32.partialorder %v1673_v6, 0.0  ;;  %v1687_v38 = vmul.f32 0.01, %v1673_v6  ;;  %v7392_v15 = vpop.f32.mrb[59].mxu1  ;;  %2036 = vmatmul.mubr.bf16.vlgmr.msra.gmra.mrb[48].mxu0 %v1844_v12  ;;  %v7899_v2 = vld [vmem:[#allocation13 + $0xf8] sm:$0xff]   ;;  %v7900_v58 = vld [vmem:[#allocation13 + $0x170] sm:$0xff]  }
 0x4b0   :  { %7422 = vmatpush3.bf16.msra.mxu0 %v7869_v10  ;;  %2043 = vmatprep.mubr.bf16.mxu0 %v9108_v13  ;;  %v7901_v4 = vld [vmem:[#allocation13 + $0x178] sm:$0xff]  }
 0x4b1   :  { %v1692_v16 = vsel %vm1682_vm13, %v1673_v6, %v1687_v38  ;;  %7423 = vmatprep.subr.bf16.mxu0 %v8436_v1  ;;  %v7902_v5 = vld [vmem:[%s9596_s8 + $0x1c0] sm:$0xff]  }
 0x4b2   :  { %v1697_v19 = vadd.f32 %v1692_v16, %v1382_v14  ;;  %v6181_v12 = vld [vmem:[#allocation12 + $0x1] ss:$0 sm:$0xff] }
 0x4b4   :  { %v1702_v20 = vmul.f32 %v8854_v28, %v1697_v19  ;;  %7424 = vmatpush3.bf16.msra.mxu0 %v7871_v17 }
 0x4b5   :  { %v1719_v22 = vld [vmem:[#allocation2 + $0xa] sm:$0xff]  ;;  %v1711_v25 = vld [vmem:[#allocation2 + $0x18] sm:$0xff]  ;;  %7425 = vmatprep.subr.bf16.mxu0 %v8436_v1 }
 0x4b6   :  { %v1710_v23 = vld [vmem:[#allocation2 + $0x10] sm:$0xff]  ;;  %1707 = vst [vmem:[#allocation2 + $0x21] sm:$0xf] %v1702_v20  ;;  %v1846_v27 = vpack.c.bf16 %v1719_v22, %v1718_v21 }
 0x4b7   :  { %v1847_v40 = vpack.c.bf16 %v1711_v25, %v1710_v23  ;;  %v1720_v32 = vld [vmem:[#allocation2 + $0x12] sm:$0xff] }
 0x4b8   :  { %7410 = vmatmul.mubr.bf16.vlgmr.msra.gmra.mrb[60].mxu1 %v1846_v27  ;;  %7426 = vmatpush3.bf16.msra.mxu0 %v7872_v50 }
 0x4b9   :  { %2044 = vmatmul.mubr.bf16.gmra.mrb[52].mxu0 %v1847_v40  ;;  %7413 = vmatprep.mubr.msk.bf16.mxu1 %vm8437_vm0, %v8436_v1 }
 0x4ba   :  { %7427 = vmatprep.subr.bf16.mxu0 %v8436_v1  ;;  %6800 = vmatpush3.bf16.msra.mxu1 %v7879_v18 }
 0x4bb   :  { %6801 = vmatprep.subr.bf16.mxu1 %v7880_v26 }
 0x4bc   :  { %7428 = vmatpush3.bf16.msra.mxu0 %v7873_v29 }
 0x4bd   :  { %v1717_v33 = vld [vmem:[#allocation2 + $0x21] sm:$0xf]  ;;  %7429 = vmatprep.subr.bf16.mxu0 %v8436_v1 }
 0x4be   :  { %v1721_v34 = vld [vmem:[#allocation2 + $0x1a] sm:$0xff]  ;;  %v1851_v37 = vpack.c.bf16 %v1717_v33, %v1717_v33  ;;  %6802 = vmatpush3.bf16.msra.mxu1 %v7881_v30  ;;  %v1722_v42 = vld [vmem:[#allocation2 + $0x22] sm:$0xf] }
 0x4bf   :  { %v1712_v35 = vld [vmem:[#allocation2 + $0x20] sm:$0xf]  ;;  %v1849_v39 = vpack.c.bf16 %v1721_v34, %v1720_v32  ;;  %v1852_v43 = vpack.c.bf16 %v1722_v42, %v1722_v42  ;;  %6803 = vmatprep.subr.bf16.mxu1 %v7882_v46 }
 0x4c0   :  { %v1850_v55 = vpack.c.bf16 %v1712_v35, %v1712_v35  ;;  %2051 = vmatprep.mubr.bf16.mxu0 %v1851_v37  ;;  %7430 = vmatpush3.bf16.msra.mxu0 %v7874_v31 }
 0x4c1   :  { %7414 = vmatmul.mubr.bf16.gmra.mrb[64].mxu1 %v1849_v39  ;;  %7431 = vmatprep.subr.bf16.mxu0 %v8436_v1 }
 0x4c2   :  { %2052 = vmatmul.mubr.bf16.gmra.mrb[56].mxu0 %v1850_v55  ;;  %7417 = vmatprep.mubr.msk.bf16.mxu1 %vm8437_vm0, %v8436_v1 }
 0x4c3   :  { %7437 = vmatprep.mubr.msk.bf16.mxu0 %vm8437_vm0, %v8436_v1  ;;  %6804 = vmatpush3.bf16.msra.mxu1 %v7884_v24 }
 0x4c4   :  { %7432 = vmatpush3.bf16.msra.mxu0 %v7875_v41  ;;  %6805 = vmatprep.subr.bf16.mxu1 %v7885_v48 }
 0x4c5   :  { %7433 = vmatprep.subr.bf16.mxu0 %v8436_v1 }
 0x4c8   :  { %7434 = vmatpush3.bf16.msra.mxu0 %v7876_v44 }
 0x4c9   :  { %7418 = vmatmul.mubr.bf16.gmra.mrb[68].mxu1 %v1852_v43  ;;  %7435 = vmatprep.subr.bf16.mxu0 %v8436_v1 }
 0x4cc   :  { %7436 = vmatpush3.bf16.msra.mxu0 %v7877_v45 }
 0x4cd   :  { %7449 = vmatprep.subr.bf16.mxu0 %v8436_v1 }
 0x4cf   :  { %7438 = vmatmul.mubr.bf16.vlgmr.msra.gmra.mrb[60].mxu0 %v9100_v51  ;;  %v7887_v51 = vld [vmem:[#allocation13 + $0xd8] sm:$0xff]  }
 0x4d0   :  { %7441 = vmatprep.mubr.msk.bf16.mxu0 %vm8437_vm0, %v8436_v1  ;;  %7450 = vmatpush3.bf16.msra.mxu0 %v7883_v47 }
 0x4d1   :  { %7451 = vmatprep.subr.bf16.mxu0 %v8436_v1  ;;  %6806 = vmatpush3.bf16.msra.mxu1 %v7887_v51 }
 0x4d2   :  { %6807 = vmatprep.subr.bf16.mxu1 %v7888_v52 }
 0x4d4   :  { %7452 = vmatpush3.bf16.msra.mxu0 %v7886_v54 }
 0x4d5   :  { %7453 = vmatprep.subr.bf16.mxu0 %v8436_v1  ;;  %6808 = vmatpush3.bf16.msra.mxu1 %v7890_v57 }
 0x4d6   :  { %6809 = vmatprep.subr.bf16.mxu1 %v7891_v59  ;;  %v7903_v59 = vld [vmem:[%s9596_s8 + $0x180] sm:$0xff]  }
 0x4d7   :  { %7442 = vmatmul.mubr.bf16.gmra.mrb[64].mxu0 %v9108_v13 }
 0x4d8   :  { %7445 = vmatprep.mubr.msk.bf16.mxu0 %vm8437_vm0, %v8436_v1  ;;  %7454 = vmatpush3.bf16.msra.mxu0 %v7889_v56 }
 0x4d9   :  { %7455 = vmatprep.subr.bf16.mxu0 %v8436_v1  ;;  %6810 = vmatpush3.bf16.msra.mxu1 %v7893_v61 }
 0x4da   :  { %6811 = vmatprep.subr.bf16.mxu1 %v7894_v62 }
 0x4dc   :  { %7456 = vmatpush3.bf16.msra.mxu0 %v7892_v60 }
 0x4dd   :  { %7457 = vmatprep.subr.bf16.mxu0 %v8436_v1  ;;  %6812 = vmatpush3.bf16.msra.mxu1 %v7896_v53 }
 0x4de   :  { %6813 = vmatprep.subr.bf16.mxu1 %v7897_v0 }
 0x4df   :  { %7446 = vmatmul.mubr.bf16.gmra.mrb[68].mxu0 %v1851_v37 }
 0x4e0   :  { %7465 = vmatprep.mubr.msk.bf16.mxu0 %vm8437_vm0, %v8436_v1  ;;  %7458 = vmatpush3.bf16.msra.mxu0 %v7895_v63  ;;  %v7904_v63 = vld [vmem:[%s9596_s8 + $0x1c8] sm:$0xff]  }
 0x4e1   :  { %7459 = vmatprep.subr.bf16.mxu0 %v8436_v1  ;;  %6814 = vmatpush3.bf16.msra.mxu1 %v7899_v2 }
 0x4e2   :  { %6844 = vmatprep.subr.bf16.mxu1 %v7902_v5 }
 0x4e4   :  { %7460 = vmatpush3.bf16.msra.mxu0 %v7898_v3 }
 0x4e5   :  { %7461 = vmatprep.subr.bf16.mxu0 %v8436_v1 }
 0x4e8   :  { %7462 = vmatpush3.bf16.msra.mxu0 %v7900_v58 }
 0x4e9   :  { %7463 = vmatprep.subr.bf16.mxu0 %v8436_v1 }
 0x4ec   :  { %7464 = vmatpush3.bf16.msra.mxu0 %v7901_v4 }
 0x4ed   :  { %7477 = vmatprep.subr.bf16.mxu0 %v8436_v1 }
 0x582   :  { %v6759_v6 = vpop.f32.mrb[48].mxu0 }
 0x583   :  { %v6760_v8 = vpop.f32.mrb[49].mxu0 }
 0x584   :  { %v6761_v9 = vadd.f32 %v6760_v8, %v6759_v6  ;;  %v6762_v36 = vpop.f32.mrb[50].mxu0 }
 0x585   :  { %v6763_v10 = vpop.f32.mrb[51].mxu0 }
 0x586   :  { %v6764_v11 = vadd.f32 %v6763_v10, %v6762_v36  ;;  %v2038_v13 = vadd.f32 %v6761_v9, %v6181_v12 }
 0x588   :  { %v2041_v19 = vadd.f32 %v6764_v11, %v6181_v12 }
 0x58b   :  { %v2093_v38 = vpop.f32.mrb[60].mxu1 }
 0x58c   :  { %v6765_v15 = vpop.f32.mrb[52].mxu0  ;;  %v2094_v14 = vadd.f32 %v2093_v38, %v2038_v13  ;;  %v7411_v16 = vpop.f32.mrb[61].mxu1 }
 0x58d   :  { %v6766_v17 = vpop.f32.mrb[53].mxu0  ;;  %v2096_v21 = vpop.f32.mrb[62].mxu1 }
 0x58e   :  { %v6767_v20 = vadd.f32 %v6766_v17, %v6765_v15  ;;  %v6768_v50 = vpop.f32.mrb[54].mxu0  ;;  %vm2115_vm14 = vcmp.gt.f32.partialorder %v2094_v14, 0.0  ;;  %v2120_v22 = vmul.f32 0.01, %v2094_v14  ;;  %v2097_v23 = vadd.f32 %v2096_v21, %v2041_v19  ;;  %v7412_v25 = vpop.f32.mrb[63].mxu1 }
 0x58f   :  { %v6769_v27 = vpop.f32.mrb[55].mxu0 }
 0x590   :  { %v6770_v40 = vadd.f32 %v6769_v27, %v6768_v50  ;;  %v2125_v18 = vsel %vm2115_vm14, %v2094_v14, %v2120_v22  ;;  %vm2116_vm15 = vcmp.gt.f32.partialorder %v2097_v23, 0.0  ;;  %v2121_v26 = vmul.f32 0.01, %v2097_v23 }
 0x591   :  { %v2130_v29 = vmul.f32 %v8828_v49, %v2125_v18  ;;  %v2046_v32 = vadd.f32 %v6767_v20, %v6181_v12 }
 0x592   :  { %v2126_v30 = vsel %vm2116_vm15, %v2097_v23, %v2121_v26  ;;  %v2049_v55 = vadd.f32 %v6770_v40, %v6181_v12 }
 0x593   :  { %2245 = vst [vmem:[#allocation3 + $0x1] sm:$0xff] %v2130_v29  ;;  %2246 = vst [vmem:[#allocation3 + $0x9] sm:$0xff] %v2126_v30  ;;  %v2266_v34 = vpack.c.bf16 %v2126_v30, %v2130_v29 }
 0x594   :  { %v2101_v33 = vpop.f32.mrb[64].mxu1 }
 0x595   :  { %v2102_v35 = vadd.f32 %v2101_v33, %v2046_v32  ;;  %v6771_v37 = vpop.f32.mrb[56].mxu0  ;;  %v7415_v39 = vpop.f32.mrb[65].mxu1  ;;  %2456 = vmatprep.mubr.bf16.mxu1 %v2266_v34  ;;  %v7905_v33 = vld [vmem:[%s9596_s8 + $0x188] sm:$0xff]   ;;  %v7906_v34 = vld [vmem:[%s9596_s8 + $0x1d0] sm:$0xff]  }
 0x596   :  { %v6772_v31 = vpop.f32.mrb[57].mxu0  ;;  %v2104_v41 = vpop.f32.mrb[66].mxu1  ;;  %v7909_v39 = vld [vmem:[%s9596_s8 + $0x1d8] sm:$0xff]  }
 0x597   :  { %vm2117_vm1 = vcmp.gt.f32.partialorder %v2102_v35, 0.0  ;;  %v2122_v42 = vmul.f32 0.01, %v2102_v35  ;;  %v6773_v43 = vadd.f32 %v6772_v31, %v6771_v37  ;;  %v2105_v44 = vadd.f32 %v2104_v41, %v2049_v55  ;;  %v6774_v45 = vpop.f32.mrb[58].mxu0  ;;  %v7416_v46 = vpop.f32.mrb[67].mxu1  ;;  %v7908_v37 = vld [vmem:[%s9596_s8 + $0x200] sm:$0xff]  }
 0x598   :  { %v6775_v47 = vpop.f32.mrb[59].mxu0  ;;  %v7910_v55 = vld [vmem:[%s9596_s8 + $0x198] sm:$0xff]   ;;  %v7911_v31 = vld [vmem:[%s9596_s8 + $0x208] sm:$0xff]   ;;  %v7912_v41 = vld [vmem:[%s9596_s8 + $0x1e0] sm:$0xff]  }
 0x599   :  { %v2127_v24 = vsel %vm2117_vm1, %v2102_v35, %v2122_v42  ;;  %vm2118_vm2 = vcmp.gt.f32.partialorder %v2105_v44, 0.0  ;;  %v2123_v48 = vmul.f32 0.01, %v2105_v44  ;;  %v2054_v52 = vadd.f32 %v6773_v43, %v6181_v12  ;;  %v7907_v35 = vld [vmem:[%s9596_s8 + $0x190] sm:$0xff]   ;;  %v7913_v42 = vld [vmem:[%s9596_s8 + $0x1a0] sm:$0xff]   ;;  %v7916_v45 = vld [vmem:[%s9596_s8 + $0x1a8] sm:$0xff]  }
 0x59a   :  { %v2132_v54 = vmul.f32 %v8844_v7, %v2127_v24  ;;  %v2250_v56 = vld [vmem:[#allocation3] sm:$0xff]  ;;  %v2251_v57 = vld [vmem:[#allocation3 + $0x8] sm:$0xff]  ;;  %v7917_v46 = vld [vmem:[%s9596_s8 + $0x218] sm:$0xff]  }
 0x59b   :  { %v2128_v51 = vsel %vm2118_vm2, %v2105_v44, %v2123_v48  ;;  %v2265_v61 = vpack.c.bf16 %v2251_v57, %v2250_v56  ;;  %v2260_v6 = vld [vmem:[#allocation3 + $0x2] sm:$0xff]  ;;  %v7920_v48 = vld [vmem:[%s9596_s8 + $0x220] sm:$0xff]   ;;  %v7926_v57 = vld [vmem:[%s9596_s8 + $0x238] sm:$0xff]  }
 0x59c   :  { %2247 = vst [vmem:[#allocation3 + $0x11] sm:$0xff] %v2132_v54  ;;  %2248 = vst [vmem:[#allocation3 + $0x19] sm:$0xff] %v2128_v51  ;;  %v2109_v60 = vpop.f32.mrb[68].mxu1  ;;  %v2269_v62 = vpack.c.bf16 %v2128_v51, %v2132_v54  ;;  %v7914_v43 = vld [vmem:[%s9596_s8 + $0x210] sm:$0xff]   ;;  %v7915_v44 = vld [vmem:[%s9596_s8 + $0x1e8] sm:$0xff]  }
 0x59d   :  { %v2110_v53 = vadd.f32 %v2109_v60, %v2054_v52  ;;  %v7419_v0 = vpop.f32.mrb[69].mxu1  ;;  %2457 = vmatmul.mubr.bf16.vlgmr.msra.gmra.mrb[72].mxu1 %v2265_v61  ;;  %v7918_v47 = vld [vmem:[%s9596_s8 + $0x1f0] sm:$0xff]   ;;  %v7921_v54 = vld [vmem:[%s9596_s8 + $0x1f8] sm:$0xff]   ;;  %v7923_v52 = vld [vmem:[%s9596_s8 + $0x228] sm:$0xff]  }
 0x59e   :  { %v2112_v3 = vpop.f32.mrb[70].mxu1  ;;  %2464 = vmatprep.mubr.bf16.mxu1 %v2269_v62  ;;  %6845 = vmatpush3.bf16.msra.mxu1 %v7903_v59  ;;  %v7919_v24 = vld [vmem:[%s9596_s8 + $0x1b0] sm:$0xff]   ;;  %v7922_v51 = vld [vmem:[%s9596_s8 + $0x1b8] sm:$0xff]   ;;  %v7934_v59 = vld [vmem:[#allocation13 + $0x1c0] sm:$0xff]  }
 0x59f   :  { %vm2119_vm3 = vcmp.gt.f32.partialorder %v2110_v53, 0.0  ;;  %v2124_v2 = vmul.f32 0.01, %v2110_v53  ;;  %v7420_v58 = vpop.f32.mrb[71].mxu1  ;;  %6846 = vmatprep.subr.bf16.mxu1 %v7904_v63  ;;  %v7924_v56 = vld [vmem:[%s9596_s8 + $0x230] sm:$0xff]  }
 0x5a0   :  { %v6215_v3 = vld [vmem:[#allocation15 + $0x1] ss:$0 sm:$0xff] }
 0x5a1   :  { %v2129_v4 = vsel %vm2119_vm3, %v2110_v53, %v2124_v2 }
 0x5a2   :  { %v2134_v5 = vmul.f32 %v8854_v28, %v2129_v4  ;;  %v9156_v12 = vpop.f32.mrb[60].mxu0  ;;  %6847 = vmatpush3.bf16.msra.mxu1 %v7905_v33 }
 0x5a3   :  { %v2261_v8 = vld [vmem:[#allocation3 + $0xa] sm:$0xff]  ;;  %v2253_v36 = vld [vmem:[#allocation3 + $0x18] sm:$0xff]  ;;  %v7439_v13 = vpop.f32.mrb[61].mxu0  ;;  %6848 = vmatprep.subr.bf16.mxu1 %v7906_v34 }
 0x5a4   :  { %v2252_v9 = vld [vmem:[#allocation3 + $0x10] sm:$0xff]  ;;  %2249 = vst [vmem:[#allocation3 + $0x21] sm:$0xf] %v2134_v5  ;;  %v2267_v10 = vpack.c.bf16 %v2261_v8, %v2260_v6  ;;  %v9158_v38 = vpop.f32.mrb[62].mxu0  ;;  %v9243_v5 = vld [vmem:[#allocation18 + $0x1] ss:$0 sm:$0xff] }
 0x5a5   :  { %v2268_v11 = vpack.c.bf16 %v2253_v36, %v2252_v9  ;;  %v7440_v15 = vpop.f32.mrb[63].mxu0  ;;  %v2262_v14 = vld [vmem:[#allocation3 + $0x12] sm:$0xff] }
 0x5a6   :  { %7466 = vmatmul.mubr.bf16.vlgmr.msra.gmra.mrb[72].mxu0 %v2267_v10  ;;  %6849 = vmatpush3.bf16.msra.mxu1 %v7907_v35 }
 0x5a7   :  { %2465 = vmatmul.mubr.bf16.gmra.mrb[76].mxu1 %v2268_v11  ;;  %7469 = vmatprep.mubr.msk.bf16.mxu0 %vm8437_vm0, %v8436_v1 }
 0x5a8   :  { %7478 = vmatpush3.bf16.msra.mxu0 %v7908_v37  ;;  %6850 = vmatprep.subr.bf16.mxu1 %v7909_v39 }
 0x5a9   :  { %7479 = vmatprep.subr.bf16.mxu0 %v8436_v1 }
 0x5aa   :  { %v9162_v22 = vpop.f32.mrb[64].mxu0  ;;  %6851 = vmatpush3.bf16.msra.mxu1 %v7910_v55 }
 0x5ab   :  { %v2259_v16 = vld [vmem:[#allocation3 + $0x21] sm:$0xf]  ;;  %v7443_v23 = vpop.f32.mrb[65].mxu0  ;;  %6852 = vmatprep.subr.bf16.mxu1 %v7912_v41 }
 0x5ac   :  { %v2263_v17 = vld [vmem:[#allocation3 + $0x1a] sm:$0xff]  ;;  %v2272_v20 = vpack.c.bf16 %v2259_v16, %v2259_v16  ;;  %v9164_v25 = vpop.f32.mrb[66].mxu0  ;;  %v2264_v40 = vld [vmem:[#allocation3 + $0x22] sm:$0xf]  ;;  %7480 = vmatpush3.bf16.msra.mxu0 %v7911_v31  ;;  %v2227_v23 = vadd.f32 %v9243_v5, %v9158_v38 }
 0x5ad   :  { %v2254_v19 = vld [vmem:[#allocation3 + $0x20] sm:$0xf]  ;;  %v2270_v21 = vpack.c.bf16 %v2263_v17, %v2262_v14  ;;  %v7444_v27 = vpop.f32.mrb[67].mxu0  ;;  %v2273_v18 = vpack.c.bf16 %v2264_v40, %v2264_v40  ;;  %7481 = vmatprep.subr.bf16.mxu0 %v8436_v1 }
 0x5ae   :  { %v2271_v50 = vpack.c.bf16 %v2254_v19, %v2254_v19  ;;  %2472 = vmatprep.mubr.bf16.mxu1 %v2272_v20  ;;  %6853 = vmatpush3.bf16.msra.mxu1 %v7913_v42  ;;  %v2224_v19 = vadd.f32 %v9243_v5, %v9156_v12 }
 0x5af   :  { %7470 = vmatmul.mubr.bf16.gmra.mrb[76].mxu0 %v2270_v21  ;;  %6854 = vmatprep.subr.bf16.mxu1 %v7915_v44  ;;  %v2232_v44 = vadd.f32 %v9243_v5, %v9162_v22 }
 0x5b0   :  { %2473 = vmatmul.mubr.bf16.gmra.mrb[80].mxu1 %v2271_v50  ;;  %7473 = vmatprep.mubr.msk.bf16.mxu0 %vm8437_vm0, %v8436_v1 }
 0x5b1   :  { %7482 = vmatpush3.bf16.msra.mxu0 %v7914_v43 }
 0x5b2   :  { %v9168_v26 = vpop.f32.mrb[68].mxu0  ;;  %7483 = vmatprep.subr.bf16.mxu0 %v8436_v1  ;;  %6855 = vmatpush3.bf16.msra.mxu1 %v7916_v45 }
 0x5b3   :  { %v7447_v29 = vpop.f32.mrb[69].mxu0  ;;  %6856 = vmatprep.subr.bf16.mxu1 %v7918_v47 }
 0x5b4   :  { %v2242_v30 = vpop.f32.mrb[70].mxu0 }
 0x5b5   :  { %v7448_v32 = vpop.f32.mrb[71].mxu0  ;;  %7484 = vmatpush3.bf16.msra.mxu0 %v7917_v46 }
 0x5b6   :  { %7485 = vmatprep.subr.bf16.mxu0 %v8436_v1  ;;  %6857 = vmatpush3.bf16.msra.mxu1 %v7919_v24  ;;  %v2235_v24 = vadd.f32 %v9243_v5, %v9164_v25 }
 0x5b7   :  { %7474 = vmatmul.mubr.bf16.gmra.mrb[80].mxu0 %v2273_v18  ;;  %6858 = vmatprep.subr.bf16.mxu1 %v7921_v54 }
 0x5b8   :  { %7493 = vmatprep.mubr.msk.bf16.mxu0 %vm8437_vm0, %v8436_v1 }
 0x5b9   :  { %7486 = vmatpush3.bf16.msra.mxu0 %v7920_v48 }
 0x5ba   :  { %7487 = vmatprep.subr.bf16.mxu0 %v8436_v1  ;;  %6859 = vmatpush3.bf16.msra.mxu1 %v7922_v51 }
 0x5bb   :  { %7505 = vmatprep.subr.bf16.mxu1 %v8436_v1 }
 0x5bd   :  { %7488 = vmatpush3.bf16.msra.mxu0 %v7923_v52 }
 0x5be   :  { %7489 = vmatprep.subr.bf16.mxu0 %v8436_v1 }
 0x5c1   :  { %7490 = vmatpush3.bf16.msra.mxu0 %v7924_v56 }
 0x5c2   :  { %7491 = vmatprep.subr.bf16.mxu0 %v8436_v1 }
 0x5c5   :  { %7492 = vmatpush3.bf16.msra.mxu0 %v7926_v57 }
 0x5c6   :  { %6900 = vmatprep.subr.bf16.mxu0 %v7934_v59 }
 0x670   :  { %v6815_v60 = vpop.f32.mrb[72].mxu1 }
 0x671   :  { %v6816_v61 = vpop.f32.mrb[73].mxu1 }
 0x672   :  { %v6817_v62 = vadd.f32 %v6816_v61, %v6815_v60  ;;  %v6818_v63 = vpop.f32.mrb[74].mxu1 }
 0x673   :  { %v6819_v53 = vpop.f32.mrb[75].mxu1 }
 0x674   :  { %v6820_v0 = vadd.f32 %v6819_v53, %v6818_v63  ;;  %v2459_v2 = vadd.f32 %v6817_v62, %v6215_v3  ;;  %v7925_v62 = vld [vmem:[#allocation16 + $0x80] sm:$0xff]  }
 0x676   :  { %v2462_v36 = vadd.f32 %v6820_v0, %v6215_v3 }
 0x679   :  { %v2514_v58 = vpop.f32.mrb[72].mxu0 }
 0x67a   :  { %v6821_v4 = vpop.f32.mrb[76].mxu1  ;;  %v2515_v6 = vadd.f32 %v2514_v58, %v2459_v2  ;;  %v7467_v8 = vpop.f32.mrb[73].mxu0 }
 0x67b   :  { %v6822_v9 = vpop.f32.mrb[77].mxu1  ;;  %v2517_v11 = vpop.f32.mrb[74].mxu0 }
 0x67c   :  { %v6823_v10 = vadd.f32 %v6822_v9, %v6821_v4  ;;  %v6824_v13 = vpop.f32.mrb[78].mxu1  ;;  %vm2536_vm4 = vcmp.gt.f32.partialorder %v2515_v6, 0.0  ;;  %v2541_v15 = vmul.f32 0.01, %v2515_v6  ;;  %v2518_v14 = vadd.f32 %v2517_v11, %v2462_v36  ;;  %v7468_v16 = vpop.f32.mrb[75].mxu0  ;;  %v7927_v4 = vld [vmem:[#allocation16 + $0x88] sm:$0xff]  }
 0x67d   :  { %v6825_v17 = vpop.f32.mrb[79].mxu1  ;;  %v7928_v36 = vld [vmem:[#allocation16 + $0x90] sm:$0xff]   ;;  %v7929_v16 = vld [vmem:[#allocation16 + $0x98] sm:$0xff]  }
 0x67e   :  { %v6826_v20 = vadd.f32 %v6825_v17, %v6824_v13  ;;  %v2546_v21 = vsel %vm2536_vm4, %v2515_v6, %v2541_v15  ;;  %vm2537_vm5 = vcmp.gt.f32.partialorder %v2518_v14, 0.0  ;;  %v2542_v50 = vmul.f32 0.01, %v2518_v14  ;;  %v7937_v17 = vld [vmem:[#allocation13 + $0x188] sm:$0xff]  }
 0x67f   :  { %v2551_v27 = vadd.f32 %v2546_v21, %v2224_v19  ;;  %v2467_v18 = vadd.f32 %v6823_v10, %v6215_v3 }
 0x680   :  { %v2547_v40 = vsel %vm2537_vm5, %v2518_v14, %v2542_v50  ;;  %v2470_v37 = vadd.f32 %v6826_v20, %v6215_v3  ;;  %v7936_v14 = vld [vmem:[#allocation13 + $0x1c8] sm:$0xff]  }
 0x681   :  { %v2556_v29 = vmul.f32 %v8828_v49, %v2551_v27  ;;  %v2552_v30 = vadd.f32 %v2547_v40, %v2227_v23 }
 0x682   :  { %v2522_v32 = vpop.f32.mrb[76].mxu0 }
 0x683   :  { %v2523_v33 = vadd.f32 %v2522_v32, %v2467_v18  ;;  %v6827_v34 = vpop.f32.mrb[80].mxu1  ;;  %v7471_v35 = vpop.f32.mrb[77].mxu0  ;;  %2561 = vst [vmem:[#allocation2 + $0x1] sm:$0xff] %v2556_v29  ;;  %2562 = vst [vmem:[#allocation2 + $0x9] sm:$0xff] %v2552_v30  ;;  %v9250_v55 = vpack.c.bf16 %v2552_v30, %v2556_v29  ;;  %v7930_v18 = vld [vmem:[#allocation16 + $0xa0] sm:$0xff]   ;;  %v7931_v29 = vld [vmem:[#allocation16 + $0xa8] sm:$0xff]  }
 0x684   :  { %v6828_v12 = vpop.f32.mrb[81].mxu1  ;;  %v2525_v39 = vpop.f32.mrb[78].mxu0  ;;  %v7938_v35 = vld [vmem:[#allocation13 + $0x1d0] sm:$0xff]  }
 0x685   :  { %vm2538_vm6 = vcmp.gt.f32.partialorder %v2523_v33, 0.0  ;;  %v2543_v31 = vmul.f32 0.01, %v2523_v33  ;;  %v6829_v38 = vadd.f32 %v6828_v12, %v6827_v34  ;;  %v2526_v41 = vadd.f32 %v2525_v39, %v2470_v37  ;;  %v6830_v42 = vpop.f32.mrb[82].mxu1  ;;  %v7472_v43 = vpop.f32.mrb[79].mxu0  ;;  %2893 = vmatprep.mubr.bf16.mxu1 %v9250_v55  ;;  %v7933_v34 = vld [vmem:[#allocation16 + $0xb8] sm:$0xff]  }
 0x686   :  { %v6831_v45 = vpop.f32.mrb[83].mxu1  ;;  %v7939_v37 = vld [vmem:[#allocation13 + $0x200] sm:$0xff]   ;;  %v7940_v12 = vld [vmem:[#allocation13 + $0x190] sm:$0xff]   ;;  %v7941_v39 = vld [vmem:[#allocation13 + $0x1d8] sm:$0xff]  }
 0x687   :  { %v2548_v46 = vsel %vm2538_vm6, %v2523_v33, %v2543_v31  ;;  %vm2539_vm7 = vcmp.gt.f32.partialorder %v2526_v41, 0.0  ;;  %v2544_v47 = vmul.f32 0.01, %v2526_v41  ;;  %v2475_v51 = vadd.f32 %v6829_v38, %v6215_v3  ;;  %v7932_v33 = vld [vmem:[#allocation16 + $0xb0] sm:$0xff]   ;;  %v7942_v31 = vld [vmem:[#allocation13 + $0x208] sm:$0xff]   ;;  %v7944_v38 = vld [vmem:[#allocation13 + $0x1e0] sm:$0xff]  }
 0x688   :  { %v2553_v48 = vadd.f32 %v2548_v46, %v2232_v44  ;;  %v2240_v3 = vadd.f32 %v9243_v5, %v9168_v26  ;;  %v7935_v5 = vld [vmem:[#allocation13 + $0x180] sm:$0xff]   ;;  %v7947_v43 = vld [vmem:[#allocation13 + $0x1e8] sm:$0xff]   ;;  %v7948_v44 = vld [vmem:[#allocation13 + $0x218] sm:$0xff]  }
 0x689   :  { %v2549_v54 = vsel %vm2539_vm7, %v2526_v41, %v2544_v47  ;;  %v7945_v41 = vld [vmem:[#allocation13 + $0x210] sm:$0xff]   ;;  %v7946_v42 = vld [vmem:[#allocation13 + $0x1a0] sm:$0xff]   ;;  %v7949_v45 = vld [vmem:[#allocation13 + $0x1a8] sm:$0xff]  }
 0x68a   :  { %v2558_v52 = vmul.f32 %v8844_v7, %v2553_v48  ;;  %v2554_v56 = vadd.f32 %v2549_v54, %v2235_v24  ;;  %v2530_v57 = vpop.f32.mrb[80].mxu0  ;;  %v2566_v61 = vld [vmem:[#allocation2] sm:$0xff]  ;;  %v2567_v22 = vld [vmem:[#allocation2 + $0x8] sm:$0xff]  ;;  %v7950_v46 = vld [vmem:[#allocation13 + $0x1f0] sm:$0xff]  }
 0x68b   :  { %v2531_v59 = vadd.f32 %v2530_v57, %v2475_v51  ;;  %v7475_v60 = vpop.f32.mrb[81].mxu0  ;;  %v2702_v53 = vpack.c.bf16 %v2567_v22, %v2566_v61  ;;  %v2576_v9 = vld [vmem:[#allocation2 + $0x2] sm:$0xff]  ;;  %v7952_v24 = vld [vmem:[#allocation13 + $0x1b0] sm:$0xff]   ;;  %v7954_v54 = vld [vmem:[#allocation13 + $0x228] sm:$0xff]  }
 0x68c   :  { %2563 = vst [vmem:[#allocation2 + $0x11] sm:$0xff] %v2558_v52  ;;  %2564 = vst [vmem:[#allocation2 + $0x19] sm:$0xff] %v2554_v56  ;;  %v2533_v63 = vpop.f32.mrb[82].mxu0  ;;  %v9258_v0 = vpack.c.bf16 %v2554_v56, %v2558_v52  ;;  %v7951_v47 = vld [vmem:[#allocation13 + $0x220] sm:$0xff]   ;;  %v7953_v48 = vld [vmem:[#allocation13 + $0x1f8] sm:$0xff]  }
 0x68d   :  { %vm2540_vm8 = vcmp.gt.f32.partialorder %v2531_v59, 0.0  ;;  %v2545_v25 = vmul.f32 0.01, %v2531_v59  ;;  %v7476_v2 = vpop.f32.mrb[83].mxu0  ;;  %2894 = vmatmul.mubr.bf16.vlgmr.msra.gmra.mrb[84].mxu1 %v2702_v53  ;;  %v7955_v51 = vld [vmem:[#allocation13 + $0x1b8] sm:$0xff]   ;;  %v7956_v52 = vld [vmem:[#allocation13 + $0x230] sm:$0xff]  }
 0x68e   :  { %7506 = vmatpush3.bf16.msra.mxu1 %v7925_v62  ;;  %2901 = vmatprep.mubr.bf16.mxu1 %v9258_v0  ;;  %v7957_v56 = vld [vmem:[#allocation13 + $0x238] sm:$0xff]  }
 0x68f   :  { %v2550_v58 = vsel %vm2540_vm8, %v2531_v59, %v2545_v25  ;;  %7507 = vmatprep.subr.bf16.mxu1 %v8436_v1  ;;  %v7958_v57 = vld [vmem:[%s9596_s8 + $0x280] sm:$0xff]  }
 0x690   :  { %v2555_v6 = vadd.f32 %v2550_v58, %v2240_v3  ;;  %v6288_v53 = vld [vmem:[#allocation12 + $0x2] ss:$0 sm:$0xff] }
 0x692   :  { %v2560_v8 = vmul.f32 %v8854_v28, %v2555_v6  ;;  %7508 = vmatpush3.bf16.msra.mxu1 %v7927_v4 }
 0x693   :  { %v2577_v10 = vld [vmem:[#allocation2 + $0xa] sm:$0xff]  ;;  %v2569_v13 = vld [vmem:[#allocation2 + $0x18] sm:$0xff]  ;;  %7509 = vmatprep.subr.bf16.mxu1 %v8436_v1 }
 0x694   :  { %v2568_v11 = vld [vmem:[#allocation2 + $0x10] sm:$0xff]  ;;  %2565 = vst [vmem:[#allocation2 + $0x21] sm:$0xf] %v2560_v8  ;;  %v2704_v15 = vpack.c.bf16 %v2577_v10, %v2576_v9 }
 0x695   :  { %v2705_v26 = vpack.c.bf16 %v2569_v13, %v2568_v11  ;;  %v2578_v19 = vld [vmem:[#allocation2 + $0x12] sm:$0xff] }
 0x696   :  { %7494 = vmatmul.mubr.bf16.vlgmr.msra.gmra.mrb[84].mxu0 %v2704_v15  ;;  %7510 = vmatpush3.bf16.msra.mxu1 %v7928_v36 }
 0x697   :  { %2902 = vmatmul.mubr.bf16.gmra.mrb[88].mxu1 %v2705_v26  ;;  %7497 = vmatprep.mubr.msk.bf16.mxu0 %vm8437_vm0, %v8436_v1 }
 0x698   :  { %7511 = vmatprep.subr.bf16.mxu1 %v8436_v1  ;;  %6901 = vmatpush3.bf16.msra.mxu0 %v7935_v5 }
 0x699   :  { %6902 = vmatprep.subr.bf16.mxu0 %v7936_v14 }
 0x69a   :  { %7512 = vmatpush3.bf16.msra.mxu1 %v7929_v16 }
 0x69b   :  { %v2575_v20 = vld [vmem:[#allocation2 + $0x21] sm:$0xf]  ;;  %7513 = vmatprep.subr.bf16.mxu1 %v8436_v1 }
 0x69c   :  { %v2579_v21 = vld [vmem:[#allocation2 + $0x1a] sm:$0xff]  ;;  %v2709_v23 = vpack.c.bf16 %v2575_v20, %v2575_v20  ;;  %6903 = vmatpush3.bf16.msra.mxu0 %v7937_v17  ;;  %v2580_v30 = vld [vmem:[#allocation2 + $0x22] sm:$0xf] }
 0x69d   :  { %v2570_v50 = vld [vmem:[#allocation2 + $0x20] sm:$0xf]  ;;  %v2707_v27 = vpack.c.bf16 %v2579_v21, %v2578_v19  ;;  %v2710_v32 = vpack.c.bf16 %v2580_v30, %v2580_v30  ;;  %6904 = vmatprep.subr.bf16.mxu0 %v7938_v35 }
 0x69e   :  { %v2708_v40 = vpack.c.bf16 %v2570_v50, %v2570_v50  ;;  %2909 = vmatprep.mubr.bf16.mxu1 %v2709_v23  ;;  %7514 = vmatpush3.bf16.msra.mxu1 %v7930_v18 }
 0x69f   :  { %7498 = vmatmul.mubr.bf16.gmra.mrb[88].mxu0 %v2707_v27  ;;  %7515 = vmatprep.subr.bf16.mxu1 %v8436_v1 }
 0x6a0   :  { %2910 = vmatmul.mubr.bf16.gmra.mrb[92].mxu1 %v2708_v40  ;;  %7501 = vmatprep.mubr.msk.bf16.mxu0 %vm8437_vm0, %v8436_v1 }
 0x6a1   :  { %7521 = vmatprep.mubr.msk.bf16.mxu1 %vm8437_vm0, %v8436_v1  ;;  %6905 = vmatpush3.bf16.msra.mxu0 %v7940_v12 }
 0x6a2   :  { %7516 = vmatpush3.bf16.msra.mxu1 %v7931_v29  ;;  %6906 = vmatprep.subr.bf16.mxu0 %v7941_v39 }
 0x6a3   :  { %7517 = vmatprep.subr.bf16.mxu1 %v8436_v1 }
 0x6a6   :  { %7518 = vmatpush3.bf16.msra.mxu1 %v7932_v33 }
 0x6a7   :  { %7502 = vmatmul.mubr.bf16.gmra.mrb[92].mxu0 %v2710_v32  ;;  %7519 = vmatprep.subr.bf16.mxu1 %v8436_v1 }
 0x6aa   :  { %7520 = vmatpush3.bf16.msra.mxu1 %v7933_v34 }
 0x6ab   :  { %7533 = vmatprep.subr.bf16.mxu1 %v8436_v1 }
 0x6ad   :  { %7522 = vmatmul.mubr.bf16.vlgmr.msra.gmra.mrb[96].mxu1 %v9250_v55  ;;  %v7943_v55 = vld [vmem:[#allocation13 + $0x198] sm:$0xff]  }
 0x6ae   :  { %7525 = vmatprep.mubr.msk.bf16.mxu1 %vm8437_vm0, %v8436_v1  ;;  %7534 = vmatpush3.bf16.msra.mxu1 %v7939_v37 }
 0x6af   :  { %7535 = vmatprep.subr.bf16.mxu1 %v8436_v1  ;;  %6907 = vmatpush3.bf16.msra.mxu0 %v7943_v55 }
 0x6b0   :  { %6908 = vmatprep.subr.bf16.mxu0 %v7944_v38 }
 0x6b2   :  { %7536 = vmatpush3.bf16.msra.mxu1 %v7942_v31 }
 0x6b3   :  { %7537 = vmatprep.subr.bf16.mxu1 %v8436_v1  ;;  %6909 = vmatpush3.bf16.msra.mxu0 %v7946_v42 }
 0x6b4   :  { %6910 = vmatprep.subr.bf16.mxu0 %v7947_v43  ;;  %v7959_v43 = vld [vmem:[%s9596_s8 + $0x240] sm:$0xff]  }
 0x6b5   :  { %7526 = vmatmul.mubr.bf16.gmra.mrb[100].mxu1 %v9258_v0 }
 0x6b6   :  { %7529 = vmatprep.mubr.msk.bf16.mxu1 %vm8437_vm0, %v8436_v1  ;;  %7538 = vmatpush3.bf16.msra.mxu1 %v7945_v41 }
 0x6b7   :  { %7539 = vmatprep.subr.bf16.mxu1 %v8436_v1  ;;  %6911 = vmatpush3.bf16.msra.mxu0 %v7949_v45 }
 0x6b8   :  { %6912 = vmatprep.subr.bf16.mxu0 %v7950_v46 }
 0x6ba   :  { %7540 = vmatpush3.bf16.msra.mxu1 %v7948_v44 }
 0x6bb   :  { %7541 = vmatprep.subr.bf16.mxu1 %v8436_v1  ;;  %6913 = vmatpush3.bf16.msra.mxu0 %v7952_v24 }
 0x6bc   :  { %6914 = vmatprep.subr.bf16.mxu0 %v7953_v48 }
 0x6bd   :  { %7530 = vmatmul.mubr.bf16.gmra.mrb[104].mxu1 %v2709_v23 }
 0x6be   :  { %7549 = vmatprep.mubr.msk.bf16.mxu1 %vm8437_vm0, %v8436_v1  ;;  %7542 = vmatpush3.bf16.msra.mxu1 %v7951_v47  ;;  %v7960_v47 = vld [vmem:[%s9596_s8 + $0x288] sm:$0xff]  }
 0x6bf   :  { %7543 = vmatprep.subr.bf16.mxu1 %v8436_v1  ;;  %6915 = vmatpush3.bf16.msra.mxu0 %v7955_v51 }
 0x6c0   :  { %6945 = vmatprep.subr.bf16.mxu0 %v7958_v57 }
 0x6c2   :  { %7544 = vmatpush3.bf16.msra.mxu1 %v7954_v54 }
 0x6c3   :  { %7545 = vmatprep.subr.bf16.mxu1 %v8436_v1 }
 0x6c6   :  { %7546 = vmatpush3.bf16.msra.mxu1 %v7956_v52 }
 0x6c7   :  { %7547 = vmatprep.subr.bf16.mxu1 %v8436_v1 }
 0x6ca   :  { %7548 = vmatpush3.bf16.msra.mxu1 %v7957_v56 }
 0x6cb   :  { %7561 = vmatprep.subr.bf16.mxu1 %v8436_v1 }
 0x760   :  { %v6860_v59 = vpop.f32.mrb[84].mxu1 }
 0x761   :  { %v6861_v60 = vpop.f32.mrb[85].mxu1 }
 0x762   :  { %v6862_v61 = vadd.f32 %v6861_v60, %v6860_v59  ;;  %v6863_v22 = vpop.f32.mrb[86].mxu1 }
 0x763   :  { %v6864_v62 = vpop.f32.mrb[87].mxu1 }
 0x764   :  { %v6865_v63 = vadd.f32 %v6864_v62, %v6863_v22  ;;  %v2896_v0 = vadd.f32 %v6862_v61, %v6288_v53 }
 0x766   :  { %v2899_v6 = vadd.f32 %v6865_v63, %v6288_v53 }
 0x769   :  { %v2951_v25 = vpop.f32.mrb[84].mxu0 }
 0x76a   :  { %v6866_v2 = vpop.f32.mrb[88].mxu1  ;;  %v2952_v3 = vadd.f32 %v2951_v25, %v2896_v0  ;;  %v7495_v58 = vpop.f32.mrb[85].mxu0 }
 0x76b   :  { %v6867_v4 = vpop.f32.mrb[89].mxu1  ;;  %v2954_v9 = vpop.f32.mrb[86].mxu0 }
 0x76c   :  { %v6868_v8 = vadd.f32 %v6867_v4, %v6866_v2  ;;  %v6869_v36 = vpop.f32.mrb[90].mxu1  ;;  %vm2973_vm9 = vcmp.gt.f32.partialorder %v2952_v3, 0.0  ;;  %v2978_v10 = vmul.f32 0.01, %v2952_v3  ;;  %v2955_v11 = vadd.f32 %v2954_v9, %v2899_v6  ;;  %v7496_v13 = vpop.f32.mrb[87].mxu0 }
 0x76d   :  { %v6870_v15 = vpop.f32.mrb[91].mxu1 }
 0x76e   :  { %v6871_v26 = vadd.f32 %v6870_v15, %v6869_v36  ;;  %v2983_v5 = vsel %vm2973_vm9, %v2952_v3, %v2978_v10  ;;  %vm2974_vm10 = vcmp.gt.f32.partialorder %v2955_v11, 0.0  ;;  %v2979_v14 = vmul.f32 0.01, %v2955_v11 }
 0x76f   :  { %v2988_v16 = vmul.f32 %v8828_v49, %v2983_v5  ;;  %v2904_v19 = vadd.f32 %v6868_v8, %v6288_v53 }
 0x770   :  { %v2984_v17 = vsel %vm2974_vm10, %v2955_v11, %v2979_v14  ;;  %v2907_v40 = vadd.f32 %v6871_v26, %v6288_v53 }
 0x771   :  { %3103 = vst [vmem:[#allocation3 + $0x1] sm:$0xff] %v2988_v16  ;;  %3104 = vst [vmem:[#allocation3 + $0x9] sm:$0xff] %v2984_v17  ;;  %v3124_v21 = vpack.c.bf16 %v2984_v17, %v2988_v16 }
 0x772   :  { %v2959_v20 = vpop.f32.mrb[88].mxu0 }
 0x773   :  { %v2960_v50 = vadd.f32 %v2959_v20, %v2904_v19  ;;  %v6872_v23 = vpop.f32.mrb[92].mxu1  ;;  %v7499_v27 = vpop.f32.mrb[89].mxu0  ;;  %3314 = vmatprep.mubr.bf16.mxu0 %v3124_v21  ;;  %v7961_v20 = vld [vmem:[%s9596_s8 + $0x248] sm:$0xff]   ;;  %v7962_v21 = vld [vmem:[%s9596_s8 + $0x290] sm:$0xff]  }
 0x774   :  { %v6873_v18 = vpop.f32.mrb[93].mxu1  ;;  %v2962_v29 = vpop.f32.mrb[90].mxu0  ;;  %v7965_v27 = vld [vmem:[%s9596_s8 + $0x298] sm:$0xff]  }
 0x775   :  { %vm2975_vm11 = vcmp.gt.f32.partialorder %v2960_v50, 0.0  ;;  %v2980_v30 = vmul.f32 0.01, %v2960_v50  ;;  %v6874_v32 = vadd.f32 %v6873_v18, %v6872_v23  ;;  %v2963_v33 = vadd.f32 %v2962_v29, %v2907_v40  ;;  %v6875_v34 = vpop.f32.mrb[94].mxu1  ;;  %v7500_v35 = vpop.f32.mrb[91].mxu0  ;;  %v7964_v23 = vld [vmem:[%s9596_s8 + $0x2c0] sm:$0xff]  }
 0x776   :  { %v6876_v37 = vpop.f32.mrb[95].mxu1  ;;  %v7966_v40 = vld [vmem:[%s9596_s8 + $0x258] sm:$0xff]   ;;  %v7967_v18 = vld [vmem:[%s9596_s8 + $0x2c8] sm:$0xff]   ;;  %v7968_v29 = vld [vmem:[%s9596_s8 + $0x2a0] sm:$0xff]  }
 0x777   :  { %v2985_v12 = vsel %vm2975_vm11, %v2960_v50, %v2980_v30  ;;  %vm2976_vm12 = vcmp.gt.f32.partialorder %v2963_v33, 0.0  ;;  %v2981_v39 = vmul.f32 0.01, %v2963_v33  ;;  %v2912_v38 = vadd.f32 %v6874_v32, %v6288_v53  ;;  %v7963_v50 = vld [vmem:[%s9596_s8 + $0x250] sm:$0xff]   ;;  %v7969_v30 = vld [vmem:[%s9596_s8 + $0x260] sm:$0xff]   ;;  %v7972_v34 = vld [vmem:[%s9596_s8 + $0x268] sm:$0xff]  }
 0x778   :  { %v2990_v31 = vmul.f32 %v8844_v7, %v2985_v12  ;;  %v3108_v41 = vld [vmem:[#allocation3] sm:$0xff]  ;;  %v3109_v42 = vld [vmem:[#allocation3 + $0x8] sm:$0xff]  ;;  %v7973_v35 = vld [vmem:[%s9596_s8 + $0x2d8] sm:$0xff]  }
 0x779   :  { %v2986_v55 = vsel %vm2976_vm12, %v2963_v33, %v2981_v39  ;;  %v3123_v45 = vpack.c.bf16 %v3109_v42, %v3108_v41  ;;  %v3118_v59 = vld [vmem:[#allocation3 + $0x2] sm:$0xff]  ;;  %v7976_v39 = vld [vmem:[%s9596_s8 + $0x2e0] sm:$0xff]   ;;  %v7982_v42 = vld [vmem:[%s9596_s8 + $0x2f8] sm:$0xff]  }
 0x77a   :  { %3105 = vst [vmem:[#allocation3 + $0x11] sm:$0xff] %v2990_v31  ;;  %3106 = vst [vmem:[#allocation3 + $0x19] sm:$0xff] %v2986_v55  ;;  %v2967_v44 = vpop.f32.mrb[92].mxu0  ;;  %v3127_v46 = vpack.c.bf16 %v2986_v55, %v2990_v31  ;;  %v7970_v32 = vld [vmem:[%s9596_s8 + $0x2d0] sm:$0xff]   ;;  %v7971_v33 = vld [vmem:[%s9596_s8 + $0x2a8] sm:$0xff]  }
 0x77b   :  { %v2968_v24 = vadd.f32 %v2967_v44, %v2912_v38  ;;  %v7503_v48 = vpop.f32.mrb[93].mxu0  ;;  %3315 = vmatmul.mubr.bf16.vlgmr.msra.gmra.mrb[96].mxu0 %v3123_v45  ;;  %v7974_v37 = vld [vmem:[%s9596_s8 + $0x2b0] sm:$0xff]   ;;  %v7977_v31 = vld [vmem:[%s9596_s8 + $0x2b8] sm:$0xff]   ;;  %v7979_v38 = vld [vmem:[%s9596_s8 + $0x2e8] sm:$0xff]  }
 0x77c   :  { %v2970_v54 = vpop.f32.mrb[94].mxu0  ;;  %3322 = vmatprep.mubr.bf16.mxu0 %v3127_v46  ;;  %6946 = vmatpush3.bf16.msra.mxu0 %v7959_v43  ;;  %v7975_v12 = vld [vmem:[%s9596_s8 + $0x270] sm:$0xff]   ;;  %v7978_v55 = vld [vmem:[%s9596_s8 + $0x278] sm:$0xff]   ;;  %v7990_v43 = vld [vmem:[#allocation13 + $0x280] sm:$0xff]  }
 0x77d   :  { %vm2977_vm13 = vcmp.gt.f32.partialorder %v2968_v24, 0.0  ;;  %v2982_v51 = vmul.f32 0.01, %v2968_v24  ;;  %v7504_v52 = vpop.f32.mrb[95].mxu0  ;;  %6947 = vmatprep.subr.bf16.mxu0 %v7960_v47  ;;  %v7980_v41 = vld [vmem:[%s9596_s8 + $0x2f0] sm:$0xff]  }
 0x77e   :  { %v6322_v54 = vld [vmem:[#allocation15 + $0x2] ss:$0 sm:$0xff] }
 0x77f   :  { %v2987_v56 = vsel %vm2977_vm13, %v2968_v24, %v2982_v51 }
 0x780   :  { %v2992_v57 = vmul.f32 %v8854_v28, %v2987_v56  ;;  %v9306_v53 = vpop.f32.mrb[96].mxu1  ;;  %6948 = vmatpush3.bf16.msra.mxu0 %v7961_v20 }
 0x781   :  { %v3119_v60 = vld [vmem:[#allocation3 + $0xa] sm:$0xff]  ;;  %v3111_v22 = vld [vmem:[#allocation3 + $0x18] sm:$0xff]  ;;  %v7523_v0 = vpop.f32.mrb[97].mxu1  ;;  %6949 = vmatprep.subr.bf16.mxu0 %v7962_v21 }
 0x782   :  { %v3110_v61 = vld [vmem:[#allocation3 + $0x10] sm:$0xff]  ;;  %3107 = vst [vmem:[#allocation3 + $0x21] sm:$0xf] %v2992_v57  ;;  %v3125_v62 = vpack.c.bf16 %v3119_v60, %v3118_v59  ;;  %v9308_v25 = vpop.f32.mrb[98].mxu1  ;;  %v9393_v57 = vld [vmem:[#allocation18 + $0x2] ss:$0 sm:$0xff] }
 0x783   :  { %v3126_v63 = vpack.c.bf16 %v3111_v22, %v3110_v61  ;;  %v7524_v2 = vpop.f32.mrb[99].mxu1  ;;  %v3120_v3 = vld [vmem:[#allocation3 + $0x12] sm:$0xff] }
 0x784   :  { %7550 = vmatmul.mubr.bf16.vlgmr.msra.gmra.mrb[108].mxu1 %v3125_v62  ;;  %6950 = vmatpush3.bf16.msra.mxu0 %v7963_v50 }
 0x785   :  { %3323 = vmatmul.mubr.bf16.gmra.mrb[100].mxu0 %v3126_v63  ;;  %7553 = vmatprep.mubr.msk.bf16.mxu1 %vm8437_vm0, %v8436_v1 }
 0x786   :  { %7562 = vmatpush3.bf16.msra.mxu1 %v7964_v23  ;;  %6951 = vmatprep.subr.bf16.mxu0 %v7965_v27 }
 0x787   :  { %7563 = vmatprep.subr.bf16.mxu1 %v8436_v1 }
 0x788   :  { %v9312_v10 = vpop.f32.mrb[100].mxu1  ;;  %6952 = vmatpush3.bf16.msra.mxu0 %v7966_v40 }
 0x789   :  { %v3117_v58 = vld [vmem:[#allocation3 + $0x21] sm:$0xf]  ;;  %v7527_v11 = vpop.f32.mrb[101].mxu1  ;;  %6953 = vmatprep.subr.bf16.mxu0 %v7968_v29 }
 0x78a   :  { %v3121_v4 = vld [vmem:[#allocation3 + $0x1a] sm:$0xff]  ;;  %v3130_v8 = vpack.c.bf16 %v3117_v58, %v3117_v58  ;;  %v9314_v13 = vpop.f32.mrb[102].mxu1  ;;  %v3122_v26 = vld [vmem:[#allocation3 + $0x22] sm:$0xf]  ;;  %7564 = vmatpush3.bf16.msra.mxu1 %v7967_v18  ;;  %v3085_v11 = vadd.f32 %v9393_v57, %v9308_v25 }
 0x78b   :  { %v3112_v6 = vld [vmem:[#allocation3 + $0x20] sm:$0xf]  ;;  %v3128_v9 = vpack.c.bf16 %v3121_v4, %v3120_v3  ;;  %v7528_v15 = vpop.f32.mrb[103].mxu1  ;;  %v3131_v5 = vpack.c.bf16 %v3122_v26, %v3122_v26  ;;  %7565 = vmatprep.subr.bf16.mxu1 %v8436_v1 }
 0x78c   :  { %v3129_v36 = vpack.c.bf16 %v3112_v6, %v3112_v6  ;;  %3330 = vmatprep.mubr.bf16.mxu0 %v3130_v8  ;;  %6954 = vmatpush3.bf16.msra.mxu0 %v7969_v30  ;;  %v3082_v6 = vadd.f32 %v9393_v57, %v9306_v53 }
 0x78d   :  { %7554 = vmatmul.mubr.bf16.gmra.mrb[112].mxu1 %v3128_v9  ;;  %6955 = vmatprep.subr.bf16.mxu0 %v7971_v33  ;;  %v3090_v33 = vadd.f32 %v9393_v57, %v9312_v10 }
 0x78e   :  { %3331 = vmatmul.mubr.bf16.gmra.mrb[104].mxu0 %v3129_v36  ;;  %7557 = vmatprep.mubr.msk.bf16.mxu1 %vm8437_vm0, %v8436_v1 }
 0x78f   :  { %7566 = vmatpush3.bf16.msra.mxu1 %v7970_v32 }
 0x790   :  { %v9318_v14 = vpop.f32.mrb[104].mxu1  ;;  %7567 = vmatprep.subr.bf16.mxu1 %v8436_v1  ;;  %6956 = vmatpush3.bf16.msra.mxu0 %v7972_v34 }
 0x791   :  { %v7531_v16 = vpop.f32.mrb[105].mxu1  ;;  %6957 = vmatprep.subr.bf16.mxu0 %v7974_v37 }
 0x792   :  { %v3100_v17 = vpop.f32.mrb[106].mxu1 }
 0x793   :  { %v7532_v19 = vpop.f32.mrb[107].mxu1  ;;  %7568 = vmatpush3.bf16.msra.mxu1 %v7973_v35 }
 0x794   :  { %7569 = vmatprep.subr.bf16.mxu1 %v8436_v1  ;;  %6958 = vmatpush3.bf16.msra.mxu0 %v7975_v12  ;;  %v3093_v12 = vadd.f32 %v9393_v57, %v9314_v13 }
 0x795   :  { %7558 = vmatmul.mubr.bf16.gmra.mrb[116].mxu1 %v3131_v5  ;;  %6959 = vmatprep.subr.bf16.mxu0 %v7977_v31 }
 0x796   :  { %7577 = vmatprep.mubr.msk.bf16.mxu1 %vm8437_vm0, %v8436_v1 }
 0x797   :  { %7570 = vmatpush3.bf16.msra.mxu1 %v7976_v39 }
 0x798   :  { %7571 = vmatprep.subr.bf16.mxu1 %v8436_v1  ;;  %6960 = vmatpush3.bf16.msra.mxu0 %v7978_v55 }
 0x799   :  { %7589 = vmatprep.subr.bf16.mxu0 %v8436_v1 }
 0x79b   :  { %7572 = vmatpush3.bf16.msra.mxu1 %v7979_v38 }
 0x79c   :  { %7573 = vmatprep.subr.bf16.mxu1 %v8436_v1 }
 0x79f   :  { %7574 = vmatpush3.bf16.msra.mxu1 %v7980_v41 }
 0x7a0   :  { %7575 = vmatprep.subr.bf16.mxu1 %v8436_v1 }
 0x7a3   :  { %7576 = vmatpush3.bf16.msra.mxu1 %v7982_v42 }
 0x7a4   :  { %7001 = vmatprep.subr.bf16.mxu1 %v7990_v43 }
 0x84e   :  { %v6916_v44 = vpop.f32.mrb[96].mxu0 }
 0x84f   :  { %v6917_v45 = vpop.f32.mrb[97].mxu0 }
 0x850   :  { %v6918_v46 = vadd.f32 %v6917_v45, %v6916_v44  ;;  %v6919_v47 = vpop.f32.mrb[98].mxu0 }
 0x851   :  { %v6920_v24 = vpop.f32.mrb[99].mxu0 }
 0x852   :  { %v6921_v48 = vadd.f32 %v6920_v24, %v6919_v47  ;;  %v3317_v51 = vadd.f32 %v6918_v46, %v6322_v54  ;;  %v7981_v46 = vld [vmem:[#allocation16 + $0xc0] sm:$0xff]  }
 0x854   :  { %v3320_v22 = vadd.f32 %v6921_v48, %v6322_v54 }
 0x857   :  { %v3372_v52 = vpop.f32.mrb[108].mxu1 }
 0x858   :  { %v6922_v56 = vpop.f32.mrb[100].mxu0  ;;  %v3373_v59 = vadd.f32 %v3372_v52, %v3317_v51  ;;  %v7551_v60 = vpop.f32.mrb[109].mxu1 }
 0x859   :  { %v6923_v61 = vpop.f32.mrb[101].mxu0  ;;  %v3375_v63 = vpop.f32.mrb[110].mxu1 }
 0x85a   :  { %v6924_v62 = vadd.f32 %v6923_v61, %v6922_v56  ;;  %v6925_v0 = vpop.f32.mrb[102].mxu0  ;;  %vm3394_vm14 = vcmp.gt.f32.partialorder %v3373_v59, 0.0  ;;  %v3399_v2 = vmul.f32 0.01, %v3373_v59  ;;  %v3376_v3 = vadd.f32 %v3375_v63, %v3320_v22  ;;  %v7552_v58 = vpop.f32.mrb[111].mxu1  ;;  %v7983_v56 = vld [vmem:[#allocation16 + $0xc8] sm:$0xff]  }
 0x85b   :  { %v6926_v4 = vpop.f32.mrb[103].mxu0  ;;  %v7984_v22 = vld [vmem:[#allocation16 + $0xd0] sm:$0xff]   ;;  %v7985_v58 = vld [vmem:[#allocation16 + $0xd8] sm:$0xff]  }
 0x85c   :  { %v6927_v8 = vadd.f32 %v6926_v4, %v6925_v0  ;;  %v3404_v9 = vsel %vm3394_vm14, %v3373_v59, %v3399_v2  ;;  %vm3395_vm15 = vcmp.gt.f32.partialorder %v3376_v3, 0.0  ;;  %v3400_v36 = vmul.f32 0.01, %v3376_v3  ;;  %v7993_v4 = vld [vmem:[#allocation13 + $0x248] sm:$0xff]  }
 0x85d   :  { %v3409_v15 = vadd.f32 %v3404_v9, %v3082_v6  ;;  %v3325_v5 = vadd.f32 %v6924_v62, %v6322_v54  ;;  %vm4362_vm14 = vcmask 1040384  }
 0x85e   :  { %v3405_v26 = vsel %vm3395_vm15, %v3376_v3, %v3400_v36  ;;  %v3328_v23 = vadd.f32 %v6927_v8, %v6322_v54  ;;  %v7992_v3 = vld [vmem:[#allocation13 + $0x288] sm:$0xff]  }
 0x85f   :  { %v3414_v16 = vmul.f32 %v8828_v49, %v3409_v15  ;;  %v3410_v17 = vadd.f32 %v3405_v26, %v3085_v11 }
 0x860   :  { %v3380_v19 = vpop.f32.mrb[112].mxu1 }
 0x861   :  { %v3381_v20 = vadd.f32 %v3380_v19, %v3325_v5  ;;  %v6928_v21 = vpop.f32.mrb[104].mxu0  ;;  %v7555_v50 = vpop.f32.mrb[113].mxu1  ;;  %3419 = vst [vmem:[#allocation2 + $0x1] sm:$0xff] %v3414_v16  ;;  %3420 = vst [vmem:[#allocation2 + $0x9] sm:$0xff] %v3410_v17  ;;  %v9400_v40 = vpack.c.bf16 %v3410_v17, %v3414_v16  ;;  %v7986_v5 = vld [vmem:[#allocation16 + $0xe0] sm:$0xff]   ;;  %v7987_v16 = vld [vmem:[#allocation16 + $0xe8] sm:$0xff]  }
 0x862   :  { %v6929_v53 = vpop.f32.mrb[105].mxu0  ;;  %v3383_v27 = vpop.f32.mrb[114].mxu1  ;;  %v7994_v50 = vld [vmem:[#allocation13 + $0x290] sm:$0xff]  }
 0x863   :  { %vm3396_vm1 = vcmp.gt.f32.partialorder %v3381_v20, 0.0  ;;  %v3401_v18 = vmul.f32 0.01, %v3381_v20  ;;  %v6930_v25 = vadd.f32 %v6929_v53, %v6928_v21  ;;  %v3384_v29 = vadd.f32 %v3383_v27, %v3328_v23  ;;  %v6931_v30 = vpop.f32.mrb[106].mxu0  ;;  %v7556_v32 = vpop.f32.mrb[115].mxu1  ;;  %3751 = vmatprep.mubr.bf16.mxu0 %v9400_v40  ;;  %v7989_v21 = vld [vmem:[#allocation16 + $0xf8] sm:$0xff]  }
 0x864   :  { %v6932_v34 = vpop.f32.mrb[107].mxu0  ;;  %v7995_v23 = vld [vmem:[#allocation13 + $0x2c0] sm:$0xff]   ;;  %v7996_v53 = vld [vmem:[#allocation13 + $0x250] sm:$0xff]   ;;  %v7997_v27 = vld [vmem:[#allocation13 + $0x298] sm:$0xff]  }
 0x865   :  { %v3406_v35 = vsel %vm3396_vm1, %v3381_v20, %v3401_v18  ;;  %vm3397_vm2 = vcmp.gt.f32.partialorder %v3384_v29, 0.0  ;;  %v3402_v37 = vmul.f32 0.01, %v3384_v29  ;;  %v3333_v55 = vadd.f32 %v6930_v25, %v6322_v54  ;;  %v7988_v20 = vld [vmem:[#allocation16 + $0xf0] sm:$0xff]   ;;  %v7998_v18 = vld [vmem:[#allocation13 + $0x2c8] sm:$0xff]   ;;  %v8000_v25 = vld [vmem:[#allocation13 + $0x2a0] sm:$0xff]  }
 0x866   :  { %v3411_v39 = vadd.f32 %v3406_v35, %v3090_v33  ;;  %v3098_v54 = vadd.f32 %v9393_v57, %v9318_v14  ;;  %v7991_v57 = vld [vmem:[#allocation13 + $0x240] sm:$0xff]   ;;  %v8003_v32 = vld [vmem:[#allocation13 + $0x2a8] sm:$0xff]   ;;  %v8004_v33 = vld [vmem:[#allocation13 + $0x2d8] sm:$0xff]  }
 0x867   :  { %v3407_v31 = vsel %vm3397_vm2, %v3384_v29, %v3402_v37  ;;  %v8001_v29 = vld [vmem:[#allocation13 + $0x2d0] sm:$0xff]   ;;  %v8002_v30 = vld [vmem:[#allocation13 + $0x260] sm:$0xff]   ;;  %v8005_v34 = vld [vmem:[#allocation13 + $0x268] sm:$0xff]   ;;  %vm5863_vm2 = vcmask 523264  }
 0x868   :  { %v3416_v38 = vmul.f32 %v8844_v7, %v3411_v39  ;;  %v3412_v41 = vadd.f32 %v3407_v31, %v3093_v12  ;;  %v3388_v42 = vpop.f32.mrb[116].mxu1  ;;  %v3424_v45 = vld [vmem:[#allocation2] sm:$0xff]  ;;  %v3425_v10 = vld [vmem:[#allocation2 + $0x8] sm:$0xff]  ;;  %v8006_v35 = vld [vmem:[#allocation13 + $0x2b0] sm:$0xff]  }
 0x869   :  { %v3389_v43 = vadd.f32 %v3388_v42, %v3333_v55  ;;  %v7559_v44 = vpop.f32.mrb[117].mxu1  ;;  %v3560_v24 = vpack.c.bf16 %v3425_v10, %v3424_v45  ;;  %v3434_v61 = vld [vmem:[#allocation2 + $0x2] sm:$0xff]  ;;  %v8008_v12 = vld [vmem:[#allocation13 + $0x270] sm:$0xff]   ;;  %v8010_v31 = vld [vmem:[#allocation13 + $0x2e8] sm:$0xff]  }
 0x86a   :  { %3421 = vst [vmem:[#allocation2 + $0x11] sm:$0xff] %v3416_v38  ;;  %3422 = vst [vmem:[#allocation2 + $0x19] sm:$0xff] %v3412_v41  ;;  %v3391_v47 = vpop.f32.mrb[118].mxu1  ;;  %v9408_v48 = vpack.c.bf16 %v3412_v41, %v3416_v38  ;;  %v8007_v37 = vld [vmem:[#allocation13 + $0x2e0] sm:$0xff]   ;;  %v8009_v39 = vld [vmem:[#allocation13 + $0x2b8] sm:$0xff]  }
 0x86b   :  { %vm3398_vm3 = vcmp.gt.f32.partialorder %v3389_v43, 0.0  ;;  %v3403_v13 = vmul.f32 0.01, %v3389_v43  ;;  %v7560_v51 = vpop.f32.mrb[119].mxu1  ;;  %3752 = vmatmul.mubr.bf16.vlgmr.msra.gmra.mrb[108].mxu0 %v3560_v24  ;;  %v8011_v55 = vld [vmem:[#allocation13 + $0x278] sm:$0xff]   ;;  %v8012_v38 = vld [vmem:[#allocation13 + $0x2f0] sm:$0xff]  }
 0x86c   :  { %7590 = vmatpush3.bf16.msra.mxu0 %v7981_v46  ;;  %3759 = vmatprep.mubr.bf16.mxu0 %v9408_v48  ;;  %v8013_v41 = vld [vmem:[#allocation13 + $0x2f8] sm:$0xff]  }
 0x86d   :  { %v3408_v52 = vsel %vm3398_vm3, %v3389_v43, %v3403_v13  ;;  %7591 = vmatprep.subr.bf16.mxu0 %v8436_v1  ;;  %v6395_v47 = vld [vmem:[#allocation12 + $0x3] ss:$0 sm:$0xff] }
 0x86e   :  { %v3413_v59 = vadd.f32 %v3408_v52, %v3098_v54 }
 0x870   :  { %v3418_v60 = vmul.f32 %v8854_v28, %v3413_v59  ;;  %7592 = vmatpush3.bf16.msra.mxu0 %v7983_v56 }
 0x871   :  { %v3435_v62 = vld [vmem:[#allocation2 + $0xa] sm:$0xff]  ;;  %v3427_v0 = vld [vmem:[#allocation2 + $0x18] sm:$0xff]  ;;  %7593 = vmatprep.subr.bf16.mxu0 %v8436_v1 }
 0x872   :  { %v3426_v63 = vld [vmem:[#allocation2 + $0x10] sm:$0xff]  ;;  %3423 = vst [vmem:[#allocation2 + $0x21] sm:$0xf] %v3418_v60  ;;  %v3562_v2 = vpack.c.bf16 %v3435_v62, %v3434_v61 }
 0x873   :  { %v3563_v14 = vpack.c.bf16 %v3427_v0, %v3426_v63  ;;  %v3436_v6 = vld [vmem:[#allocation2 + $0x12] sm:$0xff] }
 0x874   :  { %7578 = vmatmul.mubr.bf16.vlgmr.msra.gmra.mrb[120].mxu1 %v3562_v2  ;;  %7594 = vmatpush3.bf16.msra.mxu0 %v7984_v22 }
 0x875   :  { %3760 = vmatmul.mubr.bf16.gmra.mrb[112].mxu0 %v3563_v14  ;;  %7581 = vmatprep.mubr.msk.bf16.mxu1 %vm8437_vm0, %v8436_v1 }
 0x876   :  { %7595 = vmatprep.subr.bf16.mxu0 %v8436_v1  ;;  %7002 = vmatpush3.bf16.msra.mxu1 %v7991_v57 }
 0x877   :  { %7003 = vmatprep.subr.bf16.mxu1 %v7992_v3 }
 0x878   :  { %7596 = vmatpush3.bf16.msra.mxu0 %v7985_v58 }
 0x879   :  { %v3433_v8 = vld [vmem:[#allocation2 + $0x21] sm:$0xf]  ;;  %7597 = vmatprep.subr.bf16.mxu0 %v8436_v1 }
 0x87a   :  { %v3437_v9 = vld [vmem:[#allocation2 + $0x1a] sm:$0xff]  ;;  %v3567_v11 = vpack.c.bf16 %v3433_v8, %v3433_v8  ;;  %7004 = vmatpush3.bf16.msra.mxu1 %v7993_v4  ;;  %v3438_v17 = vld [vmem:[#allocation2 + $0x22] sm:$0xf] }
 0x87b   :  { %v3428_v36 = vld [vmem:[#allocation2 + $0x20] sm:$0xf]  ;;  %v3565_v15 = vpack.c.bf16 %v3437_v9, %v3436_v6  ;;  %v3568_v19 = vpack.c.bf16 %v3438_v17, %v3438_v17  ;;  %7005 = vmatprep.subr.bf16.mxu1 %v7994_v50 }
 0x87c   :  { %v3566_v26 = vpack.c.bf16 %v3428_v36, %v3428_v36  ;;  %3767 = vmatprep.mubr.bf16.mxu0 %v3567_v11  ;;  %7598 = vmatpush3.bf16.msra.mxu0 %v7986_v5 }
 0x87d   :  { %7582 = vmatmul.mubr.bf16.gmra.mrb[124].mxu1 %v3565_v15  ;;  %7599 = vmatprep.subr.bf16.mxu0 %v8436_v1 }
 0x87e   :  { %3768 = vmatmul.mubr.bf16.gmra.mrb[116].mxu0 %v3566_v26  ;;  %7585 = vmatprep.mubr.msk.bf16.mxu1 %vm8437_vm0, %v8436_v1 }
 0x87f   :  { %7605 = vmatprep.mubr.msk.bf16.mxu0 %vm8437_vm0, %v8436_v1  ;;  %7006 = vmatpush3.bf16.msra.mxu1 %v7996_v53 }
 0x880   :  { %7600 = vmatpush3.bf16.msra.mxu0 %v7987_v16  ;;  %7007 = vmatprep.subr.bf16.mxu1 %v7997_v27 }
 0x881   :  { %7601 = vmatprep.subr.bf16.mxu0 %v8436_v1 }
 0x884   :  { %7602 = vmatpush3.bf16.msra.mxu0 %v7988_v20 }
 0x885   :  { %7586 = vmatmul.mubr.bf16.gmra.mrb[128].mxu1 %v3568_v19  ;;  %7603 = vmatprep.subr.bf16.mxu0 %v8436_v1 }
 0x888   :  { %7604 = vmatpush3.bf16.msra.mxu0 %v7989_v21 }
 0x889   :  { %7617 = vmatprep.subr.bf16.mxu0 %v8436_v1 }
 0x88b   :  { %7606 = vmatmul.mubr.bf16.vlgmr.msra.gmra.mrb[120].mxu0 %v9400_v40  ;;  %v7999_v40 = vld [vmem:[#allocation13 + $0x258] sm:$0xff]  }
 0x88c   :  { %7609 = vmatprep.mubr.msk.bf16.mxu0 %vm8437_vm0, %v8436_v1  ;;  %7618 = vmatpush3.bf16.msra.mxu0 %v7995_v23 }
 0x88d   :  { %7619 = vmatprep.subr.bf16.mxu0 %v8436_v1  ;;  %7008 = vmatpush3.bf16.msra.mxu1 %v7999_v40 }
 0x88e   :  { %7009 = vmatprep.subr.bf16.mxu1 %v8000_v25 }
 0x890   :  { %7620 = vmatpush3.bf16.msra.mxu0 %v7998_v18 }
 0x891   :  { %7621 = vmatprep.subr.bf16.mxu0 %v8436_v1  ;;  %7010 = vmatpush3.bf16.msra.mxu1 %v8002_v30 }
 0x892   :  { %7011 = vmatprep.subr.bf16.mxu1 %v8003_v32 }
 0x893   :  { %7610 = vmatmul.mubr.bf16.gmra.mrb[124].mxu0 %v9408_v48 }
 0x894   :  { %7613 = vmatprep.mubr.msk.bf16.mxu0 %vm8437_vm0, %v8436_v1  ;;  %7622 = vmatpush3.bf16.msra.mxu0 %v8001_v29 }
 0x895   :  { %7623 = vmatprep.subr.bf16.mxu0 %v8436_v1  ;;  %7012 = vmatpush3.bf16.msra.mxu1 %v8005_v34 }
 0x896   :  { %7013 = vmatprep.subr.bf16.mxu1 %v8006_v35 }
 0x898   :  { %7624 = vmatpush3.bf16.msra.mxu0 %v8004_v33 }
 0x899   :  { %7625 = vmatprep.subr.bf16.mxu0 %v8436_v1  ;;  %7014 = vmatpush3.bf16.msra.mxu1 %v8008_v12 }
 0x89a   :  { %7015 = vmatprep.subr.bf16.mxu1 %v8009_v39 }
 0x89b   :  { %7614 = vmatmul.mubr.bf16.gmra.mrb[128].mxu0 %v3567_v11 }
 0x89c   :  { %7633 = vmatprep.mubr.msk.bf16.mxu0 %vm8437_vm0, %v8436_v1  ;;  %7626 = vmatpush3.bf16.msra.mxu0 %v8007_v37 }
 0x89d   :  { %7627 = vmatprep.subr.bf16.mxu0 %v8436_v1  ;;  %7016 = vmatpush3.bf16.msra.mxu1 %v8011_v55 }
 0x8a0   :  { %7628 = vmatpush3.bf16.msra.mxu0 %v8010_v31 }
 0x8a1   :  { %7629 = vmatprep.subr.bf16.mxu0 %v8436_v1 }
 0x8a4   :  { %7630 = vmatpush3.bf16.msra.mxu0 %v8012_v38 }
 0x8a5   :  { %7631 = vmatprep.subr.bf16.mxu0 %v8436_v1 }
 0x8a8   :  { %7632 = vmatpush3.bf16.msra.mxu0 %v8013_v41 }
 0x93e   :  { %v6961_v42 = vpop.f32.mrb[108].mxu0 }
 0x93f   :  { %v6962_v43 = vpop.f32.mrb[109].mxu0 }
 0x940   :  { %v6963_v44 = vadd.f32 %v6962_v43, %v6961_v42  ;;  %v6964_v45 = vpop.f32.mrb[110].mxu0 }
 0x941   :  { %v6965_v10 = vpop.f32.mrb[111].mxu0 }
 0x942   :  { %v6966_v46 = vadd.f32 %v6965_v10, %v6964_v45  ;;  %v3754_v24 = vadd.f32 %v6963_v44, %v6395_v47 }
 0x944   :  { %v3757_v56 = vadd.f32 %v6966_v46, %v6395_v47 }
 0x947   :  { %v3809_v48 = vpop.f32.mrb[120].mxu1 }
 0x948   :  { %v6967_v13 = vpop.f32.mrb[112].mxu0  ;;  %v3810_v51 = vadd.f32 %v3809_v48, %v3754_v24  ;;  %v7579_v54 = vpop.f32.mrb[121].mxu1 }
 0x949   :  { %v6968_v52 = vpop.f32.mrb[113].mxu0  ;;  %v3812_v60 = vpop.f32.mrb[122].mxu1 }
 0x94a   :  { %v6969_v59 = vadd.f32 %v6968_v52, %v6967_v13  ;;  %v6970_v61 = vpop.f32.mrb[114].mxu0  ;;  %vm3831_vm4 = vcmp.gt.f32.partialorder %v3810_v51, 0.0  ;;  %v3836_v22 = vmul.f32 0.01, %v3810_v51  ;;  %v3813_v62 = vadd.f32 %v3812_v60, %v3757_v56  ;;  %v7580_v63 = vpop.f32.mrb[123].mxu1 }
 0x94b   :  { %v6971_v0 = vpop.f32.mrb[115].mxu0 }
 0x94c   :  { %v6972_v2 = vadd.f32 %v6971_v0, %v6970_v61  ;;  %v3841_v14 = vsel %vm3831_vm4, %v3810_v51, %v3836_v22  ;;  %vm3832_vm5 = vcmp.gt.f32.partialorder %v3813_v62, 0.0  ;;  %v3837_v57 = vmul.f32 0.01, %v3813_v62 }
 0x94d   :  { %v3846_v3 = vmul.f32 %v8828_v49, %v3841_v14  ;;  %v3762_v4 = vadd.f32 %v6969_v59, %v6395_v47  ;;  %vm6023_vm4 = vcmask 1024  }
 0x94e   :  { %v3842_v58 = vsel %vm3832_vm5, %v3813_v62, %v3837_v57  ;;  %v3765_v15 = vadd.f32 %v6972_v2, %v6395_v47 }
 0x94f   :  { %3961 = vst [vmem:[#allocation3 + $0x1] sm:$0xff] %v3846_v3  ;;  %3962 = vst [vmem:[#allocation3 + $0x9] sm:$0xff] %v3842_v58  ;;  %v3982_v8 = vpack.c.bf16 %v3842_v58, %v3846_v3  ;;  %v8014_v58 = vld [vmem:[#allocation19 + $0x40] sm:$0xff]  }
 0x950   :  { %v3817_v6 = vpop.f32.mrb[124].mxu1  ;;  %7046 = vmatprep.subr.bf16.mxu1 %v8014_v58 }
 0x951   :  { %v3818_v9 = vadd.f32 %v3817_v6, %v3762_v4  ;;  %v6973_v36 = vpop.f32.mrb[116].mxu0  ;;  %v7583_v11 = vpop.f32.mrb[125].mxu1  ;;  %4172 = vmatprep.mubr.bf16.mxu1 %v3982_v8  ;;  %v8015_v4 = vld [vmem:[#allocation19 + $0xc0] sm:$0xff]  }
 0x952   :  { %v6974_v26 = vpop.f32.mrb[117].mxu0  ;;  %v3820_v5 = vpop.f32.mrb[126].mxu1  ;;  %7068 = vmatprep.subr.bf16.mxu0 %v8015_v4  ;;  %v8016_v6 = vld [vmem:[#allocation19] sm:$0xff]   ;;  %v8020_v11 = vld [vmem:[#allocation19 + $0x8] sm:$0xff]  }
 0x953   :  { %vm3833_vm6 = vcmp.gt.f32.partialorder %v3818_v9, 0.0  ;;  %v3838_v16 = vmul.f32 0.01, %v3818_v9  ;;  %v6975_v17 = vadd.f32 %v6974_v26, %v6973_v36  ;;  %v3821_v19 = vadd.f32 %v3820_v5, %v3765_v15  ;;  %v6976_v20 = vpop.f32.mrb[118].mxu0  ;;  %v7584_v21 = vpop.f32.mrb[127].mxu1  ;;  %v8017_v8 = vld [vmem:[#allocation19 + $0x80] sm:$0xff]  }
 0x954   :  { %v6977_v50 = vpop.f32.mrb[119].mxu0  ;;  %v8019_v36 = vld [vmem:[#allocation19 + $0xc8] sm:$0xff]   ;;  %v8022_v26 = vld [vmem:[#allocation19 + $0x50] sm:$0xff]   ;;  %v8027_v20 = vld [vmem:[#allocation19 + $0xd8] sm:$0xff]  }
 0x955   :  { %v3843_v23 = vsel %vm3833_vm6, %v3818_v9, %v3838_v16  ;;  %vm3834_vm7 = vcmp.gt.f32.partialorder %v3821_v19, 0.0  ;;  %v3839_v53 = vmul.f32 0.01, %v3821_v19  ;;  %v3770_v40 = vadd.f32 %v6975_v17, %v6395_v47  ;;  %v8018_v9 = vld [vmem:[#allocation19 + $0x48] sm:$0xff]   ;;  %v8023_v5 = vld [vmem:[#allocation19 + $0xd0] sm:$0xff]   ;;  %v8028_v21 = vld [vmem:[#allocation19 + $0x18] sm:$0xff]  }
 0x956   :  { %v3848_v27 = vmul.f32 %v8844_v7, %v3843_v23  ;;  %v3966_v25 = vld [vmem:[#allocation3] sm:$0xff]  ;;  %v3967_v29 = vld [vmem:[#allocation3 + $0x8] sm:$0xff]  ;;  %v8024_v16 = vld [vmem:[#allocation19 + $0x10] sm:$0xff]  }
 0x957   :  { %v3844_v18 = vsel %vm3834_vm7, %v3821_v19, %v3839_v53  ;;  %v3981_v32 = vpack.c.bf16 %v3967_v29, %v3966_v25  ;;  %v3976_v38 = vld [vmem:[#allocation3 + $0x2] sm:$0xff]  ;;  %v8021_v15 = vld [vmem:[#allocation19 + $0x88] sm:$0xff]   ;;  %v8025_v17 = vld [vmem:[#allocation19 + $0x90] sm:$0xff]  }
 0x958   :  { %3963 = vst [vmem:[#allocation3 + $0x11] sm:$0xff] %v3848_v27  ;;  %3964 = vst [vmem:[#allocation3 + $0x19] sm:$0xff] %v3844_v18  ;;  %v3825_v30 = vpop.f32.mrb[128].mxu1  ;;  %v3985_v33 = vpack.c.bf16 %v3844_v18, %v3848_v27  ;;  %v8026_v19 = vld [vmem:[#allocation19 + $0x58] sm:$0xff]   ;;  %v8030_v23 = vld [vmem:[#allocation19 + $0x60] sm:$0xff]  }
 0x959   :  { %v3826_v34 = vadd.f32 %v3825_v30, %v3770_v40  ;;  %v7587_v35 = vpop.f32.mrb[129].mxu1  ;;  %4173 = vmatmul.mubr.bf16.vlgmr.msra.gmra.mrb[132].mxu1 %v3981_v32  ;;  %v8029_v50 = vld [vmem:[#allocation19 + $0x98] sm:$0xff]   ;;  %v8031_v53 = vld [vmem:[#allocation19 + $0xe0] sm:$0xff]   ;;  %v8034_v40 = vld [vmem:[#allocation19 + $0x68] sm:$0xff]  }
 0x95a   :  { %v3828_v37 = vpop.f32.mrb[130].mxu1  ;;  %4180 = vmatprep.mubr.bf16.mxu1 %v3985_v33  ;;  %7047 = vmatpush3.bf16.msra.mxu1 %v8016_v6  ;;  %v8032_v27 = vld [vmem:[#allocation19 + $0x20] sm:$0xff]   ;;  %v8035_v25 = vld [vmem:[#allocation19 + $0xe8] sm:$0xff]   ;;  %v8038_v32 = vld [vmem:[#allocation19 + $0x70] sm:$0xff]  }
 0x95b   :  { %vm3835_vm8 = vcmp.gt.f32.partialorder %v3826_v34, 0.0  ;;  %v3840_v12 = vmul.f32 0.01, %v3826_v34  ;;  %v7588_v39 = vpop.f32.mrb[131].mxu1  ;;  %7048 = vmatprep.subr.bf16.mxu1 %v8018_v9  ;;  %v8033_v18 = vld [vmem:[#allocation19 + $0xa0] sm:$0xff]   ;;  %v8036_v29 = vld [vmem:[#allocation19 + $0x28] sm:$0xff]  }
 0x95c   :  { %v8037_v30 = vld [vmem:[#allocation19 + $0xa8] sm:$0xff]   ;;  %v8039_v33 = vld [vmem:[#allocation19 + $0xf0] sm:$0xff]   ;;  %v8042_v37 = vld [vmem:[#allocation19 + $0x78] sm:$0xff]  }
 0x95d   :  { %v3845_v31 = vsel %vm3835_vm8, %v3826_v34, %v3840_v12  ;;  %v8040_v34 = vld [vmem:[#allocation19 + $0x30] sm:$0xff]   ;;  %v8043_v12 = vld [vmem:[#allocation19 + $0xf8] sm:$0xff]  }
 0x95e   :  { %v3850_v55 = vmul.f32 %v8854_v28, %v3845_v31  ;;  %v9446_v10 = vpop.f32.mrb[120].mxu0  ;;  %7049 = vmatpush3.bf16.msra.mxu1 %v8020_v11  ;;  %v8041_v35 = vld [vmem:[#allocation19 + $0xb0] sm:$0xff]   ;;  %v8044_v39 = vld [vmem:[#allocation19 + $0x38] sm:$0xff]  }
 0x95f   :  { %v3977_v41 = vld [vmem:[#allocation3 + $0xa] sm:$0xff]  ;;  %v3969_v43 = vld [vmem:[#allocation3 + $0x18] sm:$0xff]  ;;  %v7607_v46 = vpop.f32.mrb[121].mxu0  ;;  %7050 = vmatprep.subr.bf16.mxu1 %v8022_v26 }
 0x960   :  { %v3968_v42 = vld [vmem:[#allocation3 + $0x10] sm:$0xff]  ;;  %3965 = vst [vmem:[#allocation3 + $0x21] sm:$0xf] %v3850_v55  ;;  %v3983_v44 = vpack.c.bf16 %v3977_v41, %v3976_v38  ;;  %v9448_v47 = vpop.f32.mrb[122].mxu0  ;;  %v8045_v31 = vld [vmem:[#allocation19 + $0xb8] sm:$0xff]   ;;  %v8046_v55 = vld [vmem:[#allocation19 + $0x140] sm:$0xff]  }
 0x961   :  { %v3984_v45 = vpack.c.bf16 %v3969_v43, %v3968_v42  ;;  %v7608_v24 = vpop.f32.mrb[123].mxu0  ;;  %v3978_v48 = vld [vmem:[#allocation3 + $0x12] sm:$0xff]  ;;  %v8047_v38 = vld [vmem:[#allocation19 + $0x1c0] sm:$0xff]  }
 0x962   :  { %7634 = vmatmul.mubr.bf16.vlgmr.msra.gmra.mrb[132].mxu0 %v3983_v44  ;;  %7051 = vmatpush3.bf16.msra.mxu1 %v8024_v16  ;;  %v6429_v24 = vld [vmem:[#allocation15 + $0x3] ss:$0 sm:$0xff] }
 0x963   :  { %4181 = vmatmul.mubr.bf16.gmra.mrb[136].mxu1 %v3984_v45  ;;  %7637 = vmatprep.mubr.msk.bf16.mxu0 %vm8437_vm0, %v8436_v1 }
 0x964   :  { %7069 = vmatpush3.bf16.msra.mxu0 %v8017_v8  ;;  %7052 = vmatprep.subr.bf16.mxu1 %v8026_v19 }
 0x965   :  { %7070 = vmatprep.subr.bf16.mxu0 %v8019_v36 }
 0x966   :  { %v9452_v60 = vpop.f32.mrb[124].mxu0  ;;  %7053 = vmatpush3.bf16.msra.mxu1 %v8028_v21 }
 0x967   :  { %v3975_v13 = vld [vmem:[#allocation3 + $0x21] sm:$0xf]  ;;  %v7611_v61 = vpop.f32.mrb[125].mxu0  ;;  %7054 = vmatprep.subr.bf16.mxu1 %v8030_v23 }
 0x968   :  { %v3979_v51 = vld [vmem:[#allocation3 + $0x1a] sm:$0xff]  ;;  %v3988_v52 = vpack.c.bf16 %v3975_v13, %v3975_v13  ;;  %v9454_v22 = vpop.f32.mrb[126].mxu0  ;;  %v3980_v63 = vld [vmem:[#allocation3 + $0x22] sm:$0xf]  ;;  %7071 = vmatpush3.bf16.msra.mxu0 %v8021_v15 }
 0x969   :  { %v3970_v54 = vld [vmem:[#allocation3 + $0x20] sm:$0xf]  ;;  %v3986_v56 = vpack.c.bf16 %v3979_v51, %v3978_v48  ;;  %v7612_v62 = vpop.f32.mrb[127].mxu0  ;;  %v3989_v0 = vpack.c.bf16 %v3980_v63, %v3980_v63  ;;  %7072 = vmatprep.subr.bf16.mxu0 %v8023_v5 }
 0x96a   :  { %v3987_v59 = vpack.c.bf16 %v3970_v54, %v3970_v54  ;;  %4188 = vmatprep.mubr.bf16.mxu1 %v3988_v52  ;;  %7055 = vmatpush3.bf16.msra.mxu1 %v8032_v27  ;;  %v6420_v54 = vld [vmem:[#allocation18 + $0x3] ss:$0 sm:$0xff] }
 0x96b   :  { %7638 = vmatmul.mubr.bf16.gmra.mrb[136].mxu0 %v3986_v56  ;;  %7056 = vmatprep.subr.bf16.mxu1 %v8034_v40  ;;  %v3940_v4 = vadd.f32 %v6420_v54, %v9446_v10  ;;  %v3943_v36 = vadd.f32 %v6420_v54, %v9448_v47 }
 0x96c   :  { %4189 = vmatmul.mubr.bf16.gmra.mrb[140].mxu1 %v3987_v59  ;;  %7641 = vmatprep.mubr.msk.bf16.mxu0 %vm8437_vm0, %v8436_v1 }
 0x96d   :  { %7073 = vmatpush3.bf16.msra.mxu0 %v8025_v17 }
 0x96e   :  { %v9458_v2 = vpop.f32.mrb[128].mxu0  ;;  %7074 = vmatprep.subr.bf16.mxu0 %v8027_v20  ;;  %7057 = vmatpush3.bf16.msra.mxu1 %v8036_v29 }
 0x96f   :  { %v7615_v14 = vpop.f32.mrb[129].mxu0  ;;  %7058 = vmatprep.subr.bf16.mxu1 %v8038_v32  ;;  %v3951_v32 = vadd.f32 %v6420_v54, %v9454_v22 }
 0x970   :  { %v3958_v57 = vpop.f32.mrb[130].mxu0 }
 0x971   :  { %v7616_v3 = vpop.f32.mrb[131].mxu0  ;;  %7075 = vmatpush3.bf16.msra.mxu0 %v8029_v50 }
 0x972   :  { %7076 = vmatprep.subr.bf16.mxu0 %v8031_v53  ;;  %7059 = vmatpush3.bf16.msra.mxu1 %v8040_v34 }
 0x973   :  { %7642 = vmatmul.mubr.bf16.gmra.mrb[140].mxu0 %v3989_v0  ;;  %7060 = vmatprep.subr.bf16.mxu1 %v8042_v37 }
 0x975   :  { %7077 = vmatpush3.bf16.msra.mxu0 %v8033_v18 }
 0x976   :  { %7078 = vmatprep.subr.bf16.mxu0 %v8035_v25  ;;  %7061 = vmatpush3.bf16.msra.mxu1 %v8044_v39  ;;  %v3948_v25 = vadd.f32 %v6420_v54, %v9452_v60 }
 0x977   :  { %7090 = vmatprep.subr.bf16.mxu1 %v8046_v55 }
 0x979   :  { %7079 = vmatpush3.bf16.msra.mxu0 %v8037_v30 }
 0x97a   :  { %7080 = vmatprep.subr.bf16.mxu0 %v8039_v33 }
 0x97d   :  { %7081 = vmatpush3.bf16.msra.mxu0 %v8041_v35 }
 0x97e   :  { %7082 = vmatprep.subr.bf16.mxu0 %v8043_v12 }
 0x981   :  { %7083 = vmatpush3.bf16.msra.mxu0 %v8045_v31 }
 0x982   :  { %7112 = vmatprep.subr.bf16.mxu0 %v8047_v38 }
 0xa2c   :  { %v7017_v41 = vpop.f32.mrb[132].mxu1 }
 0xa2d   :  { %v7018_v42 = vpop.f32.mrb[133].mxu1 }
 0xa2e   :  { %v7019_v43 = vadd.f32 %v7018_v42, %v7017_v41  ;;  %v7020_v44 = vpop.f32.mrb[134].mxu1  ;;  %v3956_v42 = vadd.f32 %v6420_v54, %v9458_v2 }
 0xa2f   :  { %v7021_v45 = vpop.f32.mrb[135].mxu1 }
 0xa30   :  { %v7022_v46 = vadd.f32 %v7021_v45, %v7020_v44  ;;  %v4175_v48 = vadd.f32 %v7019_v43, %v6429_v24 }
 0xa32   :  { %v4178_v61 = vadd.f32 %v7022_v46, %v6429_v24 }
 0xa35   :  { %v4230_v13 = vpop.f32.mrb[132].mxu0 }
 0xa36   :  { %v7023_v51 = vpop.f32.mrb[136].mxu1  ;;  %v4231_v52 = vadd.f32 %v4230_v13, %v4175_v48  ;;  %v7635_v56 = vpop.f32.mrb[133].mxu0 }
 0xa37   :  { %v7024_v59 = vpop.f32.mrb[137].mxu1  ;;  %v4233_v63 = vpop.f32.mrb[134].mxu0 }
 0xa38   :  { %v7025_v62 = vadd.f32 %v7024_v59, %v7023_v51  ;;  %v7026_v0 = vpop.f32.mrb[138].mxu1  ;;  %vm4252_vm9 = vcmp.gt.f32.partialorder %v4231_v52, 0.0  ;;  %v4257_v14 = vmul.f32 0.01, %v4231_v52  ;;  %v4234_v57 = vadd.f32 %v4233_v63, %v4178_v61  ;;  %v7636_v3 = vpop.f32.mrb[135].mxu0 }
 0xa39   :  { %v7027_v58 = vpop.f32.mrb[139].mxu1 }
 0xa3a   :  { %v7028_v6 = vadd.f32 %v7027_v58, %v7026_v0  ;;  %v4262_v8 = vsel %vm4252_vm9, %v4231_v52, %v4257_v14  ;;  %vm4253_vm10 = vcmp.gt.f32.partialorder %v4234_v57, 0.0  ;;  %v4258_v9 = vmul.f32 0.01, %v4234_v57 }
 0xa3b   :  { %v4267_v11 = vadd.f32 %v4262_v8, %v3940_v4  ;;  %v4183_v26 = vadd.f32 %v7025_v62, %v6429_v24  ;;  %v8049_v8 = vld [vmem:[#allocation19 + $0x180] sm:$0xff]  }
 0xa3c   :  { %v4263_v15 = vsel %vm4253_vm10, %v4234_v57, %v4258_v9  ;;  %v4186_v50 = vadd.f32 %v7028_v6, %v6429_v24  ;;  %v8048_v6 = vld [vmem:[#allocation19 + $0x100] sm:$0xff]  }
 0xa3d   :  { %v4272_v5 = vmul.f32 %v8828_v49, %v4267_v11  ;;  %v4268_v16 = vadd.f32 %v4263_v15, %v3943_v36 }
 0xa3e   :  { %v4238_v17 = vpop.f32.mrb[136].mxu0 }
 0xa3f   :  { %v4239_v19 = vadd.f32 %v4238_v17, %v4183_v26  ;;  %v7029_v20 = vpop.f32.mrb[140].mxu1  ;;  %v7639_v21 = vpop.f32.mrb[137].mxu0  ;;  %4277 = vst [vmem:[#allocation2 + $0x1] sm:$0xff] %v4272_v5  ;;  %4278 = vst [vmem:[#allocation2 + $0x9] sm:$0xff] %v4268_v16  ;;  %v8050_v26 = vld [vmem:[#allocation19 + $0x148] sm:$0xff]  }
 0xa40   :  { %v7030_v10 = vpop.f32.mrb[141].mxu1  ;;  %v4241_v23 = vpop.f32.mrb[138].mxu0  ;;  %v8051_v16 = vld [vmem:[#allocation19 + $0x1c8] sm:$0xff]  }
 0xa41   :  { %vm4254_vm11 = vcmp.gt.f32.partialorder %v4239_v19, 0.0  ;;  %v4259_v53 = vmul.f32 0.01, %v4239_v19  ;;  %v7031_v27 = vadd.f32 %v7030_v10, %v7029_v20  ;;  %v4242_v18 = vadd.f32 %v4241_v23, %v4186_v50  ;;  %v7032_v47 = vpop.f32.mrb[142].mxu1  ;;  %v7640_v40 = vpop.f32.mrb[139].mxu0  ;;  %v8052_v21 = vld [vmem:[#allocation19 + $0x108] sm:$0xff]  }
 0xa42   :  { %v7033_v29 = vpop.f32.mrb[143].mxu1  ;;  %v8053_v50 = vld [vmem:[#allocation19 + $0x188] sm:$0xff]   ;;  %v8054_v10 = vld [vmem:[#allocation19 + $0x150] sm:$0xff]   ;;  %v8059_v47 = vld [vmem:[#allocation19 + $0x1d8] sm:$0xff]  }
 0xa43   :  { %v4264_v49 = vsel %vm4254_vm11, %v4239_v19, %v4259_v53  ;;  %vm4255_vm12 = vcmp.gt.f32.partialorder %v4242_v18, 0.0  ;;  %v4260_v30 = vmul.f32 0.01, %v4242_v18  ;;  %v4191_v35 = vadd.f32 %v7031_v27, %v6429_v24  ;;  %v8055_v23 = vld [vmem:[#allocation19 + $0x1d0] sm:$0xff]   ;;  %v8060_v40 = vld [vmem:[#allocation19 + $0x118] sm:$0xff]   ;;  %v8062_v29 = vld [vmem:[#allocation19 + $0x160] sm:$0xff]  }
 0xa44   :  { %v4269_v33 = vadd.f32 %v4264_v49, %v3948_v25  ;;  %v8056_v53 = vld [vmem:[#allocation19 + $0x110] sm:$0xff]   ;;  %v8061_v25 = vld [vmem:[#allocation19 + $0x198] sm:$0xff]   ;;  %v8063_v49 = vld [vmem:[#allocation19 + $0x1e0] sm:$0xff]  }
 0xa45   :  { %v4265_v34 = vsel %vm4255_vm12, %v4242_v18, %v4260_v30  ;;  %v8057_v27 = vld [vmem:[#allocation19 + $0x190] sm:$0xff]   ;;  %v8058_v18 = vld [vmem:[#allocation19 + $0x158] sm:$0xff]   ;;  %v8064_v30 = vld [vmem:[#allocation19 + $0x120] sm:$0xff]  }
 0xa46   :  { %v4274_v37 = vmul.f32 %v8844_v7, %v4269_v33  ;;  %v4270_v12 = vadd.f32 %v4265_v34, %v3951_v32  ;;  %v4246_v39 = vpop.f32.mrb[140].mxu0  ;;  %v4283_v45 = vld [vmem:[#allocation2 + $0x3] sm:$0x1]  ;;  %v4285_v7 = vld [vmem:[#allocation2 + $0x5] sm:$0x1]  ;;  %v8065_v32 = vld [vmem:[#allocation19 + $0x1a0] sm:$0xff]  }
 0xa47   :  { %v4247_v31 = vadd.f32 %v4246_v39, %v4191_v35  ;;  %v7643_v55 = vpop.f32.mrb[141].mxu0  ;;  %v4282_v48 = vld [vmem:[#allocation2 + $0x2] sm:$0x1]  ;;  %v4284_v0 = vld [vmem:[#allocation2 + $0x4] sm:$0x1]  ;;  %v8066_v33 = vld [vmem:[#allocation19 + $0x168] sm:$0xff]  }
 0xa48   :  { %4279 = vst [vmem:[#allocation2 + $0x11] sm:$0xff] %v4274_v37  ;;  %4280 = vst [vmem:[#allocation2 + $0x19] sm:$0xff] %v4270_v12  ;;  %v4249_v38 = vpop.f32.mrb[142].mxu0  ;;  %v4287_v9 = vld [vmem:[#allocation2 + $0x7] sm:$0x1]  ;;  %v8067_v34 = vld [vmem:[#allocation19 + $0x1e8] sm:$0xff]  }
 0xa49   :  { %vm4256_vm13 = vcmp.gt.f32.partialorder %v4247_v31, 0.0  ;;  %v4261_v60 = vmul.f32 0.01, %v4247_v31  ;;  %v7644_v41 = vpop.f32.mrb[143].mxu0  ;;  %v4289_v5 = vld [vmem:[#allocation2 + $0x9] sm:$0x1] }
 0xa4a   :  { %v8068_v35 = vld [vmem:[#allocation19 + $0x128] sm:$0xff]   ;;  %v8070_v12 = vld [vmem:[#allocation19 + $0x170] sm:$0xff]  }
 0xa4b   :  { %v4266_v43 = vsel %vm4256_vm13, %v4247_v31, %v4261_v60  ;;  %v8069_v37 = vld [vmem:[#allocation19 + $0x1a8] sm:$0xff]   ;;  %v8071_v39 = vld [vmem:[#allocation19 + $0x1f0] sm:$0xff]  }
 0xa4c   :  { %v4271_v44 = vadd.f32 %v4266_v43, %v3956_v42  ;;  %v8072_v38 = vld [vmem:[#allocation19 + $0x130] sm:$0xff]   ;;  %v8074_v42 = vld [vmem:[#allocation19 + $0x178] sm:$0xff]  }
 0xa4d   :  { %v8073_v60 = vld [vmem:[#allocation19 + $0x1b0] sm:$0xff]   ;;  %v8075_v43 = vld [vmem:[#allocation19 + $0x1f8] sm:$0xff]  }
 0xa4e   :  { %v4276_v22 = vmul.f32 %v8854_v28, %v4271_v44 }
 0xa4f   :  { %v4299_v46 = vld [vmem:[#allocation2 + $0x15] sm:$0x1]  ;;  %v4301_v24 = vld [vmem:[#allocation2 + $0x17] sm:$0x1]  ;;  %v4298_v13 = vld [vmem:[#allocation2 + $0x14] sm:$0x1] }
 0xa50   :  { %4281 = vst [vmem:[#allocation2 + $0x21] sm:$0xf] %v4276_v22  ;;  %v4331_v51 = vrot.slane %v4299_v46, 7  ;;  %v4333_v52 = vrot.slane %v4301_v24, 7  ;;  %v4330_v56 = vrot.slane %v4298_v13, 7  ;;  %v8077_v24 = vld [vmem:[#allocation19 + $0x1b8] sm:$0xff]  }
 0xa51   :  { %v4300_v59 = vld [vmem:[#allocation2 + $0x16] sm:$0x1]  ;;  %v4303_v62 = vld [vmem:[#allocation2 + $0x19] sm:$0x1]  ;;  %v4305_v63 = vld [vmem:[#allocation2 + $0x1b] sm:$0x1] }
 0xa52   :  { %v4332_v61 = vrot.slane %v4300_v59, 7  ;;  %v4364_v2 = vsel %vm4362_vm14, %v4283_v45, %v4331_v51  ;;  %v4366_v54 = vsel %vm4362_vm14, %v4285_v7, %v4333_v52  ;;  %v4363_v28 = vsel %vm4362_vm14, %v4282_v48, %v4330_v56  ;;  %v4302_v31 = vld [vmem:[#allocation2 + $0x18] sm:$0x1]  ;;  %v4304_v55 = vld [vmem:[#allocation2 + $0x1a] sm:$0x1]  ;;  %v8076_v7 = vld [vmem:[#allocation19 + $0x138] sm:$0xff]  }
 0xa53   :  { %v4335_v14 = vrot.slane %v4303_v62, 7  ;;  %v4380_v57 = vpack.c.bf16 %v4364_v2, %v4364_v2  ;;  %v4382_v3 = vpack.c.bf16 %v4366_v54, %v4366_v54  ;;  %v4379_v58 = vpack.c.bf16 %v4363_v28, %v4363_v28  ;;  %v4307_v41 = vld [vmem:[#allocation2 + $0x1d] sm:$0x1]  ;;  %v4309_v44 = vld [vmem:[#allocation2 + $0x1f] sm:$0x1]  ;;  %v8078_v48 = vld [vmem:[#allocation19 + $0x240] sm:$0xff]  }
 0xa54   :  { %v4365_v4 = vsel %vm4362_vm14, %v4284_v0, %v4332_v61  ;;  %v4337_v15 = vrot.slane %v4305_v63, 7  ;;  %v4334_v22 = vrot.slane %v4302_v31, 7  ;;  %v4336_v45 = vrot.slane %v4304_v55, 7  ;;  %v4286_v51 = vld [vmem:[#allocation2 + $0x6] sm:$0x1]  ;;  %v8079_v56 = vld [vmem:[#allocation19 + $0x2c0] sm:$0xff]  }
 0xa55   :  { %v4381_v36 = vpack.c.bf16 %v4365_v4, %v4365_v4  ;;  %v4368_v11 = vsel %vm4362_vm14, %v4287_v9, %v4335_v14  ;;  %5458 = vmatprep.mubr.bf16.mxu1 %v4380_v57  ;;  %5498 = vmatprep.mubr.bf16.mxu0 %v4382_v3  ;;  %v4339_v46 = vrot.slane %v4307_v41, 7  ;;  %v4341_v13 = vrot.slane %v4309_v44, 7  ;;  %v4288_v52 = vld [vmem:[#allocation2 + $0x8] sm:$0x1]  ;;  %v4291_v62 = vld [vmem:[#allocation2 + $0xb] sm:$0x1] }
 0xa56   :  { %5459 = vmatmul.mubr.bf16.vlgmr.msra.gmra.mrb[144].mxu1 %v4379_v58  ;;  %v4384_v17 = vpack.c.bf16 %v4368_v11, %v4368_v11  ;;  %v4370_v19 = vsel %vm4362_vm14, %v4289_v5, %v4337_v15  ;;  %v4367_v59 = vsel %vm4362_vm14, %v4286_v51, %v4334_v22  ;;  %v4369_v61 = vsel %vm4362_vm14, %v4288_v52, %v4336_v45  ;;  %v4293_v2 = vld [vmem:[#allocation2 + $0xd] sm:$0x1]  ;;  %v8080_v54 = vld [vmem:[#allocation19 + $0x200] sm:$0xff]   ;;  %v8082_v58 = vld [vmem:[#allocation19 + $0x248] sm:$0xff]  }
 0xa57   :  { %5499 = vmatmul.mubr.bf16.vlgmr.msra.gmra.mrb[144].mxu0 %v4381_v36  ;;  %7091 = vmatpush3.bf16.msra.mxu1 %v8048_v6  ;;  %v4386_v20 = vpack.c.bf16 %v4370_v19, %v4370_v19  ;;  %v4372_v63 = vsel %vm4362_vm14, %v4291_v62, %v4339_v46  ;;  %v4374_v28 = vsel %vm4362_vm14, %v4293_v2, %v4341_v13  ;;  %v8081_v57 = vld [vmem:[#allocation19 + $0x280] sm:$0xff]   ;;  %v8083_v4 = vld [vmem:[#allocation19 + $0x2c8] sm:$0xff]   ;;  %v8086_v36 = vld [vmem:[#allocation19 + $0x250] sm:$0xff]  }
 0xa58   :  { %7113 = vmatpush3.bf16.msra.mxu0 %v8049_v8  ;;  %5538 = vmatprep.mubr.bf16.mxu1 %v4384_v17  ;;  %v4383_v0 = vpack.c.bf16 %v4367_v59, %v4367_v59  ;;  %v4385_v14 = vpack.c.bf16 %v4369_v61, %v4369_v61  ;;  %v4388_v3 = vpack.c.bf16 %v4372_v63, %v4372_v63  ;;  %v8084_v8 = vld [vmem:[#allocation19 + $0x208] sm:$0xff]   ;;  %v8087_v11 = vld [vmem:[#allocation19 + $0x2d0] sm:$0xff]   ;;  %v8090_v5 = vld [vmem:[#allocation19 + $0x258] sm:$0xff]  }
 0xa59   :  { %7092 = vmatprep.subr.bf16.mxu1 %v8050_v26  ;;  %5578 = vmatprep.mubr.bf16.mxu0 %v4386_v20  ;;  %v4390_v6 = vpack.c.bf16 %v4374_v28, %v4374_v28  ;;  %v8085_v9 = vld [vmem:[#allocation19 + $0x288] sm:$0xff]   ;;  %v8088_v15 = vld [vmem:[#allocation19 + $0x210] sm:$0xff]   ;;  %v8092_v17 = vld [vmem:[#allocation19 + $0x218] sm:$0xff]  }
 0xa5a   :  { %7114 = vmatprep.subr.bf16.mxu0 %v8051_v16  ;;  %v8089_v26 = vld [vmem:[#allocation19 + $0x290] sm:$0xff]   ;;  %v8091_v16 = vld [vmem:[#allocation19 + $0x2d8] sm:$0xff]   ;;  %v8094_v20 = vld [vmem:[#allocation19 + $0x260] sm:$0xff]  }
 0xa5b   :  { %7093 = vmatpush3.bf16.msra.mxu1 %v8052_v21  ;;  %v8093_v19 = vld [vmem:[#allocation19 + $0x298] sm:$0xff]   ;;  %v8095_v21 = vld [vmem:[#allocation19 + $0x2e0] sm:$0xff]   ;;  %v8115_v61 = vld [vmem:[#allocation19 + $0x3c8] sm:$0xff]  }
 0xa5c   :  { %7115 = vmatpush3.bf16.msra.mxu0 %v8053_v50  ;;  %7094 = vmatprep.subr.bf16.mxu1 %v8054_v10  ;;  %v8096_v50 = vld [vmem:[#allocation19 + $0x220] sm:$0xff]   ;;  %v8109_v55 = vld [vmem:[#allocation19 + $0x2b8] sm:$0xff]   ;;  %v8116_v63 = vld [vmem:[#allocation19 + $0x308] sm:$0xff]  }
 0xa5d   :  { %7116 = vmatprep.subr.bf16.mxu0 %v8055_v23  ;;  %v8097_v10 = vld [vmem:[#allocation19 + $0x2a0] sm:$0xff]   ;;  %v8098_v23 = vld [vmem:[#allocation19 + $0x268] sm:$0xff]   ;;  %v8119_v28 = vld [vmem:[#allocation19 + $0x3d0] sm:$0xff]  }
 0xa5e   :  { %v8111_v44 = vld [vmem:[#allocation19 + $0x3c0] sm:$0xff]   ;;  %v8117_v2 = vld [vmem:[#allocation19 + $0x388] sm:$0xff]  }
 0xa5f   :  { %7095 = vmatpush3.bf16.msra.mxu1 %v8056_v53  ;;  %v8099_v53 = vld [vmem:[#allocation19 + $0x2e8] sm:$0xff]   ;;  %v4295_v45 = vld [vmem:[#allocation2 + $0xf] sm:$0x1] }
 0xa60   :  { %7117 = vmatpush3.bf16.msra.mxu0 %v8057_v27  ;;  %7096 = vmatprep.subr.bf16.mxu1 %v8058_v18  ;;  %v8100_v27 = vld [vmem:[#allocation19 + $0x228] sm:$0xff]   ;;  %v8112_v46 = vld [vmem:[#allocation19 + $0x300] sm:$0xff]  }
 0xa61   :  { %7118 = vmatprep.subr.bf16.mxu0 %v8059_v47  ;;  %v8101_v18 = vld [vmem:[#allocation19 + $0x2a8] sm:$0xff]   ;;  %v8102_v47 = vld [vmem:[#allocation19 + $0x270] sm:$0xff]   ;;  %v8113_v13 = vld [vmem:[#allocation19 + $0x380] sm:$0xff]  }
 0xa63   :  { %7097 = vmatpush3.bf16.msra.mxu1 %v8060_v40  ;;  %v8103_v40 = vld [vmem:[#allocation19 + $0x2f0] sm:$0xff]  }
 0xa64   :  { %7119 = vmatpush3.bf16.msra.mxu0 %v8061_v25  ;;  %7098 = vmatprep.subr.bf16.mxu1 %v8062_v29  ;;  %v4306_v25 = vld [vmem:[#allocation2 + $0x1c] sm:$0x1]  ;;  %v8104_v29 = vld [vmem:[#allocation19 + $0x230] sm:$0xff]  }
 0xa65   :  { %7120 = vmatprep.subr.bf16.mxu0 %v8063_v49  ;;  %v4308_v49 = vld [vmem:[#allocation2 + $0x1e] sm:$0x1] }
 0xa67   :  { %7099 = vmatpush3.bf16.msra.mxu1 %v8064_v30  ;;  %v8105_v30 = vld [vmem:[#allocation19 + $0x2b0] sm:$0xff]  }
 0xa68   :  { %7121 = vmatpush3.bf16.msra.mxu0 %v8065_v32  ;;  %7100 = vmatprep.subr.bf16.mxu1 %v8066_v33  ;;  %v8106_v32 = vld [vmem:[#allocation19 + $0x278] sm:$0xff]   ;;  %v4311_v33 = vld [vmem:[#allocation2 + $0x21] sm:$0x1] }
 0xa69   :  { %7122 = vmatprep.subr.bf16.mxu0 %v8067_v34  ;;  %v8107_v34 = vld [vmem:[#allocation19 + $0x2f8] sm:$0xff]   ;;  %v4343_v31 = vrot.slane %v4311_v33, 7 }
 0xa6a   :  { %v5752_v33 = vld [vmem:[%s9604_s16] sm:$0xff] }
 0xa6b   :  { %7101 = vmatpush3.bf16.msra.mxu1 %v8068_v35  ;;  %v4338_v35 = vrot.slane %v4306_v25, 7 }
 0xa6c   :  { %7123 = vmatpush3.bf16.msra.mxu0 %v8069_v37  ;;  %7102 = vmatprep.subr.bf16.mxu1 %v8070_v12  ;;  %v4313_v37 = vld [vmem:[#allocation2 + $0x23] sm:$0x1]  ;;  %v4340_v12 = vrot.slane %v4308_v49, 7 }
 0xa6d   :  { %7124 = vmatprep.subr.bf16.mxu0 %v8071_v39  ;;  %v8108_v39 = vld [vmem:[#allocation19 + $0x238] sm:$0xff]   ;;  %v4345_v41 = vrot.slane %v4313_v37, 7  ;;  %v8438_v37 = vmov 0.0|0.0  }
 0xa6f   :  { %7103 = vmatpush3.bf16.msra.mxu1 %v8072_v38  ;;  %v4290_v38 = vld [vmem:[#allocation2 + $0xa] sm:$0x1] }
 0xa70   :  { %7125 = vmatpush3.bf16.msra.mxu0 %v8073_v60  ;;  %7104 = vmatprep.subr.bf16.mxu1 %v8074_v42  ;;  %v8110_v60 = vld [vmem:[#allocation19 + $0x340] sm:$0xff]   ;;  %v4371_v42 = vsel %vm4362_vm14, %v4290_v38, %v4338_v35 }
 0xa71   :  { %7126 = vmatprep.subr.bf16.mxu0 %v8075_v43  ;;  %v4292_v43 = vld [vmem:[#allocation2 + $0xc] sm:$0x1]  ;;  %v5754_v35 = vld [vmem:[%s9604_s16 + $0x10] sm:$0xff] }
 0xa72   :  { %v4373_v22 = vsel %vm4362_vm14, %v4292_v43, %v4340_v12  ;;  %v5757_v38 = vld [vmem:[%s9604_s16 + $0x28] sm:$0xff] }
 0xa73   :  { %7105 = vmatpush3.bf16.msra.mxu1 %v8076_v7  ;;  %v4376_v7 = vsel %vm4362_vm14, %v4295_v45, %v4343_v31  ;;  %v4389_v52 = vpack.c.bf16 %v4373_v22, %v4373_v22  ;;  %v5761_v22 = vld [vmem:[%s9604_s16 + $0x48] sm:$0xff] }
 0xa74   :  { %7127 = vmatpush3.bf16.msra.mxu0 %v8077_v24  ;;  %7134 = vmatprep.subr.bf16.mxu1 %v8078_v48  ;;  %v4297_v24 = vld [vmem:[#allocation2 + $0x11] sm:$0x1]  ;;  %v4387_v48 = vpack.c.bf16 %v4371_v42, %v4371_v42  ;;  %v4392_v59 = vpack.c.bf16 %v4376_v7, %v4376_v7  ;;  %v5759_v42 = vld [vmem:[%s9604_s16 + $0x38] sm:$0xff] }
 0xa75   :  { %7156 = vmatprep.subr.bf16.mxu0 %v8079_v56  ;;  %v4378_v51 = vsel %vm4362_vm14, %v4297_v24, %v4345_v41  ;;  %v8114_v56 = vld [vmem:[#allocation19 + $0x348] sm:$0xff]  }
 0xa76   :  { %5539 = vmatmul.mubr.bf16.vlgmr.msra.gmra.mrb[148].mxu1 %v4383_v0  ;;  %v4394_v62 = vpack.c.bf16 %v4378_v51, %v4378_v51  ;;  %v8120_v0 = vld [vmem:[#allocation19 + $0x310] sm:$0xff]   ;;  %v5758_v41 = vld [vmem:[%s9604_s16 + $0x30] sm:$0xff] }
 0xa77   :  { %5579 = vmatmul.mubr.bf16.vlgmr.msra.gmra.mrb[148].mxu0 %v4385_v14  ;;  %7135 = vmatpush3.bf16.msra.mxu1 %v8080_v54  ;;  %v8118_v54 = vld [vmem:[#allocation19 + $0x350] sm:$0xff]   ;;  %v7716_v43 = vpack.c.bf16 %v5759_v42, %v5758_v41 }
 0xa78   :  { %5618 = vmatprep.mubr.bf16.mxu1 %v4388_v3  ;;  %7157 = vmatpush3.bf16.msra.mxu0 %v8081_v57  ;;  %v8121_v14 = vld [vmem:[#allocation19 + $0x390] sm:$0xff]   ;;  %v8122_v57 = vld [vmem:[#allocation19 + $0x358] sm:$0xff]  }
 0xa79   :  { %5658 = vmatprep.mubr.bf16.mxu0 %v4390_v6  ;;  %7136 = vmatprep.subr.bf16.mxu1 %v8082_v58  ;;  %v8123_v3 = vld [vmem:[#allocation19 + $0x3d8] sm:$0xff]   ;;  %v8126_v6 = vld [vmem:[#allocation19 + $0x360] sm:$0xff]   ;;  %v5763_v7 = vld [vmem:[%s9604_s16 + $0x58] sm:$0xff] }
 0xa7a   :  { %7158 = vmatprep.subr.bf16.mxu0 %v8083_v4  ;;  %v8124_v58 = vld [vmem:[#allocation19 + $0x318] sm:$0xff]  }
 0xa7b   :  { %7137 = vmatpush3.bf16.msra.mxu1 %v8084_v8  ;;  %v8125_v4 = vld [vmem:[#allocation19 + $0x398] sm:$0xff]   ;;  %v8127_v8 = vld [vmem:[#allocation19 + $0x3e0] sm:$0xff]  }
 0xa7c   :  { %7159 = vmatpush3.bf16.msra.mxu0 %v8085_v9  ;;  %7138 = vmatprep.subr.bf16.mxu1 %v8086_v36  ;;  %v8128_v9 = vld [vmem:[#allocation19 + $0x320] sm:$0xff]  }
 0xa7d   :  { %7160 = vmatprep.subr.bf16.mxu0 %v8087_v11  ;;  %v8129_v36 = vld [vmem:[#allocation19 + $0x3a0] sm:$0xff]   ;;  %v8130_v11 = vld [vmem:[#allocation19 + $0x368] sm:$0xff]  }
 0xa7f   :  { %7139 = vmatpush3.bf16.msra.mxu1 %v8088_v15  ;;  %v8131_v15 = vld [vmem:[#allocation19 + $0x3e8] sm:$0xff]  }
 0xa80   :  { %7161 = vmatpush3.bf16.msra.mxu0 %v8089_v26  ;;  %7140 = vmatprep.subr.bf16.mxu1 %v8090_v5  ;;  %v8132_v26 = vld [vmem:[#allocation19 + $0x328] sm:$0xff]  }
 0xa81   :  { %7162 = vmatprep.subr.bf16.mxu0 %v8091_v16  ;;  %v8133_v5 = vld [vmem:[#allocation19 + $0x3a8] sm:$0xff]   ;;  %v8134_v16 = vld [vmem:[#allocation19 + $0x370] sm:$0xff]  }
 0xa83   :  { %7141 = vmatpush3.bf16.msra.mxu1 %v8092_v17  ;;  %v8135_v17 = vld [vmem:[#allocation19 + $0x3f0] sm:$0xff]  }
 0xa84   :  { %7163 = vmatpush3.bf16.msra.mxu0 %v8093_v19  ;;  %7142 = vmatprep.subr.bf16.mxu1 %v8094_v20  ;;  %v4310_v19 = vld [vmem:[#allocation2 + $0x20] sm:$0x1] }
 0xa85   :  { %7164 = vmatprep.subr.bf16.mxu0 %v8095_v21  ;;  %v8136_v20 = vld [vmem:[#allocation19 + $0x330] sm:$0xff]  }
 0xa86   :  { %v4312_v21 = vld [vmem:[#allocation2 + $0x22] sm:$0x1] }
 0xa87   :  { %7143 = vmatpush3.bf16.msra.mxu1 %v8096_v50  ;;  %v8137_v50 = vld [vmem:[#allocation19 + $0x3b0] sm:$0xff]  }
 0xa88   :  { %7165 = vmatpush3.bf16.msra.mxu0 %v8097_v10  ;;  %7144 = vmatprep.subr.bf16.mxu1 %v8098_v23  ;;  %v8138_v10 = vld [vmem:[#allocation19 + $0x378] sm:$0xff]  }
 0xa89   :  { %7166 = vmatprep.subr.bf16.mxu0 %v8099_v53  ;;  %v8139_v23 = vld [vmem:[#allocation19 + $0x3f8] sm:$0xff]   ;;  %v4342_v53 = vrot.slane %v4310_v19, 7 }
 0xa8b   :  { %7145 = vmatpush3.bf16.msra.mxu1 %v8100_v27  ;;  %v4344_v27 = vrot.slane %v4312_v21, 7 }
 0xa8c   :  { %7167 = vmatpush3.bf16.msra.mxu0 %v8101_v18  ;;  %7146 = vmatprep.subr.bf16.mxu1 %v8102_v47  ;;  %v8140_v18 = vld [vmem:[#allocation19 + $0x338] sm:$0xff]  }
 0xa8d   :  { %7168 = vmatprep.subr.bf16.mxu0 %v8103_v40  ;;  %v8141_v47 = vld [vmem:[#allocation19 + $0x3b8] sm:$0xff]  }
 0xa8e   :  { %v4294_v40 = vld [vmem:[#allocation2 + $0xe] sm:$0x1] }
 0xa8f   :  { %7147 = vmatpush3.bf16.msra.mxu1 %v8104_v29  ;;  %v4375_v25 = vsel %vm4362_vm14, %v4294_v40, %v4342_v53  ;;  %v4296_v29 = vld [vmem:[#allocation2 + $0x10] sm:$0x1] }
 0xa90   :  { %7169 = vmatpush3.bf16.msra.mxu0 %v8105_v30  ;;  %7148 = vmatprep.subr.bf16.mxu1 %v8106_v32  ;;  %v4377_v49 = vsel %vm4362_vm14, %v4296_v29, %v4344_v27  ;;  %v4391_v30 = vpack.c.bf16 %v4375_v25, %v4375_v25  ;;  %v5766_v29 = vld [vmem:[%s9604_s16 + $0x70] sm:$0xff] }
 0xa91   :  { %7170 = vmatprep.subr.bf16.mxu0 %v8107_v34  ;;  %v4393_v32 = vpack.c.bf16 %v4377_v49, %v4377_v49  ;;  %v5753_v34 = vld [vmem:[%s9604_s16 + $0x8] sm:$0xff]  ;;  %v5767_v49 = vld [vmem:[%s9604_s16 + $0x78] sm:$0xff] }
 0xa92   :  { %v7707_v12 = vpack.c.bf16 %v5753_v34, %v5752_v33  ;;  %v5848_v33 = vld [vmem:[%s9606_s18] sm:$0xff]  ;;  %v5849_v34 = vld [vmem:[%s9606_s18 + $0x8] sm:$0xff] }
 0xa93   :  { %7149 = vmatpush3.bf16.msra.mxu1 %v8108_v39  ;;  %v5755_v39 = vld [vmem:[%s9604_s16 + $0x18] sm:$0xff] }
 0xa94   :  { %7171 = vmatpush3.bf16.msra.mxu0 %v8109_v55  ;;  %7178 = vmatprep.subr.bf16.mxu1 %v8110_v60  ;;  %v7710_v31 = vpack.c.bf16 %v5755_v39, %v5754_v35  ;;  %v5756_v55 = vld [vmem:[%s9604_s16 + $0x20] sm:$0xff]  ;;  %v5850_v35 = vld [vmem:[%s9606_s18 + $0x10] sm:$0xff] }
 0xa95   :  { %7200 = vmatprep.subr.bf16.mxu0 %v8111_v44  ;;  %v7713_v60 = vpack.c.bf16 %v5757_v38, %v5756_v55  ;;  %v5760_v44 = vld [vmem:[%s9604_s16 + $0x40] sm:$0xff]  ;;  %v5851_v55 = vld [vmem:[%s9606_s18 + $0x18] sm:$0xff] }
 0xa96   :  { %5619 = vmatmul.mubr.bf16.vlgmr.msra.gmra.mrb[152].mxu1 %v4387_v48  ;;  %v7719_v45 = vpack.c.bf16 %v5761_v22, %v5760_v44  ;;  %v5764_v48 = vld [vmem:[%s9604_s16 + $0x60] sm:$0xff]  ;;  %v7734_v22 = vpack.c.bf16 %v5851_v55, %v5850_v35 }
 0xa97   :  { %5659 = vmatmul.mubr.bf16.vlgmr.msra.gmra.mrb[152].mxu0 %v4389_v52  ;;  %7179 = vmatpush3.bf16.msra.mxu1 %v8112_v46  ;;  %v5762_v46 = vld [vmem:[%s9604_s16 + $0x50] sm:$0xff] }
 0xa98   :  { %5698 = vmatprep.mubr.bf16.mxu1 %v4392_v59  ;;  %7201 = vmatpush3.bf16.msra.mxu0 %v8113_v13  ;;  %v7722_v24 = vpack.c.bf16 %v5763_v7, %v5762_v46  ;;  %v5765_v13 = vld [vmem:[%s9604_s16 + $0x68] sm:$0xff]  ;;  %v5852_v7 = vld [vmem:[%s9606_s18 + $0x20] sm:$0xff] }
 0xa99   :  { %5738 = vmatprep.mubr.bf16.mxu0 %v4394_v62  ;;  %7180 = vmatprep.subr.bf16.mxu1 %v8114_v56  ;;  %v6454_v56 = vld [vmem:[#allocation21] ss:$0 sm:$0xff] }
 0xa9a   :  { %7202 = vmatprep.subr.bf16.mxu0 %v8115_v61 }
 0xa9b   :  { %7181 = vmatpush3.bf16.msra.mxu1 %v8116_v63 }
 0xa9c   :  { %7203 = vmatpush3.bf16.msra.mxu0 %v8117_v2  ;;  %7182 = vmatprep.subr.bf16.mxu1 %v8118_v54 }
 0xa9d   :  { %7204 = vmatprep.subr.bf16.mxu0 %v8119_v28  ;;  %v7725_v28 = vpack.c.bf16 %v5765_v13, %v5764_v48 }
 0xa9f   :  { %7183 = vmatpush3.bf16.msra.mxu1 %v8120_v0 }
 0xaa0   :  { %7205 = vmatpush3.bf16.msra.mxu0 %v8121_v14  ;;  %7184 = vmatprep.subr.bf16.mxu1 %v8122_v57 }
 0xaa1   :  { %7206 = vmatprep.subr.bf16.mxu0 %v8123_v3 }
 0xaa3   :  { %7185 = vmatpush3.bf16.msra.mxu1 %v8124_v58 }
 0xaa4   :  { %7207 = vmatpush3.bf16.msra.mxu0 %v8125_v4  ;;  %7186 = vmatprep.subr.bf16.mxu1 %v8126_v6 }
 0xaa5   :  { %7208 = vmatprep.subr.bf16.mxu0 %v8127_v8 }
 0xaa7   :  { %7187 = vmatpush3.bf16.msra.mxu1 %v8128_v9 }
 0xaa8   :  { %7209 = vmatpush3.bf16.msra.mxu0 %v8129_v36  ;;  %7188 = vmatprep.subr.bf16.mxu1 %v8130_v11 }
 0xaa9   :  { %7210 = vmatprep.subr.bf16.mxu0 %v8131_v15 }
 0xaab   :  { %7189 = vmatpush3.bf16.msra.mxu1 %v8132_v26 }
 0xaac   :  { %7211 = vmatpush3.bf16.msra.mxu0 %v8133_v5  ;;  %7190 = vmatprep.subr.bf16.mxu1 %v8134_v16 }
 0xaad   :  { %7212 = vmatprep.subr.bf16.mxu0 %v8135_v17 }
 0xaaf   :  { %7191 = vmatpush3.bf16.msra.mxu1 %v8136_v20 }
 0xab0   :  { %7213 = vmatpush3.bf16.msra.mxu0 %v8137_v50  ;;  %7192 = vmatprep.subr.bf16.mxu1 %v8138_v10 }
 0xab1   :  { %7214 = vmatprep.subr.bf16.mxu0 %v8139_v23 }
 0xab3   :  { %7193 = vmatpush3.bf16.msra.mxu1 %v8140_v18 }
 0xab4   :  { %7215 = vmatpush3.bf16.msra.mxu0 %v8141_v47  ;;  %7706 = vmatprep.subr.bf16.mxu1 %v8438_v37 }
 0xab5   :  { %7730 = vmatprep.subr.bf16.mxu0 %v8438_v37 }
 0xab6   :  { %5699 = vmatmul.mubr.bf16.vlgmr.msra.gmra.mrb[156].mxu1 %v4391_v30  ;;  %v7728_v30 = vpack.c.bf16 %v5767_v49, %v5766_v29 }
 0xab7   :  { %5739 = vmatmul.mubr.bf16.vlgmr.msra.gmra.mrb[156].mxu0 %v4393_v32  ;;  %7677 = vmatprep.mubr.msk.f32.mxu1 %vm8437_vm0, %v8436_v1 }
 0xab8   :  { %7696 = vmatprep.mubr.msk.f32.mxu0 %vm8437_vm0, %v8436_v1  ;;  %7708 = vmatpush3.bf16.msra.mxu1 %v7707_v12 }
 0xab9   :  { %7709 = vmatprep.subr.bf16.mxu1 %v8438_v37 }
 0xabc   :  { %7711 = vmatpush3.bf16.msra.mxu1 %v7710_v31  ;;  %v7731_v31 = vpack.c.bf16 %v5849_v34, %v5848_v33 }
 0xabd   :  { %7712 = vmatprep.subr.bf16.mxu1 %v8438_v37 }
 0xabe   :  { %7732 = vmatpush3.bf16.msra.mxu0 %v7731_v31 }
 0xabf   :  { %7733 = vmatprep.subr.bf16.mxu0 %v8438_v37 }
 0xac0   :  { %7714 = vmatpush3.bf16.msra.mxu1 %v7713_v60 }
 0xac1   :  { %7715 = vmatprep.subr.bf16.mxu1 %v8438_v37 }
 0xac2   :  { %7735 = vmatpush3.bf16.msra.mxu0 %v7734_v22 }
 0xac3   :  { %7736 = vmatprep.subr.bf16.mxu0 %v8438_v37 }
 0xac4   :  { %7717 = vmatpush3.bf16.msra.mxu1 %v7716_v43 }
 0xac5   :  { %7718 = vmatprep.subr.bf16.mxu1 %v8438_v37 }
 0xac8   :  { %7720 = vmatpush3.bf16.msra.mxu1 %v7719_v45 }
 0xac9   :  { %7721 = vmatprep.subr.bf16.mxu1 %v8438_v37 }
 0xacc   :  { %7723 = vmatpush3.bf16.msra.mxu1 %v7722_v24  ;;  %v5853_v24 = vld [vmem:[%s9606_s18 + $0x28] sm:$0xff] }
 0xacd   :  { %7724 = vmatprep.subr.bf16.mxu1 %v8438_v37  ;;  %v7737_v13 = vpack.c.bf16 %v5853_v24, %v5852_v7 }
 0xacf   :  { %7738 = vmatpush3.bf16.msra.mxu0 %v7737_v13 }
 0xad0   :  { %7726 = vmatpush3.bf16.msra.mxu1 %v7725_v28  ;;  %7739 = vmatprep.subr.bf16.mxu0 %v8438_v37 }
 0xad1   :  { %7727 = vmatprep.subr.bf16.mxu1 %v8438_v37 }
 0xad4   :  { %7729 = vmatpush3.bf16.msra.mxu1 %v7728_v30 }
 0xb29   :  { %v7062_v51 = vpop.f32.mrb[144].mxu1 }
 0xb2a   :  { %v7084_v52 = vpop.f32.mrb[144].mxu0  ;;  %v7063_v59 = vpop.f32.mrb[145].mxu1 }
 0xb2b   :  { %v7085_v61 = vpop.f32.mrb[145].mxu0  ;;  %v7064_v62 = vadd.f32 %v7063_v59, %v7062_v51  ;;  %v7065_v2 = vpop.f32.mrb[146].mxu1 }
 0xb2c   :  { %v7086_v63 = vadd.f32 %v7085_v61, %v7084_v52  ;;  %v7087_v54 = vpop.f32.mrb[146].mxu0  ;;  %v7066_v0 = vpop.f32.mrb[147].mxu1  ;;  %v5854_v61 = vld [vmem:[%s9606_s18 + $0x30] sm:$0xff] }
 0xb2d   :  { %v7088_v14 = vpop.f32.mrb[147].mxu0  ;;  %v5461_v57 = vadd.f32 %v7064_v62, %v6454_v56  ;;  %v5855_v62 = vld [vmem:[%s9606_s18 + $0x38] sm:$0xff]  ;;  %v6583_v2 = vld [vmem:[#allocation22] ss:$0 sm:$0xff] }
 0xb2f   :  { %v5501_v3 = vadd.f32 %v7086_v63, %v5461_v57  ;;  %v7740_v63 = vpack.c.bf16 %v5855_v62, %v5854_v61 }
 0xb31   :  { %7741 = vmatpush3.bf16.msra.mxu0 %v7740_v63 }
 0xb32   :  { %7742 = vmatprep.subr.bf16.mxu0 %v8438_v37  ;;  %v5941_v37 = vld [vmem:[%s9608_s20 + $0x8] sm:$0xff] }
 0xb49   :  { %v7106_v58 = vpop.f32.mrb[148].mxu1 }
 0xb4a   :  { %v7128_v4 = vpop.f32.mrb[148].mxu0  ;;  %v7107_v6 = vpop.f32.mrb[149].mxu1 }
 0xb4b   :  { %v7129_v8 = vpop.f32.mrb[149].mxu0  ;;  %v7108_v9 = vadd.f32 %v7107_v6, %v7106_v58  ;;  %v7109_v11 = vpop.f32.mrb[150].mxu1 }
 0xb4c   :  { %v7130_v36 = vadd.f32 %v7129_v8, %v7128_v4  ;;  %v7131_v15 = vpop.f32.mrb[150].mxu0  ;;  %v7110_v26 = vpop.f32.mrb[151].mxu1  ;;  %v6584_v4 = vld [vmem:[%s9607_s19] ss:$0 sm:$0xff]  ;;  %v6586_v11 = vld [vmem:[#allocation4] ss:$0 sm:$0xff] }
 0xb4d   :  { %v7132_v5 = vpop.f32.mrb[151].mxu0  ;;  %v5541_v16 = vadd.f32 %v7108_v9, %v5501_v3  ;;  %v5940_v3 = vld [vmem:[%s9608_s20] sm:$0xff] }
 0xb4e   :  { %v7743_v58 = vpack.c.bf16 %v5941_v37, %v5940_v3 }
 0xb4f   :  { %v5581_v17 = vadd.f32 %v7130_v36, %v5541_v16 }
 0xb69   :  { %v7150_v19 = vpop.f32.mrb[152].mxu1 }
 0xb6a   :  { %v7172_v20 = vpop.f32.mrb[152].mxu0  ;;  %v7151_v21 = vpop.f32.mrb[153].mxu1 }
 0xb6b   :  { %v7152_v50 = vadd.f32 %v7151_v21, %v7150_v19  ;;  %v7173_v10 = vpop.f32.mrb[153].mxu0  ;;  %v7153_v23 = vpop.f32.mrb[154].mxu1 }
 0xb6c   :  { %v7174_v53 = vadd.f32 %v7173_v10, %v7172_v20  ;;  %v7175_v27 = vpop.f32.mrb[154].mxu0  ;;  %v7154_v18 = vpop.f32.mrb[155].mxu1 }
 0xb6d   :  { %v5621_v47 = vadd.f32 %v7152_v50, %v5581_v17  ;;  %v7176_v40 = vpop.f32.mrb[155].mxu0 }
 0xb6f   :  { %v5661_v25 = vadd.f32 %v7174_v53, %v5621_v47 }
 0xb89   :  { %v7194_v32 = vpop.f32.mrb[156].mxu1 }
 0xb8a   :  { %v7216_v12 = vpop.f32.mrb[156].mxu0  ;;  %v7195_v39 = vpop.f32.mrb[157].mxu1 }
 0xb8b   :  { %v7196_v38 = vadd.f32 %v7195_v39, %v7194_v32  ;;  %v7217_v60 = vpop.f32.mrb[157].mxu0  ;;  %v7197_v41 = vpop.f32.mrb[158].mxu1 }
 0xb8c   :  { %v7218_v42 = vadd.f32 %v7217_v60, %v7216_v12  ;;  %v7219_v43 = vpop.f32.mrb[158].mxu0  ;;  %v7198_v44 = vpop.f32.mrb[159].mxu1 }
 0xb8d   :  { %v5701_v45 = vadd.f32 %v7196_v38, %v5661_v25  ;;  %v7220_v46 = vpop.f32.mrb[159].mxu0 }
 0xb8f   :  { %v5741_v48 = vadd.f32 %v7218_v42, %v5701_v45 }
 0xb91   :  { %vm5746_vm15 = vcmp.gt.f32.partialorder %v5741_v48, 0.0  ;;  %v5747_v51 = vmul.f32 0.1, %v5741_v48 }
 0xb93   :  { %v5748_v52 = vsel %vm5746_vm15, %v5741_v48, %v5747_v51 }
 0xb94   :  { %5749 = vrot.lane.b32.xlu0 %v5748_v52, %s8422_s27 }
 0xc06   :  { %v5750_v56 = vpop.permute.xlu0 %5749 }
 0xc07   :  { %v5751_v59 = vadd.f32 %v5750_v56, %v5748_v52 }
 0xc09   :  { %7678 = vmatmul.mubr.f32.vlgmr.msra.gmra.mrb[160].mxu1 %v5751_v59 }
 0xcdc   :  { %v5841_v54 = vpop.f32.mrb[160].mxu1 }
 0xcdd   :  { %v5842_v28 = vadd.f32 %v6583_v2, %v5841_v54  ;;  %v7679_v0 = vpop.f32.mrb[161].mxu1 }
 0xcdf   :  { %vm5845_vm1 = vcmp.gt.f32.partialorder %v5842_v28, 0.0  ;;  %v5846_v14 = vmul.f32 0.1, %v5842_v28 }
 0xce1   :  { %v5847_v57 = vsel %vm5845_vm1, %v5842_v28, %v5846_v14 }
 0xce2   :  { %7697 = vmatmul.mubr.msk.f32.vlgmr.msra.gmra.mrb[160].mxu0 %vm5863_vm2, %v5847_v57 }
 0xce3   :  { %7703 = vmatprep.mubr.msk.f32.mxu0 %vm8437_vm0, %v8436_v1  ;;  %7744 = vmatpush3.bf16.msra.mxu0 %v7743_v58  ;;  %vm5949_vm0 = vcmask 130048  }
 0xdb5   :  { %v5933_v6 = vpop.f32.mrb[160].mxu0 }
 0xdb6   :  { %v5934_v8 = vadd.f32 %v6584_v4, %v5933_v6  ;;  %v7698_v9 = vpop.f32.mrb[161].mxu0 }
 0xdb8   :  { %vm5937_vm3 = vcmp.gt.f32.partialorder %v5934_v8, 0.0  ;;  %v5938_v36 = vmul.f32 0.1, %v5934_v8 }
 0xdba   :  { %v5939_v1 = vsel %vm5937_vm3, %v5934_v8, %v5938_v36 }
 0xdbb   :  { %7704 = vmatmul.mubr.msk.f32.vlgmr.msra.gmra.mrb[162].mxu0 %vm5949_vm0, %v5939_v1 }
 0xe8e   :  { %v6019_v15 = vpop.f32.mrb[162].mxu0 }
 0xe8f   :  { %v6020_v26 = vadd.f32 %v6586_v11, %v6019_v15  ;;  %v7705_v5 = vpop.f32.mrb[163].mxu0 }
 0xe91   :  { %6024 = vst.msk [vmem:[%s9610_s22] sm:$0x3] %vm6023_vm4, %v6020_v26 }
 0xe92   :  { %6029 = vsyncpa [#allocation6], 1 }
 0xe93   :  { %6030 = vsyncpa [#allocation8], 1 }
 0xe94   :  { %6031 = vsyncpa [#allocation11], 1 }
 0xe95   :  { %6032 = vsyncpa [#allocation14], 1 }
 0xe96   :  { %6033 = vsyncpa [#allocation17], 1 }
 0xe97   :  { %6034 = vsyncpa [#allocation20], 1 }
 0xe98   :  { %6035 = vsyncpa [#allocation23], 1 }

</bundles_post_ra>
